<compile_context>
chip_gen: v7x
topology: tpu7x:2x2x1
jax: 0.10.0
libtpu: 0.0.40
codegen_flags: <defaults>
</compile_context>

<pallas_src>
import functools

import jax
import jax.numpy as jnp
from jax.experimental import pallas as pl
from jax.experimental.pallas import tpu as pltpu


# bf16 GEMM inputs (MXU-native on v5e/v6e/v7x); accumulation stays f32.
DT = jnp.bfloat16


def _round_up(x, m):
    return (x + m - 1) // m * m


# ----------------------------------------------------------------------------
# Pallas kernels
# ----------------------------------------------------------------------------
def _conv_pool_kernel(a_ref, w_ref, b_ref, o_ref, *, hw: int, ipb: int):
    """Fused conv-as-GEMM + bias + ReLU + 2x2 maxpool.  Single K step (nk==1
    fast path: no accumulator scratch).

    a:(ipb*hw, K) bf16 im2col rows, per image ordered (hy, wx, ho, wo) so the
      4 max-pool partners of pooled pixel (ho, wo) sit in 4 contiguous
      quarter-slices of the per-image chunk.
    w:(K, C) bf16 resident, b:(1, C) f32, o:(ipb*hw//4, C) bf16.
    """
    r = jnp.dot(a_ref[...], w_ref[...], preferred_element_type=jnp.float32)
    r = jnp.maximum(r + b_ref[...], 0.0)
    q = hw // 4
    for im in range(ipb):                       # static unroll
        base = im * hw
        r00 = r[base + 0 * q: base + 1 * q]     # (hy=0, wx=0)
        r01 = r[base + 1 * q: base + 2 * q]     # (hy=0, wx=1)
        r10 = r[base + 2 * q: base + 3 * q]     # (hy=1, wx=0)
        r11 = r[base + 3 * q: base + 4 * q]     # (hy=1, wx=1)
        pooled = jnp.maximum(jnp.maximum(r00, r01), jnp.maximum(r10, r11))
        o_ref[pl.ds(im * q, q), :] = pooled.astype(o_ref.dtype)


def _fc_fused_kernel(a_ref, w1_ref, b1_ref, w2_ref, b2_ref, o_ref, acc_ref):
    """K-tiled fc1 GEMM with fused bias+ReLU and fc2 GEMM+bias in the epilogue.

    a:(tm,tk) w1:(tk,H1) b1:(1,H1) w2:(H1,NC) b2:(1,NC) o:(tm,NC) acc f32.
    Grid = (M tiles, K tiles); K axis is the reduction ("arbitrary").
    """
    k = pl.program_id(1)

    @pl.when(k == 0)
    def _():
        acc_ref[...] = jnp.zeros_like(acc_ref)

    acc_ref[...] += jnp.dot(a_ref[...], w1_ref[...],
                            preferred_element_type=jnp.float32)

    @pl.when(k == pl.num_programs(1) - 1)
    def _():
        h = jnp.maximum(acc_ref[...] + b1_ref[...], 0.0)
        logits = jnp.dot(h.astype(w2_ref.dtype), w2_ref[...],
                         preferred_element_type=jnp.float32) + b2_ref[...]
        o_ref[...] = logits.astype(o_ref.dtype)


# ----------------------------------------------------------------------------
# Pallas wrappers
# ----------------------------------------------------------------------------
def _pick_images_per_block(n_img, hw, max_rows=2048):
    """Pack several images per grid step (amortize step overhead) while keeping
    >=2 grid steps when possible (v7x has two TensorCores)."""
    divs = [d for d in range(1, n_img + 1)
            if n_img % d == 0 and d * hw <= max_rows]
    multi = [d for d in divs if n_img // d >= 2]
    return max(multi) if multi else max(divs)


def conv_pool_gemm(a, w, b, *, n_img: int, hw: int):
    """Fused conv(3x3, pad 1) + bias + ReLU + 2x2 maxpool, im2col-GEMM form.

    a:(n_img*hw, K) bf16 pool-partner-ordered patches; w:(K, C) bf16; b:(1, C)
    f32.  Returns (n_img*hw//4, C) bf16, rows in (n, ho, wo) order.
    """
    M, K = a.shape
    C = w.shape[1]
    assert M == n_img * hw
    # TODO(synk): hw % 32 != 0 (e.g. the 1-channel 28x28 -> 7x7 MNIST branch)
    #             needs row padding of the pooled output blocks; unsupported.
    assert hw % 32 == 0, "fused pool tiling needs hw % 32 == 0"

    ipb = _pick_images_per_block(n_img, hw)
    tm = ipb * hw
    kernel = functools.partial(_conv_pool_kernel, hw=hw, ipb=ipb)
    return pl.pallas_call(
        kernel,
        out_shape=jax.ShapeDtypeStruct((M // 4, C), DT),
        grid=(M // tm,),
        in_specs=[
            pl.BlockSpec((tm, K), lambda i: (i, 0)),
            pl.BlockSpec((K, C), lambda i: (0, 0)),      # resident weight
            pl.BlockSpec((1, C), lambda i: (0, 0)),      # resident bias
        ],
        out_specs=pl.BlockSpec((tm // 4, C), lambda i: (i, 0)),
        compiler_params=pltpu.CompilerParams(
            dimension_semantics=("parallel",)),
    )(a, w, b)


def fc_fused(flat, w1, b1, w2, b2, *, tm: int = 512, tk: int = 2048):
    """logits = relu(flat @ w1 + b1) @ w2 + b2, one pallas_call (fc2 fused)."""
    M, K = flat.shape
    H1 = w1.shape[1]
    NC = w2.shape[1]
    flat = flat.astype(DT)

    tm = min(tm, _round_up(M, 8))
    Mp = _round_up(M, tm)
    if Mp != M:
        flat = jnp.pad(flat, ((0, Mp - M), (0, 0)))
    if K % tk != 0:
        tk = K
    nk = K // tk

    out = pl.pallas_call(
        _fc_fused_kernel,
        out_shape=jax.ShapeDtypeStruct((Mp, NC), jnp.float32),
        grid=(Mp // tm, nk),
        in_specs=[
            pl.BlockSpec((tm, tk), lambda i, k: (i, k)),
            pl.BlockSpec((tk, H1), lambda i, k: (k, 0)),
            pl.BlockSpec((1, H1), lambda i, k: (0, 0)),
            pl.BlockSpec((H1, NC), lambda i, k: (0, 0)),   # fc2 weight resident
            pl.BlockSpec((1, NC), lambda i, k: (0, 0)),
        ],
        out_specs=pl.BlockSpec((tm, NC), lambda i, k: (i, 0)),
        scratch_shapes=[pltpu.VMEM((tm, H1), jnp.float32)],
        compiler_params=pltpu.CompilerParams(
            dimension_semantics=("parallel", "arbitrary")),
    )(flat, w1, b1.reshape(1, H1), w2, b2.reshape(1, NC))
    return out[:M] if Mp != M else out


# ----------------------------------------------------------------------------
# Conv-as-GEMM glue (XLA side, bf16)
# ----------------------------------------------------------------------------
def _im2col_pool_order(x):
    """x:(N,H,W,C) bf16 -> (N*H*W, 9*C) patches, per image row order
    (hy, wx, ho, wo) so pooling partners are contiguous quarter-blocks."""
    N, H, W, C = x.shape
    xp = jnp.pad(x, ((0, 0), (1, 1), (1, 1), (0, 0)))
    taps = [xp[:, ky:ky + H, kx:kx + W, :] for ky in range(3) for kx in range(3)]
    p = jnp.stack(taps, axis=3).reshape(N, H, W, 9 * C)
    p = p.reshape(N, H // 2, 2, W // 2, 2, 9 * C)
    p = jnp.transpose(p, (0, 2, 4, 1, 3, 5))          # (N, hy, wx, ho, wo, 9C)
    return p.reshape(N * H * W, 9 * C)


# ----------------------------------------------------------------------------
# Parameter preparation (one-time): transposes / permutations / casts
# ----------------------------------------------------------------------------
def prepare_params(params):
    """PyTorch-layout params -> kernel-ready layouts (done once, outside jit)."""
    w1, w2 = params["w1"], params["w2"]
    Cin, C1, C2 = w1.shape[1], w1.shape[0], w2.shape[0]

    # conv weights: (Cout,Cin,3,3) -> (9*Cin, Cout) tap-major, bf16, unpadded.
    wm1 = jnp.transpose(w1, (2, 3, 1, 0)).reshape(9 * Cin, C1).astype(DT)
    wm2 = jnp.transpose(w2, (2, 3, 1, 0)).reshape(9 * C1, C2).astype(DT)

    # fc1: pre-transpose and fold the PyTorch (C,H,W) flatten order into the
    # rows so the forward flattens NHWC (h,w,c) with no activation permute.
    wfc1 = params["wfc1"]                        # (512, fc_in)
    fc_out, fc_in = wfc1.shape
    side = int(round((fc_in // C2) ** 0.5))
    wt = wfc1.T.reshape(C2, side, side, fc_out)          # rows indexed (c,h,w)
    wfc1m = jnp.transpose(wt, (1, 2, 0, 3)).reshape(fc_in, fc_out).astype(DT)

    wfc2m = params["wfc2"].T.astype(DT)          # (512, n_classes)

    return {
        "wm1": wm1, "b1": params["b1"].astype(jnp.float32),
        "wm2": wm2, "b2": params["b2"].astype(jnp.float32),
        "wfc1m": wfc1m, "bfc1": params["bfc1"].astype(jnp.float32),
        "wfc2m": wfc2m, "bfc2": params["bfc2"].astype(jnp.float32),
    }


# ----------------------------------------------------------------------------
# Full forward pass
# ----------------------------------------------------------------------------
def cnn_forward(x_nchw, p, *, n_classes: int):
    """x_nchw: (N, Cin, H, W) float32 -> logits (N, n_classes) float32."""
    N, _, H, W = x_nchw.shape
    x = jnp.transpose(x_nchw, (0, 2, 3, 1)).astype(DT)    # NHWC, bf16 (once)

    # conv1 + bias + ReLU + pool (fused)   -> (N*(H/2)*(W/2), 32) bf16
    a1 = _im2col_pool_order(x)
    C1 = p["wm1"].shape[1]
    y1 = conv_pool_gemm(a1, p["wm1"], p["b1"].reshape(1, C1),
                        n_img=N, hw=H * W)
    x2 = y1.reshape(N, H // 2, W // 2, C1)

    # conv2 + bias + ReLU + pool (fused)   -> (N*(H/4)*(W/4), 64) bf16
    a2 = _im2col_pool_order(x2)
    C2 = p["wm2"].shape[1]
    y2 = conv_pool_gemm(a2, p["wm2"], p["b2"].reshape(1, C2),
                        n_img=N, hw=(H // 2) * (W // 2))

    # fc1 (+ReLU) and fc2 fused into one kernel.  Flatten is (h,w,c) order;
    # fc1's weight rows were pre-permuted to match.
    flat = y2.reshape(N, (H // 4) * (W // 4) * C2)
    logits = fc_fused(flat, p["wfc1m"], p["bfc1"], p["wfc2m"], p["bfc2"])
    return logits[:, :n_classes]


# ----------------------------------------------------------------------------
# Params / reference / main
# ----------------------------------------------------------------------------
def init_params(key, n_channels=3, n_classes=10):
    ks = jax.random.split(key, 8)
    s = 0.05
    fc_in = 64 * 8 * 8 if n_channels == 3 else 64 * 7 * 7
    return {
        "w1": s * jax.random.normal(ks[0], (32, n_channels, 3, 3), jnp.float32),
        "b1": s * jax.random.normal(ks[1], (32,), jnp.float32),
        "w2": s * jax.random.normal(ks[2], (64, 32, 3, 3), jnp.float32),
        "b2": s * jax.random.normal(ks[3], (64,), jnp.float32),
        "wfc1": s * jax.random.normal(ks[4], (512, fc_in), jnp.float32),
        "bfc1": s * jax.random.normal(ks[5], (512,), jnp.float32),
        "wfc2": s * jax.random.normal(ks[6], (n_classes, 512), jnp.float32),
        "bfc2": s * jax.random.normal(ks[7], (n_classes,), jnp.float32),
    }


def _ref_pool_nchw(x):
    N, C, H, W = x.shape
    return x.reshape(N, C, H // 2, 2, W // 2, 2).max(axis=(3, 5))


def reference_forward(x_nchw, params):
    dn = ("NCHW", "OIHW", "NCHW")
    y = jax.lax.conv_general_dilated(x_nchw, params["w1"], (1, 1),
                                     ((1, 1), (1, 1)), dimension_numbers=dn)
    y = jax.nn.relu(y + params["b1"][None, :, None, None])
    y = _ref_pool_nchw(y)
    y = jax.lax.conv_general_dilated(y, params["w2"], (1, 1),
                                     ((1, 1), (1, 1)), dimension_numbers=dn)
    y = jax.nn.relu(y + params["b2"][None, :, None, None])
    y = _ref_pool_nchw(y)
    flat = y.reshape(y.shape[0], -1)                     # PyTorch (C,H,W) order
    h = jax.nn.relu(flat @ params["wfc1"].T + params["bfc1"])
    return h @ params["wfc2"].T + params["bfc2"]


if __name__ == "__main__":
    key = jax.random.PRNGKey(0)
    k_x, k_p = jax.random.split(key)

    n_channels, n_classes, batch = 3, 10, 2
    x = jax.random.normal(k_x, (batch, n_channels, 32, 32), jnp.float32)
    raw_params = init_params(k_p, n_channels, n_classes)
    params = prepare_params(raw_params)

    forward = jax.jit(functools.partial(cnn_forward, n_classes=n_classes))
    logits = jax.block_until_ready(forward(x, params))

    assert logits.shape == (batch, n_classes), logits.shape
    assert jnp.all(jnp.isfinite(logits))

    # bf16 GEMM inputs vs the f32 reference -> loosened tolerance.
    ref = reference_forward(x, raw_params)
    assert jnp.allclose(logits, ref, atol=5e-2, rtol=5e-2), (
        float(jnp.max(jnp.abs(logits - ref))))

    print("KERNEL_OK")
</pallas_src>

<mosaic_0001>
module attributes {stable_mosaic.version = 11 : i64} {
  func.func @_conv_pool_kernel(%arg0: i32, %arg1: memref<1024x27xbf16, #tpu.memory_space<vmem>>, %arg2: memref<27x32xbf16, #tpu.memory_space<vmem>>, %arg3: memref<1x32xf32, #tpu.memory_space<vmem>>, %arg4: memref<256x32xbf16, #tpu.memory_space<vmem>>) attributes {dimension_semantics = [#tpu.dimension_semantics<parallel>], iteration_bounds = array<i64: 2>, scalar_prefetch = 0 : i64, scratch_operands = 0 : i64, tpu.core_type = #tpu.core_type<tc>, window_params = [{transform_indices = @transform_0, window_bounds = array<i64: 1024, 27>}, {pipeline_mode = #tpu.pipeline_mode<synchronous>, transform_indices = @transform_1, window_bounds = array<i64: 27, 32>}, {pipeline_mode = #tpu.pipeline_mode<synchronous>, transform_indices = @transform_2, window_bounds = array<i64: 1, 32>}, {transform_indices = @transform_3, window_bounds = array<i64: 256, 32>}]} {
    %c0 = arith.constant 0 : index
    %c0_0 = arith.constant 0 : index
    %0 = vector.load %arg1[%c0, %c0_0] : memref<1024x27xbf16, #tpu.memory_space<vmem>>, vector<1024x27xbf16>
    %c0_1 = arith.constant 0 : index
    %c0_2 = arith.constant 0 : index
    %1 = vector.load %arg2[%c0_1, %c0_2] : memref<27x32xbf16, #tpu.memory_space<vmem>>, vector<27x32xbf16>
    %cst = arith.constant dense<0.000000e+00> : vector<1024x32xf32>
    %2 = tpu.matmul %0, %1, %cst {dimension_numbers = #tpu.dot_dimension_numbers<[1], [0], [0], [1], [0, 0, 1, 1], [], []>} : vector<1024x27xbf16>, vector<27x32xbf16>, vector<1024x32xf32> -> vector<1024x32xf32>
    %c0_3 = arith.constant 0 : index
    %c0_4 = arith.constant 0 : index
    %3 = vector.load %arg3[%c0_3, %c0_4] : memref<1x32xf32, #tpu.memory_space<vmem>>, vector<1x32xf32>
    %4 = vector.broadcast %3 : vector<1x32xf32> to vector<1024x32xf32>
    %5 = arith.addf %2, %4 : vector<1024x32xf32>
    %cst_5 = arith.constant 0.000000e+00 : f32
    %6 = vector.broadcast %cst_5 : f32 to vector<1024x32xf32>
    %7 = arith.maximumf %5, %6 : vector<1024x32xf32>
    %8 = vector.extract_strided_slice %7 {offsets = [0, 0], sizes = [256, 32], strides = [1, 1]} : vector<1024x32xf32> to vector<256x32xf32>
    %9 = vector.extract_strided_slice %7 {offsets = [256, 0], sizes = [256, 32], strides = [1, 1]} : vector<1024x32xf32> to vector<256x32xf32>
    %10 = vector.extract_strided_slice %7 {offsets = [512, 0], sizes = [256, 32], strides = [1, 1]} : vector<1024x32xf32> to vector<256x32xf32>
    %11 = vector.extract_strided_slice %7 {offsets = [768, 0], sizes = [256, 32], strides = [1, 1]} : vector<1024x32xf32> to vector<256x32xf32>
    %12 = arith.maximumf %8, %9 : vector<256x32xf32>
    %13 = arith.maximumf %10, %11 : vector<256x32xf32>
    %14 = arith.maximumf %12, %13 : vector<256x32xf32>
    %15 = arith.truncf %14 : vector<256x32xf32> to vector<256x32xbf16>
    %c0_6 = arith.constant 0 : index
    %c0_7 = arith.constant 0 : index
    %16 = vector.load %arg4[%c0_6, %c0_7] : memref<256x32xbf16, #tpu.memory_space<vmem>>, vector<256x32xbf16>
    tpu.vector_store %arg4[%c0_6, %c0_7], %15 {strides = array<i32>} : memref<256x32xbf16, #tpu.memory_space<vmem>>, vector<256x32xbf16>,
    return
  }
  func.func @transform_0(%arg0: i32) -> (i32, i32) {
    %c0_i32 = arith.constant 0 : i32
    %c0_i32_0 = arith.constant 0 : i32
    return %arg0, %c0_i32 : i32, i32
  }
  func.func @transform_1(%arg0: i32) -> (i32, i32) {
    %c0_i32 = arith.constant 0 : i32
    %c0_i32_0 = arith.constant 0 : i32
    %c0_i32_1 = arith.constant 0 : i32
    return %c0_i32, %c0_i32_0 : i32, i32
  }
  func.func @transform_2(%arg0: i32) -> (i32, i32) {
    %c0_i32 = arith.constant 0 : i32
    %c0_i32_0 = arith.constant 0 : i32
    %c0_i32_1 = arith.constant 0 : i32
    return %c0_i32, %c0_i32_0 : i32, i32
  }
  func.func @transform_3(%arg0: i32) -> (i32, i32) {
    %c0_i32 = arith.constant 0 : i32
    %c0_i32_0 = arith.constant 0 : i32
    return %arg0, %c0_i32 : i32, i32
  }
}

module attributes {stable_mosaic.version = 11 : i64} {
  func.func @_conv_pool_kernel(%arg0: i32, %arg1: memref<256x288xbf16, #tpu.memory_space<vmem>>, %arg2: memref<288x64xbf16, #tpu.memory_space<vmem>>, %arg3: memref<1x64xf32, #tpu.memory_space<vmem>>, %arg4: memref<64x64xbf16, #tpu.memory_space<vmem>>) attributes {dimension_semantics = [#tpu.dimension_semantics<parallel>], iteration_bounds = array<i64: 2>, scalar_prefetch = 0 : i64, scratch_operands = 0 : i64, tpu.core_type = #tpu.core_type<tc>, window_params = [{transform_indices = @transform_0, window_bounds = array<i64: 256, 288>}, {pipeline_mode = #tpu.pipeline_mode<synchronous>, transform_indices = @transform_1, window_bounds = array<i64: 288, 64>}, {pipeline_mode = #tpu.pipeline_mode<synchronous>, transform_indices = @transform_2, window_bounds = array<i64: 1, 64>}, {transform_indices = @transform_3, window_bounds = array<i64: 64, 64>}]} {
    %c0 = arith.constant 0 : index
    %c0_0 = arith.constant 0 : index
    %0 = vector.load %arg1[%c0, %c0_0] : memref<256x288xbf16, #tpu.memory_space<vmem>>, vector<256x288xbf16>
    %c0_1 = arith.constant 0 : index
    %c0_2 = arith.constant 0 : index
    %1 = vector.load %arg2[%c0_1, %c0_2] : memref<288x64xbf16, #tpu.memory_space<vmem>>, vector<288x64xbf16>
    %cst = arith.constant dense<0.000000e+00> : vector<256x64xf32>
    %2 = tpu.matmul %0, %1, %cst {dimension_numbers = #tpu.dot_dimension_numbers<[1], [0], [0], [1], [0, 0, 1, 1], [], []>} : vector<256x288xbf16>, vector<288x64xbf16>, vector<256x64xf32> -> vector<256x64xf32>
    %c0_3 = arith.constant 0 : index
    %c0_4 = arith.constant 0 : index
    %3 = vector.load %arg3[%c0_3, %c0_4] : memref<1x64xf32, #tpu.memory_space<vmem>>, vector<1x64xf32>
    %4 = vector.broadcast %3 : vector<1x64xf32> to vector<256x64xf32>
    %5 = arith.addf %2, %4 : vector<256x64xf32>
    %cst_5 = arith.constant 0.000000e+00 : f32
    %6 = vector.broadcast %cst_5 : f32 to vector<256x64xf32>
    %7 = arith.maximumf %5, %6 : vector<256x64xf32>
    %8 = vector.extract_strided_slice %7 {offsets = [0, 0], sizes = [64, 64], strides = [1, 1]} : vector<256x64xf32> to vector<64x64xf32>
    %9 = vector.extract_strided_slice %7 {offsets = [64, 0], sizes = [64, 64], strides = [1, 1]} : vector<256x64xf32> to vector<64x64xf32>
    %10 = vector.extract_strided_slice %7 {offsets = [128, 0], sizes = [64, 64], strides = [1, 1]} : vector<256x64xf32> to vector<64x64xf32>
    %11 = vector.extract_strided_slice %7 {offsets = [192, 0], sizes = [64, 64], strides = [1, 1]} : vector<256x64xf32> to vector<64x64xf32>
    %12 = arith.maximumf %8, %9 : vector<64x64xf32>
    %13 = arith.maximumf %10, %11 : vector<64x64xf32>
    %14 = arith.maximumf %12, %13 : vector<64x64xf32>
    %15 = arith.truncf %14 : vector<64x64xf32> to vector<64x64xbf16>
    %c0_6 = arith.constant 0 : index
    %c0_7 = arith.constant 0 : index
    %16 = vector.load %arg4[%c0_6, %c0_7] : memref<64x64xbf16, #tpu.memory_space<vmem>>, vector<64x64xbf16>
    tpu.vector_store %arg4[%c0_6, %c0_7], %15 {strides = array<i32>} : memref<64x64xbf16, #tpu.memory_space<vmem>>, vector<64x64xbf16>,
    return
  }
  func.func @transform_0(%arg0: i32) -> (i32, i32) {
    %c0_i32 = arith.constant 0 : i32
    %c0_i32_0 = arith.constant 0 : i32
    return %arg0, %c0_i32 : i32, i32
  }
  func.func @transform_1(%arg0: i32) -> (i32, i32) {
    %c0_i32 = arith.constant 0 : i32
    %c0_i32_0 = arith.constant 0 : i32
    %c0_i32_1 = arith.constant 0 : i32
    return %c0_i32, %c0_i32_0 : i32, i32
  }
  func.func @transform_2(%arg0: i32) -> (i32, i32) {
    %c0_i32 = arith.constant 0 : i32
    %c0_i32_0 = arith.constant 0 : i32
    %c0_i32_1 = arith.constant 0 : i32
    return %c0_i32, %c0_i32_0 : i32, i32
  }
  func.func @transform_3(%arg0: i32) -> (i32, i32) {
    %c0_i32 = arith.constant 0 : i32
    %c0_i32_0 = arith.constant 0 : i32
    return %arg0, %c0_i32 : i32, i32
  }
}

module attributes {stable_mosaic.version = 11 : i64} {
  func.func @_fc_fused_kernel(%arg0: i32, %arg1: i32, %arg2: memref<8x2048xbf16, #tpu.memory_space<vmem>>, %arg3: memref<2048x512xbf16, #tpu.memory_space<vmem>>, %arg4: memref<1x512xf32, #tpu.memory_space<vmem>>, %arg5: memref<512x10xbf16, #tpu.memory_space<vmem>>, %arg6: memref<1x10xf32, #tpu.memory_space<vmem>>, %arg7: memref<8x10xf32, #tpu.memory_space<vmem>>, %arg8: memref<8x512xf32, #tpu.memory_space<vmem>>) attributes {dimension_semantics = [#tpu.dimension_semantics<parallel>, #tpu.dimension_semantics<arbitrary>], iteration_bounds = array<i64: 1, 2>, scalar_prefetch = 0 : i64, scratch_operands = 1 : i64, tpu.core_type = #tpu.core_type<tc>, window_params = [{transform_indices = @transform_0, window_bounds = array<i64: 8, 2048>}, {transform_indices = @transform_1, window_bounds = array<i64: 2048, 512>}, {pipeline_mode = #tpu.pipeline_mode<synchronous>, transform_indices = @transform_2, window_bounds = array<i64: 1, 512>}, {pipeline_mode = #tpu.pipeline_mode<synchronous>, transform_indices = @transform_3, window_bounds = array<i64: 512, 10>}, {pipeline_mode = #tpu.pipeline_mode<synchronous>, transform_indices = @transform_4, window_bounds = array<i64: 1, 10>}, {transform_indices = @transform_5, window_bounds = array<i64: 8, 10>}]} {
    %c0_i32 = arith.constant 0 : i32
    %0 = arith.cmpi eq, %arg1, %c0_i32 : i32
    %1 = arith.extui %0 : i1 to i32
    %c0_i32_0 = arith.constant 0 : i32
    %2 = arith.cmpi ne, %1, %c0_i32_0 : i32
    scf.if %2 {
      %cst_9 = arith.constant 0.000000e+00 : f32
      %12 = vector.broadcast %cst_9 : f32 to vector<8x512xf32>
      %c0_10 = arith.constant 0 : index
      %c0_11 = arith.constant 0 : index
      %13 = vector.load %arg8[%c0_10, %c0_11] : memref<8x512xf32, #tpu.memory_space<vmem>>, vector<8x512xf32>
      tpu.vector_store %arg8[%c0_10, %c0_11], %12 {strides = array<i32>} : memref<8x512xf32, #tpu.memory_space<vmem>>, vector<8x512xf32>,
    } else {
    }
    %c0 = arith.constant 0 : index
    %c0_1 = arith.constant 0 : index
    %3 = vector.load %arg8[%c0, %c0_1] : memref<8x512xf32, #tpu.memory_space<vmem>>, vector<8x512xf32>
    %c0_2 = arith.constant 0 : index
    %c0_3 = arith.constant 0 : index
    %4 = vector.load %arg2[%c0_2, %c0_3] : memref<8x2048xbf16, #tpu.memory_space<vmem>>, vector<8x2048xbf16>
    %c0_4 = arith.constant 0 : index
    %c0_5 = arith.constant 0 : index
    %5 = vector.load %arg3[%c0_4, %c0_5] : memref<2048x512xbf16, #tpu.memory_space<vmem>>, vector<2048x512xbf16>
    %cst = arith.constant dense<0.000000e+00> : vector<8x512xf32>
    %6 = tpu.matmul %4, %5, %cst {dimension_numbers = #tpu.dot_dimension_numbers<[1], [0], [0], [1], [0, 0, 1, 1], [], []>} : vector<8x2048xbf16>, vector<2048x512xbf16>, vector<8x512xf32> -> vector<8x512xf32>
    %7 = arith.addf %3, %6 : vector<8x512xf32>
    %c0_6 = arith.constant 0 : index
    %c0_7 = arith.constant 0 : index
    %8 = vector.load %arg8[%c0_6, %c0_7] : memref<8x512xf32, #tpu.memory_space<vmem>>, vector<8x512xf32>
    tpu.vector_store %arg8[%c0_6, %c0_7], %7 {strides = array<i32>} : memref<8x512xf32, #tpu.memory_space<vmem>>, vector<8x512xf32>,
    %c1_i32 = arith.constant 1 : i32
    %9 = arith.cmpi eq, %arg1, %c1_i32 : i32
    %10 = arith.extui %9 : i1 to i32
    %c0_i32_8 = arith.constant 0 : i32
    %11 = arith.cmpi ne, %10, %c0_i32_8 : i32
    scf.if %11 {
      %c0_9 = arith.constant 0 : index
      %c0_10 = arith.constant 0 : index
      %12 = vector.load %arg8[%c0_9, %c0_10] : memref<8x512xf32, #tpu.memory_space<vmem>>, vector<8x512xf32>
      %c0_11 = arith.constant 0 : index
      %c0_12 = arith.constant 0 : index
      %13 = vector.load %arg4[%c0_11, %c0_12] : memref<1x512xf32, #tpu.memory_space<vmem>>, vector<1x512xf32>
      %14 = vector.broadcast %13 : vector<1x512xf32> to vector<8x512xf32>
      %15 = arith.addf %12, %14 : vector<8x512xf32>
      %cst_13 = arith.constant 0.000000e+00 : f32
      %16 = vector.broadcast %cst_13 : f32 to vector<8x512xf32>
      %17 = arith.maximumf %15, %16 : vector<8x512xf32>
      %18 = arith.truncf %17 : vector<8x512xf32> to vector<8x512xbf16>
      %c0_14 = arith.constant 0 : index
      %c0_15 = arith.constant 0 : index
      %19 = vector.load %arg5[%c0_14, %c0_15] : memref<512x10xbf16, #tpu.memory_space<vmem>>, vector<512x10xbf16>
      %cst_16 = arith.constant dense<0.000000e+00> : vector<8x10xf32>
      %20 = tpu.matmul %18, %19, %cst_16 {dimension_numbers = #tpu.dot_dimension_numbers<[1], [0], [0], [1], [0, 0, 1, 1], [], []>} : vector<8x512xbf16>, vector<512x10xbf16>, vector<8x10xf32> -> vector<8x10xf32>
      %c0_17 = arith.constant 0 : index
      %c0_18 = arith.constant 0 : index
      %21 = vector.load %arg6[%c0_17, %c0_18] : memref<1x10xf32, #tpu.memory_space<vmem>>, vector<1x10xf32>
      %22 = vector.broadcast %21 : vector<1x10xf32> to vector<8x10xf32>
      %23 = arith.addf %20, %22 : vector<8x10xf32>
      %c0_19 = arith.constant 0 : index
      %c0_20 = arith.constant 0 : index
      %24 = vector.load %arg7[%c0_19, %c0_20] : memref<8x10xf32, #tpu.memory_space<vmem>>, vector<8x10xf32>
      tpu.vector_store %arg7[%c0_19, %c0_20], %23 {strides = array<i32>} : memref<8x10xf32, #tpu.memory_space<vmem>>, vector<8x10xf32>,
    } else {
    }
    return
  }
  func.func @transform_0(%arg0: i32, %arg1: i32) -> (i32, i32) {
    %c0_i32 = arith.constant 0 : i32
    return %arg0, %arg1 : i32, i32
  }
  func.func @transform_1(%arg0: i32, %arg1: i32) -> (i32, i32) {
    %c0_i32 = arith.constant 0 : i32
    %c0_i32_0 = arith.constant 0 : i32
    return %arg1, %c0_i32 : i32, i32
  }
  func.func @transform_2(%arg0: i32, %arg1: i32) -> (i32, i32) {
    %c0_i32 = arith.constant 0 : i32
    %c0_i32_0 = arith.constant 0 : i32
    %c0_i32_1 = arith.constant 0 : i32
    return %c0_i32, %c0_i32_0 : i32, i32
  }
  func.func @transform_3(%arg0: i32, %arg1: i32) -> (i32, i32) {
    %c0_i32 = arith.constant 0 : i32
    %c0_i32_0 = arith.constant 0 : i32
    %c0_i32_1 = arith.constant 0 : i32
    return %c0_i32, %c0_i32_0 : i32, i32
  }
  func.func @transform_4(%arg0: i32, %arg1: i32) -> (i32, i32) {
    %c0_i32 = arith.constant 0 : i32
    %c0_i32_0 = arith.constant 0 : i32
    %c0_i32_1 = arith.constant 0 : i32
    return %c0_i32, %c0_i32_0 : i32, i32
  }
  func.func @transform_5(%arg0: i32, %arg1: i32) -> (i32, i32) {
    %c0_i32 = arith.constant 0 : i32
    %c0_i32_0 = arith.constant 0 : i32
    return %arg0, %c0_i32 : i32, i32
  }
}

</mosaic_0001>

<bundles_post_ra>
// kernel: cnn_forward.3
= control target key start
LH: loop header
LB: loop body
LE: loop exit
PB: predicated region body
PF: predicated region fallthrough
CT: control target
= control target key end

     0   :  { %s2343_s12 = smov 0   ;;  %s3105_s0 = inlined_call_operand.vmem [shape: bf16[2048,27], index: 0, kind: input, shape index: {}]   ;;  %s3106_s1 = inlined_call_operand.vmem [shape: bf16[27,32], index: 1, kind: input, shape index: {}]   ;;  %s3107_s2 = inlined_call_operand.vmem [shape: f32[1,32], index: 2, kind: input, shape index: {}]   ;;  %s3108_s3 = inlined_call_operand.vmem [shape: bf16[512,32], index: 3, kind: output, shape index: {}]  }
   0x1 LB: > { %s1831_s13 = sadd.s32 4294967295, %s2320_s12   ;;  %p1835_p0 = scmp.ge.s32.totalorder %s2320_s12, 1  ;;  %s2320_s12 = sphi %s2343_s12, %s13_s12  }
   0x2   : > { %p138_p1 = scmp.lt.s32.totalorder %s2320_s12, 3 }
   0x4   : > { %p139_p2 = pnand %p1835_p0, %p138_p1 }
   0x6   : > { %142 = sbr.rel (%p139_p2) target bundleno = 385 (0x181), region = 32 }
   0xd   : > { %v2248_v0 = vld [vmem:[%s3106_s1] sm:$0xff]   ;;  %vm838_vm0 = vcmask 1044480   ;;  %v2249_v1 = vld [vmem:[%s3106_s1 + $0x8] sm:$0x3f]   ;;  %vm839_vm1 = vcmask 1045504   ;;  %s1836_s18 = sshll.u32 %s1831_s13, 7 }
   0xe   : > { %2103 = vmatprep.subr.bf16.mxu0 %v2248_v0  ;;  %2235 = vmatprep.subr.bf16.mxu1 %v2248_v0  ;;  %v2322_v2 = vmov 65535   ;;  %p163_p3 = scmp.lt.s32.totalorder %s1836_s18, 255  ;;  %vm645_vm2 = vcmask 220160   ;;  %s2769_s25 = sshll.u32 %s1831_s13, 5  ;;  %vm1742_vm3 = vcmask 257024  }
   0xf   : > { %2104 = vmatpush3.bf16.msra.mxu0 %v2248_v0  ;;  %2237 = vmatpush3.bf16.msra.mxu1 %v2248_v0  ;;  %v840_v3 = vsel %vm838_vm0, 4294967295, %v2322_v2  ;;  %p169_p4 = scmp.lt.s32.totalorder %s2769_s25, 63 }
  0x10   : > { %v841_v4 = vsel %vm839_vm1, %v840_v3, 0  ;;  %s3236_s18 = smov (!%p163_p3, %s1836_s18), 255 }
  0x11   : > { %v843_v5 = vand.u32 %v2249_v1, %v841_v4  ;;  %s1837_s19 = sshll.u32 %s3236_s18, 2  ;;  %s3238_s25 = smov (!%p169_p4, %s2769_s25), 63 }
  0x12   : > { %s2362_s22 = scalar_lea.vmem %s3105_s0, %s1837_s19  ;;  %s1839_s26 = sshll.u32 %s3238_s25, 2 }
  0x13   : > { %2105 = vmatprep.subr.bf16.mxu0 %v843_v5  ;;  %2236 = vmatprep.subr.bf16.mxu1 %v843_v5  ;;  %v2250_v6 = vld [vmem:[%s2362_s22] sm:$0xff]   ;;  %v2252_v8 = vld [vmem:[%s2362_s22 + $0x8] sm:$0xff]   ;;  %v2254_v10 = vld [vmem:[%s2362_s22 + $0x10] sm:$0xff]   ;;  %s2857_s29 = scalar_lea.vmem %s3108_s3, %s1839_s26 }
  0x14   : > { %2106 = vmatpush3.bf16.msra.mxu0 %v843_v5  ;;  %2238 = vmatpush3.bf16.msra.mxu1 %v843_v5  ;;  %v2251_v7 = vld [vmem:[%s2362_s22 + $0x100] sm:$0xff]   ;;  %v2253_v9 = vld [vmem:[%s2362_s22 + $0x108] sm:$0xff]   ;;  %v2255_v11 = vld [vmem:[%s2362_s22 + $0x110] sm:$0xff]  }
  0x15   : > { %2107 = vmatprep.mubr.msk.bf16.mxu0 %vm645_vm2, %v2250_v6  ;;  %2171 = vmatprep.mubr.msk.bf16.mxu1 %vm645_vm2, %v2251_v7  ;;  %v2256_v12 = vld [vmem:[%s2362_s22 + $0x18] sm:$0xff]   ;;  %v2258_v14 = vld [vmem:[%s2362_s22 + $0x20] sm:$0xff]   ;;  %v2260_v16 = vld [vmem:[%s2362_s22 + $0x28] sm:$0xff]  }
  0x16   : > { %v2257_v13 = vld [vmem:[%s2362_s22 + $0x118] sm:$0xff]   ;;  %v2259_v15 = vld [vmem:[%s2362_s22 + $0x120] sm:$0xff]   ;;  %v2261_v17 = vld [vmem:[%s2362_s22 + $0x128] sm:$0xff]  }
  0x17   : > { %2108 = vmatmul.mubr.msk.bf16.vlgmr.msra.gmra.mrb[0].mxu0 %vm645_vm2, %v2252_v8  ;;  %2172 = vmatmul.mubr.msk.bf16.vlgmr.msra.gmra.mrb[0].mxu1 %vm645_vm2, %v2253_v9  ;;  %v2262_v18 = vld [vmem:[%s2362_s22 + $0x30] sm:$0xff]   ;;  %v2264_v20 = vld [vmem:[%s2362_s22 + $0x38] sm:$0xff]   ;;  %v2266_v22 = vld [vmem:[%s2362_s22 + $0x40] sm:$0xff]  }
  0x18   : > { %2111 = vmatprep.mubr.msk.bf16.mxu0 %vm645_vm2, %v2254_v10  ;;  %2175 = vmatprep.mubr.msk.bf16.mxu1 %vm645_vm2, %v2255_v11  ;;  %v2263_v19 = vld [vmem:[%s2362_s22 + $0x130] sm:$0xff]   ;;  %v2265_v21 = vld [vmem:[%s2362_s22 + $0x138] sm:$0xff]   ;;  %v2267_v23 = vld [vmem:[%s2362_s22 + $0x140] sm:$0xff]  }
  0x19   : > { %v2268_v24 = vld [vmem:[%s2362_s22 + $0x48] sm:$0xff]   ;;  %v2270_v26 = vld [vmem:[%s2362_s22 + $0x50] sm:$0xff]   ;;  %v2272_v28 = vld [vmem:[%s2362_s22 + $0x58] sm:$0xff]  }
  0x1a   : > { %v2269_v25 = vld [vmem:[%s2362_s22 + $0x148] sm:$0xff]   ;;  %v2271_v27 = vld [vmem:[%s2362_s22 + $0x150] sm:$0xff]   ;;  %v2273_v29 = vld [vmem:[%s2362_s22 + $0x158] sm:$0xff]  }
  0x1b   : > { %v2274_v30 = vld [vmem:[%s2362_s22 + $0x60] sm:$0xff]   ;;  %v2276_v32 = vld [vmem:[%s2362_s22 + $0x68] sm:$0xff]   ;;  %v2278_v34 = vld [vmem:[%s2362_s22 + $0x70] sm:$0xff]  }
  0x1c   : > { %v2275_v31 = vld [vmem:[%s2362_s22 + $0x160] sm:$0xff]   ;;  %v2277_v33 = vld [vmem:[%s2362_s22 + $0x168] sm:$0xff]   ;;  %v2279_v35 = vld [vmem:[%s2362_s22 + $0x170] sm:$0xff]  }
  0x1d   : > { %v2280_v36 = vld [vmem:[%s2362_s22 + $0x78] sm:$0xff]   ;;  %v2282_v38 = vld [vmem:[%s2362_s22 + $0x80] sm:$0xff]   ;;  %v2284_v40 = vld [vmem:[%s2362_s22 + $0x88] sm:$0xff]  }
  0x1e   : > { %v2281_v37 = vld [vmem:[%s2362_s22 + $0x178] sm:$0xff]   ;;  %v2283_v39 = vld [vmem:[%s2362_s22 + $0x180] sm:$0xff]   ;;  %v2285_v41 = vld [vmem:[%s2362_s22 + $0x188] sm:$0xff]  }
  0x1f   : > { %2112 = vmatmul.mubr.msk.bf16.gmra.mrb[4].mxu0 %vm645_vm2, %v2256_v12  ;;  %2176 = vmatmul.mubr.msk.bf16.gmra.mrb[4].mxu1 %vm645_vm2, %v2257_v13  ;;  %v2286_v42 = vld [vmem:[%s2362_s22 + $0x90] sm:$0xff]   ;;  %v2288_v44 = vld [vmem:[%s2362_s22 + $0x98] sm:$0xff]   ;;  %v2290_v46 = vld [vmem:[%s2362_s22 + $0xa0] sm:$0xff]  }
  0x20   : > { %2115 = vmatprep.mubr.msk.bf16.mxu0 %vm645_vm2, %v2258_v14  ;;  %2179 = vmatprep.mubr.msk.bf16.mxu1 %vm645_vm2, %v2259_v15  ;;  %v2287_v43 = vld [vmem:[%s2362_s22 + $0x190] sm:$0xff]   ;;  %v2289_v45 = vld [vmem:[%s2362_s22 + $0x198] sm:$0xff]   ;;  %v2291_v47 = vld [vmem:[%s2362_s22 + $0x1a0] sm:$0xff]  }
  0x21   : > { %v2292_v48 = vld [vmem:[%s2362_s22 + $0xa8] sm:$0xff]   ;;  %v2294_v50 = vld [vmem:[%s2362_s22 + $0xb0] sm:$0xff]   ;;  %v2296_v52 = vld [vmem:[%s2362_s22 + $0xb8] sm:$0xff]  }
  0x22   : > { %v2293_v49 = vld [vmem:[%s2362_s22 + $0x1a8] sm:$0xff]   ;;  %v2295_v51 = vld [vmem:[%s2362_s22 + $0x1b0] sm:$0xff]   ;;  %v2297_v53 = vld [vmem:[%s2362_s22 + $0x1b8] sm:$0xff]  }
  0x23   : > { %v2298_v54 = vld [vmem:[%s2362_s22 + $0xc0] sm:$0xff]   ;;  %v2300_v56 = vld [vmem:[%s2362_s22 + $0xc8] sm:$0xff]   ;;  %v2302_v58 = vld [vmem:[%s2362_s22 + $0xd0] sm:$0xff]  }
  0x24   : > { %v2299_v55 = vld [vmem:[%s2362_s22 + $0x1c0] sm:$0xff]   ;;  %v2301_v57 = vld [vmem:[%s2362_s22 + $0x1c8] sm:$0xff]   ;;  %v2303_v59 = vld [vmem:[%s2362_s22 + $0x1d0] sm:$0xff]  }
  0x25   : > { %v2304_v60 = vld [vmem:[%s2362_s22 + $0xd8] sm:$0xff]   ;;  %v2306_v62 = vld [vmem:[%s2362_s22 + $0xe0] sm:$0xff]   ;;  %v2308_v0 = vld [vmem:[%s2362_s22 + $0xe8] sm:$0xff]  }
  0x26   : > { %v2305_v61 = vld [vmem:[%s2362_s22 + $0x1d8] sm:$0xff]   ;;  %v2307_v63 = vld [vmem:[%s2362_s22 + $0x1e0] sm:$0xff]   ;;  %v2309_v1 = vld [vmem:[%s2362_s22 + $0x1e8] sm:$0xff]  }
  0x27   : > { %2116 = vmatmul.mubr.msk.bf16.gmra.mrb[8].mxu0 %vm645_vm2, %v2260_v16  ;;  %2180 = vmatmul.mubr.msk.bf16.gmra.mrb[8].mxu1 %vm645_vm2, %v2261_v17  ;;  %v2310_v2 = vld [vmem:[%s2362_s22 + $0xf0] sm:$0xff]   ;;  %v2312_v4 = vld [vmem:[%s2362_s22 + $0xf8] sm:$0xff]  }
  0x28   : > { %2119 = vmatprep.mubr.msk.bf16.mxu0 %vm645_vm2, %v2262_v18  ;;  %2183 = vmatprep.mubr.msk.bf16.mxu1 %vm645_vm2, %v2263_v19  ;;  %v2311_v3 = vld [vmem:[%s2362_s22 + $0x1f0] sm:$0xff]   ;;  %v2313_v5 = vld [vmem:[%s2362_s22 + $0x1f8] sm:$0xff]  }
  0x2f   : > { %2120 = vmatmul.mubr.msk.bf16.gmra.mrb[12].mxu0 %vm645_vm2, %v2264_v20  ;;  %2184 = vmatmul.mubr.msk.bf16.gmra.mrb[12].mxu1 %vm645_vm2, %v2265_v21 }
  0x30   : > { %2123 = vmatprep.mubr.msk.bf16.mxu0 %vm645_vm2, %v2266_v22  ;;  %2187 = vmatprep.mubr.msk.bf16.mxu1 %vm645_vm2, %v2267_v23 }
  0x37   : > { %2124 = vmatmul.mubr.msk.bf16.gmra.mrb[16].mxu0 %vm645_vm2, %v2268_v24  ;;  %2188 = vmatmul.mubr.msk.bf16.gmra.mrb[16].mxu1 %vm645_vm2, %v2269_v25 }
  0x38   : > { %2127 = vmatprep.mubr.msk.bf16.mxu0 %vm645_vm2, %v2270_v26  ;;  %2191 = vmatprep.mubr.msk.bf16.mxu1 %vm645_vm2, %v2271_v27 }
  0x3f   : > { %2128 = vmatmul.mubr.msk.bf16.gmra.mrb[20].mxu0 %vm645_vm2, %v2272_v28  ;;  %2192 = vmatmul.mubr.msk.bf16.gmra.mrb[20].mxu1 %vm645_vm2, %v2273_v29 }
  0x40   : > { %2131 = vmatprep.mubr.msk.bf16.mxu0 %vm645_vm2, %v2274_v30  ;;  %2195 = vmatprep.mubr.msk.bf16.mxu1 %vm645_vm2, %v2275_v31 }
  0x47   : > { %2132 = vmatmul.mubr.msk.bf16.gmra.mrb[24].mxu0 %vm645_vm2, %v2276_v32  ;;  %2196 = vmatmul.mubr.msk.bf16.gmra.mrb[24].mxu1 %vm645_vm2, %v2277_v33 }
  0x48   : > { %2135 = vmatprep.mubr.msk.bf16.mxu0 %vm645_vm2, %v2278_v34  ;;  %2199 = vmatprep.mubr.msk.bf16.mxu1 %vm645_vm2, %v2279_v35 }
  0x4f   : > { %2136 = vmatmul.mubr.msk.bf16.gmra.mrb[28].mxu0 %vm645_vm2, %v2280_v36  ;;  %2200 = vmatmul.mubr.msk.bf16.gmra.mrb[28].mxu1 %vm645_vm2, %v2281_v37 }
  0x50   : > { %2139 = vmatprep.mubr.msk.bf16.mxu0 %vm645_vm2, %v2282_v38  ;;  %2203 = vmatprep.mubr.msk.bf16.mxu1 %vm645_vm2, %v2283_v39  ;;  %v2511_v38 = vld [vmem:[%s3107_s2] ss:$0 sm:$0xff] }
  0x57   : > { %2140 = vmatmul.mubr.msk.bf16.gmra.mrb[32].mxu0 %vm645_vm2, %v2284_v40  ;;  %2204 = vmatmul.mubr.msk.bf16.gmra.mrb[32].mxu1 %vm645_vm2, %v2285_v41 }
  0x58   : > { %2143 = vmatprep.mubr.msk.bf16.mxu0 %vm645_vm2, %v2286_v42  ;;  %2207 = vmatprep.mubr.msk.bf16.mxu1 %vm645_vm2, %v2287_v43 }
  0x5f   : > { %2144 = vmatmul.mubr.msk.bf16.gmra.mrb[36].mxu0 %vm645_vm2, %v2288_v44  ;;  %2208 = vmatmul.mubr.msk.bf16.gmra.mrb[36].mxu1 %vm645_vm2, %v2289_v45 }
  0x60   : > { %2147 = vmatprep.mubr.msk.bf16.mxu0 %vm645_vm2, %v2290_v46  ;;  %2211 = vmatprep.mubr.msk.bf16.mxu1 %vm645_vm2, %v2291_v47 }
  0x67   : > { %2148 = vmatmul.mubr.msk.bf16.gmra.mrb[40].mxu0 %vm645_vm2, %v2292_v48  ;;  %2212 = vmatmul.mubr.msk.bf16.gmra.mrb[40].mxu1 %vm645_vm2, %v2293_v49 }
  0x68   : > { %2151 = vmatprep.mubr.msk.bf16.mxu0 %vm645_vm2, %v2294_v50  ;;  %2215 = vmatprep.mubr.msk.bf16.mxu1 %vm645_vm2, %v2295_v51 }
  0x6f   : > { %2152 = vmatmul.mubr.msk.bf16.gmra.mrb[44].mxu0 %vm645_vm2, %v2296_v52  ;;  %2216 = vmatmul.mubr.msk.bf16.gmra.mrb[44].mxu1 %vm645_vm2, %v2297_v53 }
  0x70   : > { %2155 = vmatprep.mubr.msk.bf16.mxu0 %vm645_vm2, %v2298_v54  ;;  %2219 = vmatprep.mubr.msk.bf16.mxu1 %vm645_vm2, %v2299_v55 }
  0x77   : > { %2156 = vmatmul.mubr.msk.bf16.gmra.mrb[48].mxu0 %vm645_vm2, %v2300_v56  ;;  %2220 = vmatmul.mubr.msk.bf16.gmra.mrb[48].mxu1 %vm645_vm2, %v2301_v57 }
  0x78   : > { %2159 = vmatprep.mubr.msk.bf16.mxu0 %vm645_vm2, %v2302_v58  ;;  %2223 = vmatprep.mubr.msk.bf16.mxu1 %vm645_vm2, %v2303_v59 }
  0x7f   : > { %2160 = vmatmul.mubr.msk.bf16.gmra.mrb[52].mxu0 %vm645_vm2, %v2304_v60  ;;  %2224 = vmatmul.mubr.msk.bf16.gmra.mrb[52].mxu1 %vm645_vm2, %v2305_v61 }
  0x80   : > { %2163 = vmatprep.mubr.msk.bf16.mxu0 %vm645_vm2, %v2306_v62  ;;  %2227 = vmatprep.mubr.msk.bf16.mxu1 %vm645_vm2, %v2307_v63 }
  0x87   : > { %2164 = vmatmul.mubr.msk.bf16.gmra.mrb[56].mxu0 %vm645_vm2, %v2308_v0  ;;  %2228 = vmatmul.mubr.msk.bf16.gmra.mrb[56].mxu1 %vm645_vm2, %v2309_v1 }
  0x88   : > { %2167 = vmatprep.mubr.msk.bf16.mxu0 %vm645_vm2, %v2310_v2  ;;  %2231 = vmatprep.mubr.msk.bf16.mxu1 %vm645_vm2, %v2311_v3 }
  0x8f   : > { %2168 = vmatmul.mubr.msk.bf16.gmra.mrb[60].mxu0 %vm645_vm2, %v2312_v4  ;;  %2232 = vmatmul.mubr.msk.bf16.gmra.mrb[60].mxu1 %vm645_vm2, %v2313_v5 }
  0xea   : > { %v2109_v6 = vpop.f32.mrb[0].mxu0  ;;  %v2173_v7 = vpop.f32.mrb[0].mxu1 }
  0xeb   : > { %v879_v8 = vpop.f32.mrb[1].mxu0  ;;  %v1135_v9 = vpop.f32.mrb[1].mxu1  ;;  %v2524_v44 = vadd.f32 %v2109_v6, %v2511_v38  ;;  %v2527_v45 = vadd.f32 %v2173_v7, %v2511_v38 }
  0xec   : > { %v2110_v10 = vpop.f32.mrb[2].mxu0  ;;  %v2174_v11 = vpop.f32.mrb[2].mxu1  ;;  %v2530_v46 = vadd.f32 %v2511_v38, %v879_v8  ;;  %v2537_v49 = vadd.f32 %v2511_v38, %v1135_v9 }
  0xed   : > { %v882_v12 = vpop.f32.mrb[3].mxu0  ;;  %v1138_v13 = vpop.f32.mrb[3].mxu1  ;;  %v2540_v50 = vadd.f32 %v2110_v10, %v2511_v38  ;;  %v2543_v51 = vadd.f32 %v2174_v11, %v2511_v38 }
  0xee   : > { %v2546_v52 = vadd.f32 %v2511_v38, %v882_v12  ;;  %v2551_v54 = vadd.f32 %v2511_v38, %v1138_v13 }
  0xf2   : > { %v2113_v14 = vpop.f32.mrb[4].mxu0  ;;  %v2177_v15 = vpop.f32.mrb[4].mxu1 }
  0xf3   : > { %v895_v16 = vpop.f32.mrb[5].mxu0  ;;  %v1151_v17 = vpop.f32.mrb[5].mxu1  ;;  %v2554_v55 = vadd.f32 %v2113_v14, %v2511_v38  ;;  %v2567_v1 = vadd.f32 %v2177_v15, %v2511_v38 }
  0xf4   : > { %v2114_v18 = vpop.f32.mrb[6].mxu0  ;;  %v2178_v19 = vpop.f32.mrb[6].mxu1  ;;  %v2570_v2 = vadd.f32 %v2511_v38, %v895_v16  ;;  %v2573_v3 = vadd.f32 %v2511_v38, %v1151_v17 }
  0xf5   : > { %v898_v20 = vpop.f32.mrb[7].mxu0  ;;  %v1154_v21 = vpop.f32.mrb[7].mxu1  ;;  %v2581_v7 = vadd.f32 %v2114_v18, %v2511_v38  ;;  %v2584_v8 = vadd.f32 %v2178_v19, %v2511_v38 }
  0xf6   : > { %v2587_v9 = vadd.f32 %v2511_v38, %v898_v20  ;;  %v2594_v12 = vadd.f32 %v2511_v38, %v1154_v21 }
  0xfa   : > { %v2117_v22 = vpop.f32.mrb[8].mxu0  ;;  %v2181_v23 = vpop.f32.mrb[8].mxu1 }
  0xfb   : > { %v911_v24 = vpop.f32.mrb[9].mxu0  ;;  %v1167_v25 = vpop.f32.mrb[9].mxu1  ;;  %v2597_v13 = vadd.f32 %v2117_v22, %v2511_v38  ;;  %v2600_v14 = vadd.f32 %v2181_v23, %v2511_v38 }
  0xfc   : > { %v2118_v26 = vpop.f32.mrb[10].mxu0  ;;  %v2182_v27 = vpop.f32.mrb[10].mxu1  ;;  %v2603_v15 = vadd.f32 %v2511_v38, %v911_v24  ;;  %v2610_v18 = vadd.f32 %v2511_v38, %v1167_v25 }
  0xfd   : > { %v914_v28 = vpop.f32.mrb[11].mxu0  ;;  %v1170_v29 = vpop.f32.mrb[11].mxu1  ;;  %v2613_v19 = vadd.f32 %v2118_v26, %v2511_v38  ;;  %v2616_v20 = vadd.f32 %v2182_v27, %v2511_v38 }
  0xfe   : > { %v2619_v21 = vadd.f32 %v2511_v38, %v914_v28  ;;  %v2627_v25 = vadd.f32 %v2511_v38, %v1170_v29 }
 0x102   : > { %v2492_v30 = vpop.f32.mrb[12].mxu0  ;;  %v2494_v31 = vpop.f32.mrb[12].mxu1 }
 0x103   : > { %v2496_v32 = vpop.f32.mrb[13].mxu0  ;;  %v2498_v33 = vpop.f32.mrb[13].mxu1  ;;  %v2634_v28 = vadd.f32 %v2492_v30, %v2511_v38  ;;  %v2647_v62 = vadd.f32 %v2494_v31, %v2511_v38 }
 0x104   : > { %v2500_v34 = vpop.f32.mrb[14].mxu0  ;;  %v2502_v35 = vpop.f32.mrb[14].mxu1  ;;  %v2651_v24 = vadd.f32 %v2511_v38, %v2496_v32  ;;  %v2655_v29 = vadd.f32 %v2511_v38, %v2498_v33 }
 0x105   : > { %v2504_v36 = vpop.f32.mrb[15].mxu0  ;;  %v2506_v37 = vpop.f32.mrb[15].mxu1  ;;  %3132 = vst [vmem:[#allocation2_spill] sm:$0xff] %v2634_v28  ;;  %v2660_v27 = vadd.f32 %v2500_v34, %v2511_v38  ;;  %v2664_v31 = vadd.f32 %v2502_v35, %v2511_v38 }
 0x106   : > { %3133 = vst [vmem:[#allocation3_spill] sm:$0xff] %v2655_v29  ;;  %v2668_v32 = vadd.f32 %v2511_v38, %v2504_v36  ;;  %v2672_v33 = vadd.f32 %v2511_v38, %v2506_v37 }
 0x108   : > { %3134 = vst [vmem:[#allocation4_spill] sm:$0xff] %v2668_v32 }
 0x10a   : > { %v2513_v39 = vpop.f32.mrb[16].mxu0  ;;  %v2515_v40 = vpop.f32.mrb[16].mxu1 }
 0x10b   : > { %v2517_v41 = vpop.f32.mrb[17].mxu0  ;;  %v2519_v42 = vpop.f32.mrb[17].mxu1  ;;  %v2676_v0 = vadd.f32 %v2513_v39, %v2511_v38  ;;  %v2680_v34 = vadd.f32 %v2515_v40, %v2511_v38 }
 0x10c   : > { %v2521_v43 = vpop.f32.mrb[18].mxu0  ;;  %v2532_v47 = vpop.f32.mrb[18].mxu1  ;;  %v2684_v35 = vadd.f32 %v2511_v38, %v2517_v41  ;;  %v2688_v59 = vadd.f32 %v2511_v38, %v2519_v42 }
 0x10d   : > { %v2534_v48 = vpop.f32.mrb[19].mxu0  ;;  %v2548_v53 = vpop.f32.mrb[19].mxu1  ;;  %v2692_v37 = vadd.f32 %v2521_v43, %v2511_v38  ;;  %v2696_v39 = vadd.f32 %v2532_v47, %v2511_v38 }
 0x10e   : > { %3135 = vst [vmem:[#allocation5_spill] sm:$0xff] %v2684_v35  ;;  %3136 = vst [vmem:[#allocation6_spill] sm:$0xff] %v2688_v59  ;;  %v2700_v40 = vadd.f32 %v2511_v38, %v2534_v48  ;;  %v2707_v56 = vadd.f32 %v2511_v38, %v2548_v53 }
 0x10f   : > { %3137 = vst [vmem:[#allocation7_spill] sm:$0xff] %v2692_v37  ;;  %3138 = vst [vmem:[#allocation8_spill] sm:$0xff] %v2696_v39 }
 0x110   : > { %3139 = vst [vmem:[#allocation9_spill] sm:$0xff] %v2700_v40  ;;  %3140 = vst [vmem:[#allocation10_spill] sm:$0xff] %v2707_v56 }
 0x112   : > { %v2563_v63 = vpop.f32.mrb[20].mxu0  ;;  %v2575_v4 = vpop.f32.mrb[20].mxu1 }
 0x113   : > { %v2577_v5 = vpop.f32.mrb[21].mxu0  ;;  %v2589_v10 = vpop.f32.mrb[21].mxu1  ;;  %v2714_v48 = vadd.f32 %v2563_v63, %v2511_v38  ;;  %v2727_v58 = vadd.f32 %v2575_v4, %v2511_v38 }
 0x114   : > { %v2591_v11 = vpop.f32.mrb[22].mxu0  ;;  %v2605_v16 = vpop.f32.mrb[22].mxu1  ;;  %v2731_v42 = vadd.f32 %v2511_v38, %v2577_v5  ;;  %v2735_v53 = vadd.f32 %v2511_v38, %v2589_v10 }
 0x115   : > { %v2607_v17 = vpop.f32.mrb[23].mxu0  ;;  %v2621_v22 = vpop.f32.mrb[23].mxu1  ;;  %3141 = vst [vmem:[#allocation11_spill] sm:$0xff] %v2714_v48  ;;  %v2740_v63 = vadd.f32 %v2591_v11, %v2511_v38  ;;  %v2744_v4 = vadd.f32 %v2605_v16, %v2511_v38 }
 0x116   : > { %v2748_v5 = vadd.f32 %v2511_v38, %v2607_v17  ;;  %v2752_v10 = vadd.f32 %v2511_v38, %v2621_v22 }
 0x117   : > { %3142 = vst [vmem:[#allocation12_spill] sm:$0xff] %v2740_v63  ;;  %3143 = vst [vmem:[#allocation13_spill] sm:$0xff] %v2744_v4 }
 0x118   : > { %3144 = vst [vmem:[#allocation14_spill] sm:$0xff] %v2748_v5  ;;  %3145 = vst [vmem:[#allocation15_spill] sm:$0xff] %v2752_v10  ;;  %v3157_v10 = vmax.f32 %v2530_v46, 0.0  ;;  %v3161_v46 = vmax.f32 %v2546_v52, 0.0 }
 0x11a   : > { %v2133_v61 = vpop.f32.mrb[24].mxu0  ;;  %v2197_v26 = vpop.f32.mrb[24].mxu1 }
 0x11b   : > { %v975_v6 = vpop.f32.mrb[25].mxu0  ;;  %v1231_v30 = vpop.f32.mrb[25].mxu1  ;;  %v2755_v28 = vadd.f32 %v2133_v61, %v2511_v38  ;;  %v2758_v11 = vadd.f32 %v2197_v26, %v2511_v38 }
 0x11c   : > { %v2134_v23 = vpop.f32.mrb[26].mxu0  ;;  %v2198_v36 = vpop.f32.mrb[26].mxu1  ;;  %v2761_v48 = vadd.f32 %v2511_v38, %v975_v6  ;;  %v2772_v17 = vadd.f32 %v2511_v38, %v1231_v30 }
 0x11d   : > { %v978_v60 = vpop.f32.mrb[27].mxu0  ;;  %v1234_v41 = vpop.f32.mrb[27].mxu1  ;;  %3146 = vst [vmem:[#allocation16_spill] sm:$0xff] %v2755_v28  ;;  %3147 = vst [vmem:[#allocation17_spill] sm:$0xff] %v2758_v11  ;;  %v2775_v61 = vadd.f32 %v2134_v23, %v2511_v38  ;;  %v2778_v22 = vadd.f32 %v2198_v36, %v2511_v38 }
 0x11e   : > { %3148 = vst [vmem:[#allocation18_spill] sm:$0xff] %v2761_v48  ;;  %3149 = vst [vmem:[#allocation19_spill] sm:$0xff] %v2772_v17  ;;  %v2781_v6 = vadd.f32 %v2511_v38, %v978_v60  ;;  %v2789_v30 = vadd.f32 %v2511_v38, %v1234_v41  ;;  %v3155_v48 = vmax.f32 %v2524_v44, 0.0  ;;  %v3159_v44 = vmax.f32 %v2540_v50, 0.0 }
 0x11f   : > { %3150 = vst [vmem:[#allocation20_spill] sm:$0xff] %v2775_v61  ;;  %3151 = vst [vmem:[#allocation21_spill] sm:$0xff] %v2778_v22  ;;  %v3162_v50 = vmax.f32 %v2551_v54, 0.0 }
 0x120   : > { %3152 = vst [vmem:[#allocation22_spill] sm:$0xff] %v2781_v6  ;;  %3153 = vst [vmem:[#allocation23_spill] sm:$0xff] %v2789_v30 }
 0x122   : > { %v2137_v32 = vpop.f32.mrb[28].mxu0  ;;  %v2201_v43 = vpop.f32.mrb[28].mxu1 }
 0x123   : > { %v991_v47 = vpop.f32.mrb[29].mxu0  ;;  %v1247_v29 = vpop.f32.mrb[29].mxu1  ;;  %v2795_v60 = vadd.f32 %v2137_v32, %v2511_v38  ;;  %v2808_v35 = vadd.f32 %v2201_v43, %v2511_v38 }
 0x124   : > { %v2138_v57 = vpop.f32.mrb[30].mxu0  ;;  %v2763_v16 = vpop.f32.mrb[30].mxu1  ;;  %v2811_v39 = vadd.f32 %v2511_v38, %v991_v47  ;;  %v2816_v36 = vadd.f32 %v2511_v38, %v1247_v29 }
 0x125   : > { %v2765_v56 = vpop.f32.mrb[31].mxu0  ;;  %v2783_v26 = vpop.f32.mrb[31].mxu1  ;;  %3154 = vst [vmem:[#allocation24_spill] sm:$0xff] %v2795_v60 }
 0x12a   : > { %v2141_v37 = vpop.f32.mrb[32].mxu0  ;;  %v2205_v41 = vpop.f32.mrb[32].mxu1 }
 0x12b   : > { %v1016_v40 = vadd.f32 %v2141_v37, %v2511_v38  ;;  %v1007_v23 = vpop.f32.mrb[33].mxu0  ;;  %v1272_v5 = vadd.f32 %v2205_v41, %v2511_v38  ;;  %v1263_v32 = vpop.f32.mrb[33].mxu1  ;;  %v2826_v37 = vadd.f32 %v2138_v57, %v2511_v38 }
 0x12c   : > { %v1008_v43 = vadd.f32 %v2511_v38, %v1007_v23  ;;  %v2142_v47 = vpop.f32.mrb[34].mxu0  ;;  %v1264_v6 = vadd.f32 %v2511_v38, %v1263_v32  ;;  %v2206_v29 = vpop.f32.mrb[34].mxu1  ;;  %v3156_v32 = vmax.f32 %v2527_v45, 0.0  ;;  %v3160_v45 = vmax.f32 %v2543_v51, 0.0 }
 0x12d   : > { %v1424_v30 = vmax.f32 %v1016_v40, 0.0  ;;  %v1019_v59 = vadd.f32 %v2142_v47, %v2511_v38  ;;  %v1010_v60 = vpop.f32.mrb[35].mxu0  ;;  %v1488_v22 = vmax.f32 %v1272_v5, 0.0  ;;  %v1275_v17 = vadd.f32 %v2206_v29, %v2511_v38  ;;  %v1266_v23 = vpop.f32.mrb[35].mxu1 }
 0x12e   : > { %v1422_v61 = vmax.f32 %v1008_v43, 0.0  ;;  %v1011_v41 = vadd.f32 %v2511_v38, %v1010_v60  ;;  %v1486_v28 = vmax.f32 %v1264_v6, 0.0  ;;  %v1267_v40 = vadd.f32 %v2511_v38, %v1266_v23 }
 0x12f   : > { %v1520_v11 = vmax.f32 %v3155_v48, %v1424_v30  ;;  %v1425_v57 = vmax.f32 %v1019_v59, 0.0  ;;  %v1552_v47 = vmax.f32 %v3156_v32, %v1488_v22  ;;  %v1489_v43 = vmax.f32 %v1275_v17, 0.0 }
 0x130   : > { %v1518_v5 = vmax.f32 %v3157_v10, %v1422_v61  ;;  %v1423_v4 = vmax.f32 %v1011_v41, 0.0  ;;  %v1484_v29 = vmax.f32 %v2808_v35, 0.0  ;;  %v3158_v60 = vmax.f32 %v2537_v49, 0.0 }
 0x131   : > { %v1521_v48 = vmax.f32 %v3159_v44, %v1425_v57  ;;  %v1487_v59 = vmax.f32 %v1267_v40, 0.0  ;;  %v1418_v6 = vmax.f32 %v2811_v39, 0.0  ;;  %v1584_v30 = vmax.f32 %v1520_v11, %v1552_v47 }
 0x132   : > { %v1550_v63 = vmax.f32 %v3158_v60, %v1486_v28  ;;  %v1553_v22 = vmax.f32 %v3160_v45, %v1489_v43  ;;  %v1519_v10 = vmax.f32 %v3161_v46, %v1423_v4  ;;  %v2145_v17 = vpop.f32.mrb[36].mxu0  ;;  %v2852_v61 = vadd.f32 %v2763_v16, %v2511_v38  ;;  %v2209_v11 = vpop.f32.mrb[36].mxu1 }
 0x133   : > { %v1551_v28 = vmax.f32 %v3162_v50, %v1487_v59  ;;  %v1032_v51 = vadd.f32 %v2145_v17, %v2511_v38  ;;  %v1023_v52 = vpop.f32.mrb[37].mxu0  ;;  %v2007_v4 = vpack.c.bf16 %v1584_v30, %v1584_v30  ;;  %v1288_v23 = vadd.f32 %v2209_v11, %v2511_v38  ;;  %v1279_v57 = vpop.f32.mrb[37].mxu1 }
 0x134   : > { %v1582_v49 = vmax.f32 %v1518_v5, %v1550_v63  ;;  %v1585_v41 = vmax.f32 %v1521_v48, %v1553_v22  ;;  %v1024_v16 = vadd.f32 %v2511_v38, %v1023_v52  ;;  %v2146_v40 = vpop.f32.mrb[38].mxu0  ;;  %v1280_v54 = vadd.f32 %v2511_v38, %v1279_v57  ;;  %v2210_v5 = vpop.f32.mrb[38].mxu1 }
 0x135   : > { %v1583_v47 = vmax.f32 %v1519_v10, %v1551_v28  ;;  %v1428_v63 = vmax.f32 %v1032_v51, 0.0  ;;  %v1026_v43 = vpop.f32.mrb[39].mxu0  ;;  %1745 = vst.msk [vmem:[%s2857_s29 + $0x8] sm:$0xf] %vm1742_vm3, %v2007_v4  ;;  %v1492_v44 = vmax.f32 %v1288_v23, 0.0  ;;  %v1035_v59 = vadd.f32 %v2146_v40, %v2511_v38  ;;  %v1282_v30 = vpop.f32.mrb[39].mxu1 }
 0x136   : > { %v2005_v32 = vpack.c.bf16 %v1582_v49, %v1582_v49  ;;  %v2008_v60 = vpack.c.bf16 %v1585_v41, %v1585_v41  ;;  %v1426_v48 = vmax.f32 %v1024_v16, 0.0  ;;  %v3163_v22 = vmax.f32 %v2554_v55, 0.0 }
 0x137   : > { %v2006_v45 = vpack.c.bf16 %v1583_v47, %v1583_v47  ;;  %v1490_v10 = vmax.f32 %v1280_v54, 0.0  ;;  %v1291_v17 = vadd.f32 %v2210_v5, %v2511_v38  ;;  %v3164_v49 = vmax.f32 %v2567_v1, 0.0 }
 0x138   : > { %1743 = vst.msk [vmem:[%s2857_s29] sm:$0xf] %vm1742_vm3, %v2005_v32  ;;  %v1524_v46 = vmax.f32 %v3163_v22, %v1428_v63  ;;  %1746 = vst.msk [vmem:[%s2857_s29 + $0xc] sm:$0xf] %vm1742_vm3, %v2008_v60  ;;  %v3165_v28 = vmax.f32 %v2570_v2, 0.0  ;;  %v1429_v11 = vmax.f32 %v1035_v59, 0.0  ;;  %v1027_v52 = vadd.f32 %v2511_v38, %v1026_v43 }
 0x139   : > { %v1556_v50 = vmax.f32 %v3164_v49, %v1492_v44  ;;  %v2882_v4 = vadd.f32 %v2511_v38, %v2765_v56  ;;  %1744 = vst.msk [vmem:[%s2857_s29 + $0x4] sm:$0xf] %vm1742_vm3, %v2006_v45  ;;  %v3166_v55 = vmax.f32 %v2573_v3, 0.0  ;;  %v1493_v23 = vmax.f32 %v1291_v17, 0.0 }
 0x13a   : > { %v1522_v51 = vmax.f32 %v3165_v28, %v1426_v48  ;;  %v1283_v16 = vadd.f32 %v2511_v38, %v1282_v30  ;;  %v1482_v1 = vmax.f32 %v2816_v36, 0.0  ;;  %v3167_v2 = vmax.f32 %v2581_v7, 0.0  ;;  %v2149_v47 = vpop.f32.mrb[40].mxu0  ;;  %v2213_v43 = vpop.f32.mrb[40].mxu1 }
 0x13b   : > { %v1554_v41 = vmax.f32 %v3166_v55, %v1490_v10  ;;  %v1588_v57 = vmax.f32 %v1524_v46, %v1556_v50  ;;  %v1427_v32 = vmax.f32 %v1027_v52, 0.0  ;;  %v3168_v56 = vmax.f32 %v2584_v8, 0.0  ;;  %v1039_v60 = vpop.f32.mrb[41].mxu0  ;;  %v1295_v45 = vpop.f32.mrb[41].mxu1 }
 0x13c   : > { %v1525_v40 = vmax.f32 %v3167_v2, %v1429_v11  ;;  %v1491_v5 = vmax.f32 %v1283_v16, 0.0  ;;  %v1048_v3 = vadd.f32 %v2149_v47, %v2511_v38  ;;  %v3169_v48 = vmax.f32 %v2587_v9, 0.0  ;;  %v2150_v22 = vpop.f32.mrb[42].mxu0  ;;  %v2214_v50 = vpop.f32.mrb[42].mxu1 }
 0x13d   : > { %v1586_v63 = vmax.f32 %v1522_v51, %v1554_v41  ;;  %v1557_v54 = vmax.f32 %v3168_v56, %v1493_v23  ;;  %v2011_v44 = vpack.c.bf16 %v1588_v57, %v1588_v57  ;;  %v1304_v30 = vadd.f32 %v2213_v43, %v2511_v38  ;;  %v1042_v28 = vpop.f32.mrb[43].mxu0  ;;  %v1298_v55 = vpop.f32.mrb[43].mxu1 }
 0x13e   : > { %v1523_v59 = vmax.f32 %v3169_v48, %v1427_v32  ;;  %v1040_v7 = vadd.f32 %v2511_v38, %v1039_v60  ;;  %v3170_v10 = vmax.f32 %v2594_v12, 0.0  ;;  %v1432_v49 = vmax.f32 %v1048_v3, 0.0 }
 0x13f   : > { %v2009_v46 = vpack.c.bf16 %v1586_v63, %v1586_v63  ;;  %v1589_v8 = vmax.f32 %v1525_v40, %v1557_v54  ;;  %1749 = vst.msk [vmem:[%s2857_s29 + $0x18] sm:$0xf] %vm1742_vm3, %v2011_v44  ;;  %v1496_v9 = vmax.f32 %v1304_v30, 0.0  ;;  %v1296_v11 = vadd.f32 %v2511_v38, %v1295_v45 }
 0x140   : > { %v1555_v17 = vmax.f32 %v3170_v10, %v1491_v5  ;;  %v1430_v51 = vmax.f32 %v1040_v7, 0.0  ;;  %v1051_v52 = vadd.f32 %v2150_v22, %v2511_v38  ;;  %v3171_v12 = vmax.f32 %v2597_v13, 0.0 }
 0x141   : > { %1747 = vst.msk [vmem:[%s2857_s29 + $0x10] sm:$0xf] %vm1742_vm3, %v2009_v46  ;;  %v2012_v41 = vpack.c.bf16 %v1589_v8, %v1589_v8  ;;  %v1307_v57 = vadd.f32 %v2214_v50, %v2511_v38  ;;  %v3172_v2 = vmax.f32 %v2600_v14, 0.0  ;;  %v3173_v32 = vmax.f32 %v2603_v15, 0.0 }
 0x142   : > { %v1587_v23 = vmax.f32 %v1523_v59, %v1555_v17  ;;  %v1528_v16 = vmax.f32 %v3171_v12, %v1432_v49  ;;  %v1494_v63 = vmax.f32 %v1296_v11, 0.0  ;;  %v1433_v56 = vmax.f32 %v1051_v52, 0.0  ;;  %v2153_v59 = vpop.f32.mrb[44].mxu0  ;;  %v2217_v8 = vpop.f32.mrb[44].mxu1 }
 0x143   : > { %v1560_v40 = vmax.f32 %v3172_v2, %v1496_v9  ;;  %v1526_v47 = vmax.f32 %v3173_v32, %v1430_v51  ;;  %1750 = vst.msk [vmem:[%s2857_s29 + $0x1c] sm:$0xf] %vm1742_vm3, %v2012_v41  ;;  %v1497_v5 = vmax.f32 %v1307_v57, 0.0  ;;  %v1043_v3 = vadd.f32 %v2511_v38, %v1042_v28  ;;  %v1055_v10 = vpop.f32.mrb[45].mxu0  ;;  %v1311_v50 = vpop.f32.mrb[45].mxu1 }
 0x144   : > { %v2010_v54 = vpack.c.bf16 %v1587_v23, %v1587_v23  ;;  %v1299_v13 = vadd.f32 %v2511_v38, %v1298_v55  ;;  %v1421_v43 = vmax.f32 %v2826_v37, 0.0  ;;  %v3174_v44 = vmax.f32 %v2610_v18, 0.0  ;;  %v2154_v28 = vpop.f32.mrb[46].mxu0  ;;  %v2218_v41 = vpop.f32.mrb[46].mxu1 }
 0x145   : > { %v1592_v60 = vmax.f32 %v1528_v16, %v1560_v40  ;;  %v3175_v48 = vmax.f32 %v2613_v19, 0.0  ;;  %v3176_v30 = vmax.f32 %v2616_v20, 0.0  ;;  %v1431_v45 = vmax.f32 %v1043_v3, 0.0  ;;  %v1058_v23 = vpop.f32.mrb[47].mxu0  ;;  %v1314_v40 = vpop.f32.mrb[47].mxu1 }
 0x146   : > { %v1558_v14 = vmax.f32 %v3174_v44, %v1494_v63  ;;  %1748 = vst.msk [vmem:[%s2857_s29 + $0x14] sm:$0xf] %vm1742_vm3, %v2010_v54  ;;  %v1495_v22 = vmax.f32 %v1299_v13, 0.0  ;;  %v1064_v46 = vadd.f32 %v2153_v59, %v2511_v38  ;;  %v1320_v18 = vadd.f32 %v2217_v8, %v2511_v38 }
 0x147   : > { %v1529_v15 = vmax.f32 %v3175_v48, %v1433_v56  ;;  %v1561_v7 = vmax.f32 %v3176_v30, %v1497_v5  ;;  %v2015_v17 = vpack.c.bf16 %v1592_v60, %v1592_v60  ;;  %v1056_v19 = vadd.f32 %v2511_v38, %v1055_v10 }
 0x148   : > { %v1590_v49 = vmax.f32 %v1526_v47, %v1558_v14  ;;  %v3177_v51 = vmax.f32 %v2619_v21, 0.0  ;;  %v3178_v11 = vmax.f32 %v2627_v25, 0.0  ;;  %v1436_v55 = vmax.f32 %v1064_v46, 0.0  ;;  %v3179_v21 = vld [vmem:[#allocation2_spill] sm:$0xff] }
 0x149   : > { %v1593_v9 = vmax.f32 %v1529_v15, %v1561_v7  ;;  %1753 = vst.msk [vmem:[%s2857_s29 + $0x28] sm:$0xf] %vm1742_vm3, %v2015_v17  ;;  %v1500_v16 = vmax.f32 %v1320_v18, 0.0  ;;  %v1434_v57 = vmax.f32 %v1056_v19, 0.0  ;;  %v1312_v2 = vadd.f32 %v2511_v38, %v1311_v50  ;;  %v3183_v7 = vld [vmem:[#allocation3_spill] sm:$0xff] }
 0x14a   : > { %v1527_v20 = vmax.f32 %v3177_v51, %v1431_v45  ;;  %v1559_v52 = vmax.f32 %v3178_v11, %v1495_v22  ;;  %v2013_v12 = vpack.c.bf16 %v1590_v49, %v1590_v49  ;;  %v3180_v63 = vmax.f32 %v3179_v21, 0.0  ;;  %v2157_v46 = vpop.f32.mrb[48].mxu0  ;;  %v2221_v19 = vpop.f32.mrb[48].mxu1 }
 0x14b   : > { %v2016_v32 = vpack.c.bf16 %v1593_v9, %v1593_v9  ;;  %v1067_v25 = vadd.f32 %v2154_v28, %v2511_v38  ;;  %v3181_v54 = vmax.f32 %v2647_v62, 0.0  ;;  %v3182_v3 = vmax.f32 %v2651_v24, 0.0  ;;  %v1071_v50 = vpop.f32.mrb[49].mxu0  ;;  %v1327_v11 = vpop.f32.mrb[49].mxu1 }
 0x14c   : > { %v1591_v47 = vmax.f32 %v1527_v20, %v1559_v52  ;;  %v1532_v56 = vmax.f32 %v3180_v63, %v1436_v55  ;;  %1751 = vst.msk [vmem:[%s2857_s29 + $0x20] sm:$0xf] %vm1742_vm3, %v2013_v12  ;;  %v1498_v60 = vmax.f32 %v1312_v2, 0.0  ;;  %v1323_v44 = vadd.f32 %v2218_v41, %v2511_v38  ;;  %v2158_v52 = vpop.f32.mrb[50].mxu0  ;;  %v3187_v55 = vld [vmem:[#allocation4_spill] sm:$0xff]  ;;  %v2222_v2 = vpop.f32.mrb[50].mxu1 }
 0x14d   : > { %v1564_v5 = vmax.f32 %v3181_v54, %v1500_v16  ;;  %v1530_v13 = vmax.f32 %v3182_v3, %v1434_v57  ;;  %1754 = vst.msk [vmem:[%s2857_s29 + $0x2c] sm:$0xf] %vm1742_vm3, %v2016_v32  ;;  %v1437_v48 = vmax.f32 %v1067_v25, 0.0  ;;  %v1059_v15 = vadd.f32 %v2511_v38, %v1058_v23  ;;  %v1330_v63 = vpop.f32.mrb[51].mxu1 }
 0x14e   : > { %v2014_v14 = vpack.c.bf16 %v1591_v47, %v1591_v47  ;;  %v1315_v59 = vadd.f32 %v2511_v38, %v1314_v40  ;;  %v2953_v30 = vadd.f32 %v2511_v38, %v2783_v26  ;;  %v3184_v45 = vmax.f32 %v3183_v7, 0.0  ;;  %v1074_v40 = vpop.f32.mrb[51].mxu0 }
 0x14f   : > { %v1596_v62 = vmax.f32 %v1532_v56, %v1564_v5  ;;  %v1501_v22 = vmax.f32 %v1323_v44, 0.0  ;;  %v3185_v8 = vmax.f32 %v2660_v27, 0.0  ;;  %v1435_v17 = vmax.f32 %v1059_v15, 0.0  ;;  %v3192_v15 = vld [vmem:[#allocation5_spill] sm:$0xff] }
 0x150   : > { %v1562_v24 = vmax.f32 %v3184_v45, %v1498_v60  ;;  %1752 = vst.msk [vmem:[%s2857_s29 + $0x24] sm:$0xf] %vm1742_vm3, %v2014_v14  ;;  %v1499_v49 = vmax.f32 %v1315_v59, 0.0  ;;  %v1080_v18 = vadd.f32 %v2157_v46, %v2511_v38  ;;  %v3186_v9 = vmax.f32 %v2664_v31, 0.0 }
 0x151   : > { %v1533_v10 = vmax.f32 %v3185_v8, %v1437_v48  ;;  %v2019_v26 = vpack.c.bf16 %v1596_v62, %v1596_v62  ;;  %v1336_v20 = vadd.f32 %v2221_v19, %v2511_v38  ;;  %v3188_v41 = vmax.f32 %v3187_v55, 0.0 }
 0x152   : > { %v1594_v28 = vmax.f32 %v1530_v13, %v1562_v24  ;;  %v1565_v51 = vmax.f32 %v3186_v9, %v1501_v22  ;;  %v3189_v23 = vmax.f32 %v2672_v33, 0.0  ;;  %v1440_v16 = vmax.f32 %v1080_v18, 0.0  ;;  %v3194_v24 = vld [vmem:[#allocation6_spill] sm:$0xff] }
 0x153   : > { %v1531_v27 = vmax.f32 %v3188_v41, %v1435_v17  ;;  %v1072_v57 = vadd.f32 %v2511_v38, %v1071_v50  ;;  %1757 = vst.msk [vmem:[%s2857_s29 + $0x38] sm:$0xf] %vm1742_vm3, %v2019_v26  ;;  %v1504_v47 = vmax.f32 %v1336_v20, 0.0  ;;  %v1328_v21 = vadd.f32 %v2511_v38, %v1327_v11  ;;  %v3198_v11 = vld [vmem:[#allocation8_spill] sm:$0xff] }
 0x154   : > { %v1563_v12 = vmax.f32 %v3189_v23, %v1499_v49  ;;  %v2017_v31 = vpack.c.bf16 %v1594_v28, %v1594_v28  ;;  %v1597_v32 = vmax.f32 %v1533_v10, %v1565_v51  ;;  %v3190_v25 = vmax.f32 %v2676_v0, 0.0  ;;  %v2161_v10 = vpop.f32.mrb[52].mxu0  ;;  %v3196_v49 = vld [vmem:[#allocation7_spill] sm:$0xff]  ;;  %v2225_v28 = vpop.f32.mrb[52].mxu1 }
 0x155   : > { %v1438_v54 = vmax.f32 %v1072_v57, 0.0  ;;  %v1083_v5 = vadd.f32 %v2158_v52, %v2511_v38  ;;  %v3191_v13 = vmax.f32 %v2680_v34, 0.0  ;;  %v1502_v44 = vmax.f32 %v1328_v21, 0.0  ;;  %v1087_v9 = vpop.f32.mrb[53].mxu0 }
 0x156   : > { %v1595_v56 = vmax.f32 %v1531_v27, %v1563_v12  ;;  %v1536_v33 = vmax.f32 %v3190_v25, %v1440_v16  ;;  %1755 = vst.msk [vmem:[%s2857_s29 + $0x30] sm:$0xf] %vm1742_vm3, %v2017_v31  ;;  %v2020_v3 = vpack.c.bf16 %v1597_v32, %v1597_v32  ;;  %v1339_v14 = vadd.f32 %v2222_v2, %v2511_v38  ;;  %v1343_v27 = vpop.f32.mrb[53].mxu1  ;;  %v2162_v23 = vpop.f32.mrb[54].mxu0  ;;  %v3200_v12 = vld [vmem:[#allocation9_spill] sm:$0xff] }
 0x157   : > { %v1568_v60 = vmax.f32 %v3191_v13, %v1504_v47  ;;  %v3193_v59 = vmax.f32 %v3192_v15, 0.0  ;;  %v1441_v7 = vmax.f32 %v1083_v5, 0.0  ;;  %v1075_v0 = vadd.f32 %v2511_v38, %v1074_v40  ;;  %v2226_v32 = vpop.f32.mrb[54].mxu1  ;;  %v1090_v47 = vpop.f32.mrb[55].mxu0 }
 0x158   : > { %v2018_v48 = vpack.c.bf16 %v1595_v56, %v1595_v56  ;;  %1758 = vst.msk [vmem:[%s2857_s29 + $0x3c] sm:$0xf] %vm1742_vm3, %v2020_v3  ;;  %v3195_v22 = vmax.f32 %v3194_v24, 0.0  ;;  %v1505_v8 = vmax.f32 %v1339_v14, 0.0  ;;  %v1331_v34 = vadd.f32 %v2511_v38, %v1330_v63  ;;  %v3202_v56 = vld [vmem:[#allocation10_spill] sm:$0xff]  ;;  %v1346_v5 = vpop.f32.mrb[55].mxu1 }
 0x159   : > { %v1534_v62 = vmax.f32 %v3193_v59, %v1438_v54  ;;  %v1600_v45 = vmax.f32 %v1536_v33, %v1568_v60  ;;  %v1485_v17 = vmax.f32 %v2852_v61, 0.0  ;;  %v3197_v18 = vmax.f32 %v3196_v49, 0.0  ;;  %v3204_v3 = vld [vmem:[#allocation11_spill] sm:$0xff] }
 0x15a   : > { %v1566_v46 = vmax.f32 %v3195_v22, %v1502_v44  ;;  %1756 = vst.msk [vmem:[%s2857_s29 + $0x34] sm:$0xf] %vm1742_vm3, %v2018_v48  ;;  %v1439_v50 = vmax.f32 %v1075_v0, 0.0  ;;  %v1096_v26 = vadd.f32 %v2161_v10, %v2511_v38  ;;  %v3199_v52 = vmax.f32 %v3198_v11, 0.0 }
 0x15b   : > { %v1537_v19 = vmax.f32 %v3197_v18, %v1441_v7  ;;  %v2023_v51 = vpack.c.bf16 %v1600_v45, %v1600_v45  ;;  %v1503_v41 = vmax.f32 %v1331_v34, 0.0  ;;  %v3201_v16 = vmax.f32 %v3200_v12, 0.0 }
 0x15c   : > { %v1598_v20 = vmax.f32 %v1534_v62, %v1566_v46  ;;  %v1569_v55 = vmax.f32 %v3199_v52, %v1505_v8  ;;  %v1444_v2 = vmax.f32 %v1096_v26, 0.0  ;;  %v1352_v40 = vadd.f32 %v2225_v28, %v2511_v38 }
 0x15d   : > { %v1535_v57 = vmax.f32 %v3201_v16, %v1439_v50  ;;  %v1088_v31 = vadd.f32 %v2511_v38, %v1087_v9  ;;  %1761 = vst.msk [vmem:[%s2857_s29 + $0x48] sm:$0xf] %vm1742_vm3, %v2023_v51  ;;  %v3203_v25 = vmax.f32 %v3202_v56, 0.0  ;;  %v1344_v54 = vadd.f32 %v2511_v38, %v1343_v27  ;;  %v2165_v50 = vpop.f32.mrb[56].mxu0 }
 0x15e   : > { %v2021_v21 = vpack.c.bf16 %v1598_v20, %v1598_v20  ;;  %v1601_v63 = vmax.f32 %v1537_v19, %v1569_v55  ;;  %v3205_v13 = vmax.f32 %v3204_v3, 0.0  ;;  %v1508_v44 = vmax.f32 %v1352_v40, 0.0  ;;  %v2229_v20 = vpop.f32.mrb[56].mxu1  ;;  %v1103_v11 = vpop.f32.mrb[57].mxu0  ;;  %v3211_v55 = vld [vmem:[#allocation13_spill] sm:$0xff] }
 0x15f   : > { %v1567_v33 = vmax.f32 %v3203_v25, %v1503_v41  ;;  %v1442_v14 = vmax.f32 %v1088_v31, 0.0  ;;  %v1099_v48 = vadd.f32 %v2162_v23, %v2511_v38  ;;  %v1506_v62 = vmax.f32 %v1344_v54, 0.0  ;;  %v1359_v12 = vpop.f32.mrb[57].mxu1  ;;  %v2166_v16 = vpop.f32.mrb[58].mxu0 }
 0x160   : > { %v1540_v60 = vmax.f32 %v3205_v13, %v1444_v2  ;;  %1759 = vst.msk [vmem:[%s2857_s29 + $0x40] sm:$0xf] %vm1742_vm3, %v2021_v21  ;;  %v2024_v15 = vpack.c.bf16 %v1601_v63, %v1601_v63  ;;  %v1355_v7 = vadd.f32 %v2226_v32, %v2511_v38  ;;  %v3206_v0 = vmax.f32 %v2727_v58, 0.0  ;;  %v3209_v58 = vld [vmem:[#allocation12_spill] sm:$0xff]  ;;  %v3213_v2 = vld [vmem:[#allocation14_spill] sm:$0xff]  ;;  %v2230_v21 = vpop.f32.mrb[58].mxu1 }
 0x161   : > { %v1599_v59 = vmax.f32 %v1535_v57, %v1567_v33  ;;  %v3207_v24 = vmax.f32 %v2731_v42, 0.0  ;;  %v1445_v46 = vmax.f32 %v1099_v48, 0.0  ;;  %v1091_v8 = vadd.f32 %v2511_v38, %v1090_v47  ;;  %v1106_v63 = vpop.f32.mrb[59].mxu0  ;;  %v3215_v33 = vld [vmem:[#allocation15_spill] sm:$0xff]  ;;  %v1362_v13 = vpop.f32.mrb[59].mxu1 }
 0x162   : > { %v1572_v45 = vmax.f32 %v3206_v0, %v1508_v44  ;;  %1762 = vst.msk [vmem:[%s2857_s29 + $0x4c] sm:$0xf] %vm1742_vm3, %v2024_v15  ;;  %v3208_v10 = vmax.f32 %v2735_v53, 0.0  ;;  %v1509_v18 = vmax.f32 %v1355_v7, 0.0  ;;  %v1347_v19 = vadd.f32 %v2511_v38, %v1346_v5  ;;  %v3219_v0 = vld [vmem:[#allocation17_spill] sm:$0xff] }
 0x163   : > { %v1538_v22 = vmax.f32 %v3207_v24, %v1442_v14  ;;  %v2022_v34 = vpack.c.bf16 %v1599_v59, %v1599_v59  ;;  %v3210_v28 = vmax.f32 %v3209_v58, 0.0  ;;  %v1443_v42 = vmax.f32 %v1091_v8, 0.0 }
 0x164   : > { %v1570_v49 = vmax.f32 %v3208_v10, %v1506_v62  ;;  %v1604_v26 = vmax.f32 %v1540_v60, %v1572_v45  ;;  %v1112_v51 = vadd.f32 %v2165_v50, %v2511_v38  ;;  %v3212_v41 = vmax.f32 %v3211_v55, 0.0  ;;  %v3217_v60 = vld [vmem:[#allocation16_spill] sm:$0xff] }
 0x165   : > { %v1541_v9 = vmax.f32 %v3210_v28, %v1445_v46  ;;  %1760 = vst.msk [vmem:[%s2857_s29 + $0x44] sm:$0xf] %vm1742_vm3, %v2022_v34  ;;  %v1507_v27 = vmax.f32 %v1347_v19, 0.0  ;;  %v1368_v23 = vadd.f32 %v2229_v20, %v2511_v38  ;;  %v3214_v40 = vmax.f32 %v3213_v2, 0.0  ;;  %v3221_v46 = vld [vmem:[#allocation18_spill] sm:$0xff]  ;;  %v2169_v28 = vpop.f32.mrb[60].mxu0 }
 0x166   : > { %v1602_v52 = vmax.f32 %v1538_v22, %v1570_v49  ;;  %v1573_v53 = vmax.f32 %v3212_v41, %v1509_v18  ;;  %v2027_v57 = vpack.c.bf16 %v1604_v26, %v1604_v26  ;;  %v1448_v32 = vmax.f32 %v1112_v51, 0.0  ;;  %v3225_v20 = vld [vmem:[#allocation20_spill] sm:$0xff] }
 0x167   : > { %v1539_v31 = vmax.f32 %v3214_v40, %v1443_v42  ;;  %v1104_v47 = vadd.f32 %v2511_v38, %v1103_v11  ;;  %v3216_v54 = vmax.f32 %v3215_v33, 0.0  ;;  %v1512_v3 = vmax.f32 %v1368_v23, 0.0 }
 0x168   : > { %v2025_v56 = vpack.c.bf16 %v1602_v52, %v1602_v52  ;;  %v1605_v25 = vmax.f32 %v1541_v9, %v1573_v53  ;;  %1765 = vst.msk [vmem:[%s2857_s29 + $0x58] sm:$0xf] %vm1742_vm3, %v2027_v57  ;;  %v3218_v44 = vmax.f32 %v3217_v60, 0.0  ;;  %v1360_v15 = vadd.f32 %v2511_v38, %v1359_v12  ;;  %v3223_v9 = vld [vmem:[#allocation19_spill] sm:$0xff]  ;;  %v2233_v53 = vpop.f32.mrb[60].mxu1  ;;  %v3227_v12 = vld [vmem:[#allocation21_spill] sm:$0xff] }
 0x169   : > { %v1571_v5 = vmax.f32 %v3216_v54, %v1507_v27  ;;  %v1446_v48 = vmax.f32 %v1104_v47, 0.0  ;;  %v1115_v59 = vadd.f32 %v2166_v16, %v2511_v38  ;;  %v3220_v45 = vmax.f32 %v3219_v0, 0.0  ;;  %v1119_v27 = vpop.f32.mrb[61].mxu0 }
 0x16a   : > { %v1544_v14 = vmax.f32 %v3218_v44, %v1448_v32  ;;  %1763 = vst.msk [vmem:[%s2857_s29 + $0x50] sm:$0xf] %vm1742_vm3, %v2025_v56  ;;  %v2028_v62 = vpack.c.bf16 %v1605_v25, %v1605_v25  ;;  %v1371_v22 = vadd.f32 %v2230_v21, %v2511_v38  ;;  %v3222_v8 = vmax.f32 %v3221_v46, 0.0  ;;  %v2170_v32 = vpop.f32.mrb[62].mxu0  ;;  %v3229_v21 = vld [vmem:[#allocation22_spill] sm:$0xff] }
 0x16b   : > { %v1603_v7 = vmax.f32 %v1539_v31, %v1571_v5  ;;  %v1576_v24 = vmax.f32 %v3220_v45, %v1512_v3  ;;  %v1510_v10 = vmax.f32 %v1360_v15, 0.0  ;;  %v1449_v49 = vmax.f32 %v1115_v59, 0.0  ;;  %v1375_v31 = vpop.f32.mrb[61].mxu1  ;;  %v1122_v5 = vpop.f32.mrb[63].mxu0 }
 0x16c   : > { %v1542_v34 = vmax.f32 %v3222_v8, %v1446_v48  ;;  %v1107_v18 = vadd.f32 %v2511_v38, %v1106_v63  ;;  %1766 = vst.msk [vmem:[%s2857_s29 + $0x5c] sm:$0xf] %vm1742_vm3, %v2028_v62  ;;  %v1513_v26 = vmax.f32 %v1371_v22, 0.0  ;;  %v1363_v58 = vadd.f32 %v2511_v38, %v1362_v13  ;;  %v2234_v54 = vpop.f32.mrb[62].mxu1  ;;  %v3231_v13 = vld [vmem:[#allocation23_spill] sm:$0xff]  ;;  %v3233_v62 = vld [vmem:[#allocation24_spill] sm:$0xff] }
 0x16d   : > { %v2026_v19 = vpack.c.bf16 %v1603_v7, %v1603_v7  ;;  %v1608_v50 = vmax.f32 %v1544_v14, %v1576_v24  ;;  %v3224_v42 = vmax.f32 %v3223_v9, 0.0  ;;  %v3226_v11 = vmax.f32 %v3225_v20, 0.0  ;;  %v1378_v15 = vpop.f32.mrb[63].mxu1 }
 0x16e   : > { %v1447_v55 = vmax.f32 %v1107_v18, 0.0  ;;  %v1128_v41 = vadd.f32 %v2169_v28, %v2511_v38  ;;  %v3228_v16 = vmax.f32 %v3227_v12, 0.0  ;;  %v1511_v2 = vmax.f32 %v1363_v58, 0.0 }
 0x16f   : > { %v1574_v51 = vmax.f32 %v3224_v42, %v1510_v10  ;;  %v1545_v52 = vmax.f32 %v3226_v11, %v1449_v49  ;;  %1764 = vst.msk [vmem:[%s2857_s29 + $0x54] sm:$0xf] %vm1742_vm3, %v2026_v19  ;;  %v2031_v23 = vpack.c.bf16 %v1608_v50, %v1608_v50  ;;  %v1384_v40 = vadd.f32 %v2233_v53, %v2511_v38 }
 0x170   : > { %v1577_v57 = vmax.f32 %v3228_v16, %v1513_v26  ;;  %v3230_v63 = vmax.f32 %v3229_v21, 0.0  ;;  %v1452_v25 = vmax.f32 %v1128_v41, 0.0  ;;  %v1120_v33 = vadd.f32 %v2511_v38, %v1119_v27 }
 0x171   : > { %v1606_v47 = vmax.f32 %v1542_v34, %v1574_v51  ;;  %1769 = vst.msk [vmem:[%s2857_s29 + $0x68] sm:$0xf] %vm1742_vm3, %v2031_v23  ;;  %v3232_v60 = vmax.f32 %v3231_v13, 0.0  ;;  %v1516_v14 = vmax.f32 %v1384_v40, 0.0  ;;  %v1376_v48 = vadd.f32 %v2511_v38, %v1375_v31 }
 0x172   : > { %v1543_v56 = vmax.f32 %v3230_v63, %v1447_v55  ;;  %v1609_v3 = vmax.f32 %v1545_v52, %v1577_v57  ;;  %v3234_v7 = vmax.f32 %v3233_v62, 0.0  ;;  %v1450_v45 = vmax.f32 %v1120_v33, 0.0 }
 0x173   : > { %v1575_v44 = vmax.f32 %v3232_v60, %v1511_v2  ;;  %v2029_v59 = vpack.c.bf16 %v1606_v47, %v1606_v47  ;;  %v1131_v24 = vadd.f32 %v2170_v32, %v2511_v38  ;;  %v1580_v8 = vmax.f32 %v1484_v29, %v1516_v14 }
 0x174   : > { %v1548_v0 = vmax.f32 %v3234_v7, %v1452_v25  ;;  %v2032_v22 = vpack.c.bf16 %v1609_v3, %v1609_v3  ;;  %v1514_v34 = vmax.f32 %v1376_v48, 0.0  ;;  %v1546_v10 = vmax.f32 %v1418_v6, %v1450_v45 }
 0x175   : > { %v1607_v46 = vmax.f32 %v1543_v56, %v1575_v44  ;;  %1767 = vst.msk [vmem:[%s2857_s29 + $0x60] sm:$0xf] %vm1742_vm3, %v2029_v59  ;;  %v1453_v49 = vmax.f32 %v1131_v24, 0.0  ;;  %v1387_v18 = vadd.f32 %v2234_v54, %v2511_v38  ;;  %v1123_v19 = vadd.f32 %v2511_v38, %v1122_v5 }
 0x176   : > { %1770 = vst.msk [vmem:[%s2857_s29 + $0x6c] sm:$0xf] %vm1742_vm3, %v2032_v22  ;;  %v1612_v26 = vmax.f32 %v1548_v0, %v1580_v8  ;;  %v1578_v35 = vmax.f32 %v1482_v1, %v1514_v34  ;;  %v1379_v29 = vadd.f32 %v2511_v38, %v1378_v15  ;;  %v1419_v58 = vmax.f32 %v2882_v4, 0.0 }
 0x177   : > { %v2030_v50 = vpack.c.bf16 %v1607_v46, %v1607_v46  ;;  %v1549_v39 = vmax.f32 %v1421_v43, %v1453_v49  ;;  %v1517_v6 = vmax.f32 %v1387_v18, 0.0  ;;  %v1451_v28 = vmax.f32 %v1123_v19, 0.0 }
 0x178   : > { %v1483_v9 = vmax.f32 %v2953_v30, 0.0  ;;  %v2035_v42 = vpack.c.bf16 %v1612_v26, %v1612_v26  ;;  %v1610_v51 = vmax.f32 %v1546_v10, %v1578_v35  ;;  %v1515_v36 = vmax.f32 %v1379_v29, 0.0 }
 0x179   : > { %1768 = vst.msk [vmem:[%s2857_s29 + $0x64] sm:$0xf] %vm1742_vm3, %v2030_v50  ;;  %v1581_v38 = vmax.f32 %v1485_v17, %v1517_v6  ;;  %v1547_v1 = vmax.f32 %v1419_v58, %v1451_v28 }
 0x17a   : > { %1773 = vst.msk [vmem:[%s2857_s29 + $0x78] sm:$0xf] %vm1742_vm3, %v2035_v42  ;;  %v2033_v4 = vpack.c.bf16 %v1610_v51, %v1610_v51  ;;  %v1579_v37 = vmax.f32 %v1483_v9, %v1515_v36 }
 0x17b   : > { %v1613_v43 = vmax.f32 %v1549_v39, %v1581_v38 }
 0x17c   : > { %1771 = vst.msk [vmem:[%s2857_s29 + $0x70] sm:$0xf] %vm1742_vm3, %v2033_v4  ;;  %v1611_v20 = vmax.f32 %v1547_v1, %v1579_v37 }
 0x17d   : > { %v2036_v11 = vpack.c.bf16 %v1613_v43, %v1613_v43 }
 0x17e   : > { %v2034_v30 = vpack.c.bf16 %v1611_v20, %v1611_v20 }
 0x17f   : > { %1774 = vst.msk [vmem:[%s2857_s29 + $0x7c] sm:$0xf] %vm1742_vm3, %v2036_v11 }
 0x180   : > { %1772 = vst.msk [vmem:[%s2857_s29 + $0x74] sm:$0xf] %vm1742_vm3, %v2034_v30 }
 0x181 PF: > { %s13_s12 = sadd.s32 1, %s2320_s12  }
 0x182   : > { %p10_p5 = scmp.ge.s32.totalorder %s13_s12, 4  }
 0x184   :  { %12 = sbr.rel (!%p10_p5) target bundleno = 1 (0x1), region = 62 }

// kernel: cnn_forward.4
= control target key start
LH: loop header
LB: loop body
LE: loop exit
PB: predicated region body
PF: predicated region fallthrough
CT: control target
= control target key end

     0   :  { %s1568_s12 = smov 0   ;;  %s1827_s0 = inlined_call_operand.vmem [shape: bf16[512,288], index: 0, kind: input, shape index: {}]   ;;  %s1828_s1 = inlined_call_operand.vmem [shape: bf16[288,64], index: 1, kind: input, shape index: {}]   ;;  %s1829_s2 = inlined_call_operand.vmem [shape: f32[1,64], index: 2, kind: input, shape index: {}]   ;;  %s1830_s3 = inlined_call_operand.vmem [shape: bf16[128,64], index: 3, kind: output, shape index: {}]  }
   0x1 LB: > { %s1157_s13 = sadd.s32 4294967295, %s1546_s12   ;;  %p1161_p0 = scmp.ge.s32.totalorder %s1546_s12, 1  ;;  %s1546_s12 = sphi %s1568_s12, %s13_s12  }
   0x2   : > { %p139_p1 = scmp.lt.s32.totalorder %s1546_s12, 3 }
   0x4   : > { %p140_p2 = pnand %p1161_p0, %p139_p1 }
   0x5   : > { %v1458_v0 = vld [vmem:[%s1828_s1 + $0x40] sm:$0xff] (!%p140_p2)   ;;  %s1162_s16 = sshll.u32 (!%p140_p2), %s1157_s13, 5  ;;  %v1460_v2 = vld [vmem:[%s1828_s1 + $0x48] sm:$0xff] (!%p140_p2)   ;;  %v1462_v4 = vld [vmem:[%s1828_s1 + $0x50] sm:$0xff] (!%p140_p2)   ;;  %vm633_vm0 = vcmask (!%p140_p2), 261120   ;;  %s1164_s5 = sshll.u32 (!%p140_p2), %s1157_s13, 3 }
   0x6   : > { %143 = sbr.rel (%p140_p2) target bundleno = 356 (0x164), region = 32  ;;  %v1459_v1 = vld [vmem:[%s1828_s1] sm:$0xff] (!%p140_p2)   ;;  %1267 = vmatprep.subr.bf16.mxu0 (!%p140_p2), %v1458_v0  ;;  %1433 = vmatprep.subr.bf16.mxu1 (!%p140_p2), %v1458_v0  ;;  %p165_p3 = scmp.lt.s32.totalorder (!%p140_p2), %s1162_s16, 63  ;;  %v1461_v3 = vld [vmem:[%s1828_s1 + $0x8] sm:$0xff] (!%p140_p2)   ;;  %v1463_v5 = vld [vmem:[%s1828_s1 + $0x10] sm:$0xff] (!%p140_p2)   ;;  %vm1092_vm1 = vcmask (!%p140_p2), 519168  }
   0x7   : > { %1268 = vmatpush3.bf16.msra.mxu0 (!%p140_p2), %v1459_v1  ;;  %1441 = vmatpush3.bf16.msra.mxu1 (!%p140_p2), %v1459_v1  ;;  %v1464_v6 = vld [vmem:[%s1828_s1 + $0x58] sm:$0xff] (!%p140_p2)   ;;  %v1466_v8 = vld [vmem:[%s1828_s1 + $0x60] sm:$0xff] (!%p140_p2)   ;;  %v1468_v10 = vld [vmem:[%s1828_s1 + $0x68] sm:$0xff] (!%p140_p2)   ;;  %p172_p4 = scmp.lt.s32.totalorder (!%p140_p2), %s1164_s5, 15 }
   0x8   : > { %1269 = vmatprep.subr.bf16.mxu0 (!%p140_p2), %v1460_v2  ;;  %1434 = vmatprep.subr.bf16.mxu1 (!%p140_p2), %v1460_v2  ;;  %v1465_v7 = vld [vmem:[%s1828_s1 + $0x18] sm:$0xff] (!%p140_p2)   ;;  %v1467_v9 = vld [vmem:[%s1828_s1 + $0x20] sm:$0xff] (!%p140_p2)   ;;  %v1469_v13 = vld [vmem:[%s1828_s1 + $0x28] sm:$0xff] (!%p140_p2)  }
   0x9   : > { %v1470_v14 = vld [vmem:[%s1828_s1 + $0x70] sm:$0xff] (!%p140_p2)   ;;  %v1472_v16 = vld [vmem:[%s1828_s1 + $0x78] sm:$0xff] (!%p140_p2)   ;;  %v1480_v18 = vld [vmem:[%s1828_s1 + $0x80] sm:$0xff] (!%p140_p2)  }
   0xa   : > { %v1471_v15 = vld [vmem:[%s1828_s1 + $0x30] sm:$0xff] (!%p140_p2)   ;;  %v1473_v17 = vld [vmem:[%s1828_s1 + $0x38] sm:$0xff] (!%p140_p2)   ;;  %v1493_v23 = vld [vmem:[%s1828_s1 + $0x88] sm:$0xff] (!%p140_p2)  }
   0xb   : > { %1270 = vmatpush3.bf16.msra.mxu0 (!%p140_p2), %v1461_v3  ;;  %1442 = vmatpush3.bf16.msra.mxu1 (!%p140_p2), %v1461_v3 }
   0xc   : > { %1271 = vmatprep.subr.bf16.mxu0 (!%p140_p2), %v1462_v4  ;;  %1435 = vmatprep.subr.bf16.mxu1 (!%p140_p2), %v1462_v4 }
   0xd   : > { %s1832_s16 = smov (!%p165_p3, %s1162_s16), 63  ;;  %s1834_s5 = smov (!%p172_p4, %s1164_s5), 15 }
   0xe   : > { %s1449_s29 = smul.u32 12, %s1832_s16  ;;  %s1165_s13 = sshll.u32 %s1834_s5, 2 }
   0xf   : > { %1272 = vmatpush3.bf16.msra.mxu0 %v1463_v5  ;;  %1443 = vmatpush3.bf16.msra.mxu1 %v1463_v5  ;;  %s1789_s8 = scalar_lea.vmem %s1830_s3, %s1165_s13 }
  0x10   : > { %1273 = vmatprep.subr.bf16.mxu0 %v1464_v6  ;;  %1436 = vmatprep.subr.bf16.mxu1 %v1464_v6  ;;  %s1608_s9 = scalar_lea.vmem %s1827_s0, %s1449_s29 }
  0x11   : > { %v1476_v11 = vld [vmem:[%s1608_s9 + $0x4] ss:$12 sps:$4 sm:$0xff]   ;;  %v1474_v19 = vld [vmem:[%s1608_s9] ss:$12 sps:$4 sm:$0xff]   ;;  %v1481_v21 = vld [vmem:[%s1608_s9 + $0x1c] ss:$12 sps:$4 sm:$0xff]  }
  0x12   : > { %v1479_v12 = vld [vmem:[%s1608_s9 + $0x124] ss:$12 sps:$4 sm:$0xff]   ;;  %714 = vmatprep.mubr.bf16.mxu0 %v1476_v11  ;;  %v1477_v20 = vld [vmem:[%s1608_s9 + $0x120] ss:$12 sps:$4 sm:$0xff]   ;;  %v1483_v22 = vld [vmem:[%s1608_s9 + $0x13c] ss:$12 sps:$4 sm:$0xff]  }
  0x13   : > { %1274 = vmatpush3.bf16.msra.mxu0 %v1465_v7  ;;  %1444 = vmatpush3.bf16.msra.mxu1 %v1465_v7  ;;  %v1485_v24 = vld [vmem:[%s1608_s9 + $0x18] ss:$12 sps:$4 sm:$0xff]   ;;  %v1487_v26 = vld [vmem:[%s1608_s9 + $0x34] ss:$12 sps:$4 sm:$0xff]   ;;  %v1491_v28 = vld [vmem:[%s1608_s9 + $0x30] ss:$12 sps:$4 sm:$0xff]  }
  0x14   : > { %1275 = vmatprep.subr.bf16.mxu0 %v1466_v8  ;;  %1437 = vmatprep.subr.bf16.mxu1 %v1466_v8  ;;  %v1486_v25 = vld [vmem:[%s1608_s9 + $0x138] ss:$12 sps:$4 sm:$0xff]   ;;  %v1489_v27 = vld [vmem:[%s1608_s9 + $0x154] ss:$12 sps:$4 sm:$0xff]   ;;  %v1492_v29 = vld [vmem:[%s1608_s9 + $0x150] ss:$12 sps:$4 sm:$0xff]  }
  0x15   : > { %810 = vmatprep.mubr.bf16.mxu1 %v1479_v12  ;;  %v1494_v30 = vld [vmem:[%s1608_s9 + $0x4c] ss:$12 sps:$4 sm:$0xff]   ;;  %v1498_v32 = vld [vmem:[%s1608_s9 + $0x48] ss:$12 sps:$4 sm:$0xff]   ;;  %v1500_v34 = vld [vmem:[%s1608_s9 + $0x64] ss:$12 sps:$4 sm:$0xff]  }
  0x16   : > { %v1496_v31 = vld [vmem:[%s1608_s9 + $0x16c] ss:$12 sps:$4 sm:$0xff]   ;;  %v1499_v33 = vld [vmem:[%s1608_s9 + $0x168] ss:$12 sps:$4 sm:$0xff]   ;;  %v1509_v41 = vld [vmem:[%s1608_s9 + $0x50] ss:$12 sps:$4 sm:$0xff]  }
  0x17   : > { %1276 = vmatpush3.bf16.msra.mxu0 %v1467_v9  ;;  %1445 = vmatpush3.bf16.msra.mxu1 %v1467_v9  ;;  %v1502_v35 = vld [vmem:[%s1608_s9 + $0x8] ss:$12 sps:$4 sm:$0xff]   ;;  %v1503_v36 = vld [vmem:[%s1608_s9 + $0x60] ss:$12 sps:$4 sm:$0xff]   ;;  %v1507_v39 = vld [vmem:[%s1608_s9 + $0x38] ss:$12 sps:$4 sm:$0xff]  }
  0x18   : > { %1277 = vmatprep.subr.bf16.mxu0 %v1468_v10  ;;  %1438 = vmatprep.subr.bf16.mxu1 %v1468_v10  ;;  %v1504_v37 = vld [vmem:[%s1608_s9 + $0x20] ss:$12 sps:$4 sm:$0xff]   ;;  %v1505_v38 = vld [vmem:[%s1608_s9 + $0x7c] ss:$12 sps:$4 sm:$0xff]   ;;  %v1508_v40 = vld [vmem:[%s1608_s9 + $0x78] ss:$12 sps:$4 sm:$0xff]  }
  0x19   : > { %v1510_v42 = vld [vmem:[%s1608_s9 + $0x94] ss:$12 sps:$4 sm:$0xff]   ;;  %v1513_v44 = vld [vmem:[%s1608_s9 + $0x90] ss:$12 sps:$4 sm:$0xff]   ;;  %v1515_v46 = vld [vmem:[%s1608_s9 + $0xac] ss:$12 sps:$4 sm:$0xff]  }
  0x1a   : > { %v1512_v43 = vld [vmem:[%s1608_s9 + $0x68] ss:$12 sps:$4 sm:$0xff]   ;;  %v1514_v45 = vld [vmem:[%s1608_s9 + $0x80] ss:$12 sps:$4 sm:$0xff]   ;;  %v1517_v47 = vld [vmem:[%s1608_s9 + $0x98] ss:$12 sps:$4 sm:$0xff]  }
  0x1b   : > { %1278 = vmatpush3.bf16.msra.mxu0 %v1469_v13  ;;  %1446 = vmatpush3.bf16.msra.mxu1 %v1469_v13  ;;  %v1518_v48 = vld [vmem:[%s1608_s9 + $0xa8] ss:$12 sps:$4 sm:$0xff]   ;;  %v1519_v49 = vld [vmem:[%s1608_s9 + $0xb0] ss:$12 sps:$4 sm:$0xff]   ;;  %v1523_v52 = vld [vmem:[%s1608_s9 + $0xc0] ss:$12 sps:$4 sm:$0xff]  }
  0x1c   : > { %1279 = vmatprep.subr.bf16.mxu0 %v1470_v14  ;;  %1439 = vmatprep.subr.bf16.mxu1 %v1470_v14  ;;  %v1520_v50 = vld [vmem:[%s1608_s9 + $0xc4] ss:$12 sps:$4 sm:$0xff]   ;;  %v1522_v51 = vld [vmem:[%s1608_s9 + $0xc8] ss:$12 sps:$4 sm:$0xff]   ;;  %v1524_v53 = vld [vmem:[%s1608_s9 + $0xe0] ss:$12 sps:$4 sm:$0xff]  }
  0x1d   : > { %v1525_v54 = vld [vmem:[%s1608_s9 + $0xdc] ss:$12 sps:$4 sm:$0xff]   ;;  %v1527_v55 = vld [vmem:[%s1608_s9 + $0xf8] ss:$12 sps:$4 sm:$0xff]   ;;  %v1530_v58 = vld [vmem:[%s1608_s9 + $0xf4] ss:$12 sps:$4 sm:$0xff]  }
  0x1e   : > { %v1528_v56 = vld [vmem:[%s1608_s9 + $0xd8] ss:$12 sps:$4 sm:$0xff]   ;;  %v1529_v57 = vld [vmem:[%s1608_s9 + $0x110] ss:$12 sps:$4 sm:$0xff]   ;;  %v1532_v59 = vld [vmem:[%s1608_s9 + $0x128] ss:$12 sps:$4 sm:$0xff]  }
  0x1f   : > { %1280 = vmatpush3.bf16.msra.mxu0 %v1471_v15  ;;  %1447 = vmatpush3.bf16.msra.mxu1 %v1471_v15  ;;  %v1533_v60 = vld [vmem:[%s1608_s9 + $0xf0] ss:$12 sps:$4 sm:$0xff]   ;;  %v1534_v61 = vld [vmem:[%s1608_s9 + $0x140] ss:$12 sps:$4 sm:$0xff]   ;;  %v1537_v63 = vld [vmem:[%s1608_s9 + $0x158] ss:$12 sps:$4 sm:$0xff]  }
  0x20   : > { %1281 = vmatprep.subr.bf16.mxu0 %v1472_v16  ;;  %1440 = vmatprep.subr.bf16.mxu1 %v1472_v16  ;;  %v1535_v62 = vld [vmem:[%s1608_s9 + $0x10c] ss:$12 sps:$4 sm:$0xff]   ;;  %v1538_v0 = vld [vmem:[%s1608_s9 + $0x108] ss:$12 sps:$4 sm:$0xff]   ;;  %v1539_v1 = vld [vmem:[%s1608_s9 + $0x170] ss:$12 sps:$4 sm:$0xff]  }
  0x23   : > { %1282 = vmatpush3.bf16.msra.mxu0 %v1473_v17  ;;  %1448 = vmatpush3.bf16.msra.mxu1 %v1473_v17 }
  0x24   : > { %1397 = vmatprep.subr.bf16.mxu1 %v1480_v18 }
  0x26   : > { %715 = vmatmul.mubr.bf16.vlgmr.msra.gmra.mrb[0].mxu0 %v1474_v19  ;;  %811 = vmatmul.mubr.bf16.vlgmr.msra.gmra.mrb[0].mxu1 %v1477_v20 }
  0x27   : > { %1398 = vmatpush3.bf16.msra.mxu1 %v1480_v18  ;;  %722 = vmatprep.mubr.bf16.mxu0 %v1481_v21 }
  0x28   : > { %818 = vmatprep.mubr.bf16.mxu1 %v1483_v22  ;;  %1399 = vmatprep.subr.bf16.mxu1 %v1493_v23 }
  0x2b   : > { %1400 = vmatpush3.bf16.msra.mxu1 %v1493_v23 }
  0x2e   : > { %723 = vmatmul.mubr.bf16.gmra.mrb[4].mxu0 %v1485_v24  ;;  %819 = vmatmul.mubr.bf16.gmra.mrb[4].mxu1 %v1486_v25 }
  0x2f   : > { %730 = vmatprep.mubr.bf16.mxu0 %v1487_v26  ;;  %826 = vmatprep.mubr.bf16.mxu1 %v1489_v27 }
  0x36   : > { %731 = vmatmul.mubr.bf16.gmra.mrb[8].mxu0 %v1491_v28  ;;  %827 = vmatmul.mubr.bf16.gmra.mrb[8].mxu1 %v1492_v29 }
  0x37   : > { %738 = vmatprep.mubr.bf16.mxu0 %v1494_v30  ;;  %834 = vmatprep.mubr.bf16.mxu1 %v1496_v31 }
  0x3e   : > { %739 = vmatmul.mubr.bf16.gmra.mrb[12].mxu0 %v1498_v32  ;;  %835 = vmatmul.mubr.bf16.gmra.mrb[12].mxu1 %v1499_v33 }
  0x3f   : > { %746 = vmatprep.mubr.bf16.mxu0 %v1500_v34  ;;  %1401 = vmatprep.mubr.msk.bf16.mxu1 %vm633_vm0, %v1502_v35 }
  0x46   : > { %747 = vmatmul.mubr.bf16.gmra.mrb[16].mxu0 %v1503_v36  ;;  %1402 = vmatmul.mubr.msk.bf16.vlgmr.msra.gmra.mrb[16].mxu1 %vm633_vm0, %v1504_v37 }
  0x47   : > { %754 = vmatprep.mubr.bf16.mxu0 %v1505_v38  ;;  %1405 = vmatprep.mubr.msk.bf16.mxu1 %vm633_vm0, %v1507_v39 }
  0x4e   : > { %755 = vmatmul.mubr.bf16.gmra.mrb[20].mxu0 %v1508_v40  ;;  %1406 = vmatmul.mubr.msk.bf16.gmra.mrb[20].mxu1 %vm633_vm0, %v1509_v41 }
  0x4f   : > { %762 = vmatprep.mubr.bf16.mxu0 %v1510_v42  ;;  %1409 = vmatprep.mubr.msk.bf16.mxu1 %vm633_vm0, %v1512_v43 }
  0x56   : > { %763 = vmatmul.mubr.bf16.gmra.mrb[24].mxu0 %v1513_v44  ;;  %1410 = vmatmul.mubr.msk.bf16.gmra.mrb[24].mxu1 %vm633_vm0, %v1514_v45 }
  0x57   : > { %770 = vmatprep.mubr.bf16.mxu0 %v1515_v46  ;;  %1413 = vmatprep.mubr.msk.bf16.mxu1 %vm633_vm0, %v1517_v47 }
  0x5e   : > { %771 = vmatmul.mubr.bf16.gmra.mrb[28].mxu0 %v1518_v48  ;;  %1414 = vmatmul.mubr.msk.bf16.gmra.mrb[28].mxu1 %vm633_vm0, %v1519_v49 }
  0x5f   : > { %778 = vmatprep.mubr.bf16.mxu0 %v1520_v50  ;;  %1417 = vmatprep.mubr.msk.bf16.mxu1 %vm633_vm0, %v1522_v51  ;;  %v1720_v50 = vld [vmem:[%s1829_s2] ss:$0 sm:$0xff] }
  0x66   : > { %779 = vmatmul.mubr.bf16.gmra.mrb[32].mxu0 %v1523_v52  ;;  %1418 = vmatmul.mubr.msk.bf16.gmra.mrb[32].mxu1 %vm633_vm0, %v1524_v53 }
  0x67   : > { %786 = vmatprep.mubr.bf16.mxu0 %v1525_v54  ;;  %1421 = vmatprep.mubr.msk.bf16.mxu1 %vm633_vm0, %v1527_v55 }
  0x6e   : > { %787 = vmatmul.mubr.bf16.gmra.mrb[36].mxu0 %v1528_v56  ;;  %1422 = vmatmul.mubr.msk.bf16.gmra.mrb[36].mxu1 %vm633_vm0, %v1529_v57 }
  0x6f   : > { %794 = vmatprep.mubr.bf16.mxu0 %v1530_v58  ;;  %1425 = vmatprep.mubr.msk.bf16.mxu1 %vm633_vm0, %v1532_v59 }
  0x76   : > { %795 = vmatmul.mubr.bf16.gmra.mrb[40].mxu0 %v1533_v60  ;;  %1426 = vmatmul.mubr.msk.bf16.gmra.mrb[40].mxu1 %vm633_vm0, %v1534_v61 }
  0x77   : > { %802 = vmatprep.mubr.bf16.mxu0 %v1535_v62  ;;  %1429 = vmatprep.mubr.msk.bf16.mxu1 %vm633_vm0, %v1537_v63 }
  0x7e   : > { %803 = vmatmul.mubr.bf16.gmra.mrb[44].mxu0 %v1538_v0  ;;  %1430 = vmatmul.mubr.msk.bf16.gmra.mrb[44].mxu1 %vm633_vm0, %v1539_v1 }
  0xf9   : > { %v1283_v2 = vpop.f32.mrb[0].mxu0  ;;  %v1355_v3 = vpop.f32.mrb[0].mxu1 }
  0xfa   : > { %v1284_v4 = vpop.f32.mrb[1].mxu0  ;;  %v1356_v5 = vpop.f32.mrb[1].mxu1 }
  0xfb   : > { %v1285_v6 = vadd.f32 %v1284_v4, %v1283_v2  ;;  %v1286_v7 = vpop.f32.mrb[2].mxu0  ;;  %v1701_v8 = vadd.f32 %v1356_v5, %v1355_v3  ;;  %v1358_v9 = vpop.f32.mrb[2].mxu1 }
  0xfc   : > { %v1287_v10 = vpop.f32.mrb[3].mxu0  ;;  %v1359_v11 = vpop.f32.mrb[3].mxu1 }
  0xfd   : > { %v1288_v12 = vadd.f32 %v1287_v10, %v1286_v7  ;;  %v1703_v13 = vadd.f32 %v1359_v11, %v1358_v9  ;;  %v717_v54 = vadd.f32 %v1285_v6, %v1720_v50 }
  0xff   : > { %v720_v63 = vadd.f32 %v1288_v12, %v1720_v50 }
 0x101   : > { %v1289_v14 = vpop.f32.mrb[4].mxu0  ;;  %v1361_v15 = vpop.f32.mrb[4].mxu1 }
 0x102   : > { %v1290_v16 = vpop.f32.mrb[5].mxu0  ;;  %v1362_v17 = vpop.f32.mrb[5].mxu1 }
 0x103   : > { %v1291_v18 = vadd.f32 %v1290_v16, %v1289_v14  ;;  %v1292_v19 = vpop.f32.mrb[6].mxu0  ;;  %v1705_v20 = vadd.f32 %v1362_v17, %v1361_v15  ;;  %v1364_v21 = vpop.f32.mrb[6].mxu1 }
 0x104   : > { %v1293_v22 = vpop.f32.mrb[7].mxu0  ;;  %v1365_v23 = vpop.f32.mrb[7].mxu1 }
 0x105   : > { %v1294_v24 = vadd.f32 %v1293_v22, %v1292_v19  ;;  %v1707_v25 = vadd.f32 %v1365_v23, %v1364_v21  ;;  %v725_v51 = vadd.f32 %v1291_v18, %v1720_v50 }
 0x107   : > { %v728_v58 = vadd.f32 %v1294_v24, %v1720_v50 }
 0x109   : > { %v1295_v26 = vpop.f32.mrb[8].mxu0  ;;  %v1367_v27 = vpop.f32.mrb[8].mxu1 }
 0x10a   : > { %v1296_v28 = vpop.f32.mrb[9].mxu0  ;;  %v1368_v29 = vpop.f32.mrb[9].mxu1 }
 0x10b   : > { %v1297_v30 = vadd.f32 %v1296_v28, %v1295_v26  ;;  %v1298_v31 = vpop.f32.mrb[10].mxu0  ;;  %v1709_v32 = vadd.f32 %v1368_v29, %v1367_v27  ;;  %v1370_v33 = vpop.f32.mrb[10].mxu1 }
 0x10c   : > { %v1299_v34 = vpop.f32.mrb[11].mxu0  ;;  %v1371_v35 = vpop.f32.mrb[11].mxu1 }
 0x10d   : > { %v1300_v36 = vadd.f32 %v1299_v34, %v1298_v31  ;;  %v1711_v37 = vadd.f32 %v1371_v35, %v1370_v33  ;;  %v733_v9 = vadd.f32 %v1297_v30, %v1720_v50 }
 0x10f   : > { %v736_v19 = vadd.f32 %v1300_v36, %v1720_v50 }
 0x111   : > { %v1301_v38 = vpop.f32.mrb[12].mxu0  ;;  %v1373_v39 = vpop.f32.mrb[12].mxu1 }
 0x112   : > { %v1302_v40 = vpop.f32.mrb[13].mxu0  ;;  %v1374_v41 = vpop.f32.mrb[13].mxu1 }
 0x113   : > { %v1303_v42 = vadd.f32 %v1302_v40, %v1301_v38  ;;  %v1304_v43 = vpop.f32.mrb[14].mxu0  ;;  %v1713_v44 = vadd.f32 %v1374_v41, %v1373_v39  ;;  %v1376_v45 = vpop.f32.mrb[14].mxu1 }
 0x114   : > { %v1305_v46 = vpop.f32.mrb[15].mxu0  ;;  %v1377_v47 = vpop.f32.mrb[15].mxu1 }
 0x115   : > { %v1306_v48 = vadd.f32 %v1305_v46, %v1304_v43  ;;  %v1715_v49 = vadd.f32 %v1377_v47, %v1376_v45  ;;  %v741_v5 = vadd.f32 %v1303_v42, %v1720_v50 }
 0x117   : > { %v744_v15 = vadd.f32 %v1306_v48, %v1720_v50 }
 0x119   : > { %v1307_v52 = vpop.f32.mrb[16].mxu0  ;;  %v1403_v53 = vpop.f32.mrb[16].mxu1 }
 0x11a   : > { %v886_v55 = vadd.f32 %v1403_v53, %v725_v51  ;;  %v1308_v56 = vpop.f32.mrb[17].mxu0  ;;  %v877_v57 = vpop.f32.mrb[17].mxu1 }
 0x11b   : > { %v1309_v59 = vadd.f32 %v1308_v56, %v1307_v52  ;;  %v878_v60 = vadd.f32 %v877_v57, %v717_v54  ;;  %v1310_v61 = vpop.f32.mrb[18].mxu0  ;;  %v1404_v62 = vpop.f32.mrb[18].mxu1 }
 0x11c   : > { %v889_v0 = vadd.f32 %v1404_v62, %v728_v58  ;;  %v1311_v1 = vpop.f32.mrb[19].mxu0  ;;  %v880_v2 = vpop.f32.mrb[19].mxu1  ;;  %v1006_v42 = vmax.f32 %v886_v55, 0.0 }
 0x11d   : > { %v1312_v3 = vadd.f32 %v1311_v1, %v1310_v61  ;;  %v881_v4 = vadd.f32 %v880_v2, %v720_v63  ;;  %v749_v30 = vadd.f32 %v1309_v59, %v1720_v50  ;;  %v1004_v48 = vmax.f32 %v878_v60, 0.0 }
 0x11e   : > { %v1007_v54 = vmax.f32 %v889_v0, 0.0 }
 0x11f   : > { %v752_v41 = vadd.f32 %v1312_v3, %v1720_v50  ;;  %v1005_v58 = vmax.f32 %v881_v4, 0.0 }
 0x121   : > { %v1313_v7 = vpop.f32.mrb[20].mxu0  ;;  %v1407_v6 = vpop.f32.mrb[20].mxu1 }
 0x122   : > { %v1728_v10 = vadd.f32 %v1407_v6, %v741_v5  ;;  %v1314_v11 = vpop.f32.mrb[21].mxu0  ;;  %v893_v14 = vpop.f32.mrb[21].mxu1 }
 0x123   : > { %v1315_v16 = vadd.f32 %v1314_v11, %v1313_v7  ;;  %v894_v17 = vadd.f32 %v893_v14, %v733_v9  ;;  %v1316_v12 = vpop.f32.mrb[22].mxu0  ;;  %v1408_v18 = vpop.f32.mrb[22].mxu1 }
 0x124   : > { %v1732_v21 = vadd.f32 %v1408_v18, %v744_v15  ;;  %v1317_v22 = vpop.f32.mrb[23].mxu0  ;;  %v896_v23 = vpop.f32.mrb[23].mxu1 }
 0x125   : > { %v1318_v24 = vadd.f32 %v1317_v22, %v1316_v12  ;;  %v897_v26 = vadd.f32 %v896_v23, %v736_v19  ;;  %v757_v27 = vadd.f32 %v1315_v16, %v1720_v50  ;;  %v1008_v4 = vmax.f32 %v894_v17, 0.0 }
 0x127   : > { %v760_v35 = vadd.f32 %v1318_v24, %v1720_v50  ;;  %v1009_v19 = vmax.f32 %v897_v26, 0.0 }
 0x129   : > { %v1319_v28 = vpop.f32.mrb[24].mxu0  ;;  %v1411_v29 = vpop.f32.mrb[24].mxu1 }
 0x12a   : > { %v918_v31 = vadd.f32 %v1411_v29, %v757_v27  ;;  %v1320_v33 = vpop.f32.mrb[25].mxu0  ;;  %v909_v34 = vpop.f32.mrb[25].mxu1 }
 0x12b   : > { %v1321_v38 = vadd.f32 %v1320_v33, %v1319_v28  ;;  %v910_v39 = vadd.f32 %v909_v34, %v749_v30  ;;  %v1322_v36 = vpop.f32.mrb[26].mxu0  ;;  %v1412_v40 = vpop.f32.mrb[26].mxu1  ;;  %v1010_v28 = vmax.f32 %v1728_v10, 0.0 }
 0x12c   : > { %v1014_v43 = vmax.f32 %v918_v31, 0.0  ;;  %v921_v45 = vadd.f32 %v1412_v40, %v760_v35  ;;  %v1323_v46 = vpop.f32.mrb[27].mxu0  ;;  %v912_v47 = vpop.f32.mrb[27].mxu1 }
 0x12d   : > { %v1012_v51 = vmax.f32 %v910_v39, 0.0  ;;  %v1324_v52 = vadd.f32 %v1323_v46, %v1322_v36  ;;  %v913_v53 = vadd.f32 %v912_v47, %v752_v41  ;;  %v765_v2 = vadd.f32 %v1321_v38, %v1720_v50 }
 0x12e   : > { %v1738_v56 = vmax.f32 %v1006_v42, %v1014_v43  ;;  %v1015_v57 = vmax.f32 %v921_v45, 0.0  ;;  %v1011_v38 = vmax.f32 %v1732_v21, 0.0 }
 0x12f   : > { %v1740_v59 = vmax.f32 %v1004_v48, %v1012_v51  ;;  %v1013_v61 = vmax.f32 %v913_v53, 0.0  ;;  %v768_v9 = vadd.f32 %v1324_v52, %v1720_v50 }
 0x130   : > { %v1742_v62 = vmax.f32 %v1007_v54, %v1015_v57 }
 0x131   : > { %v1744_v63 = vmax.f32 %v1005_v58, %v1013_v61  ;;  %v1325_v55 = vpop.f32.mrb[28].mxu0  ;;  %v1415_v1 = vpop.f32.mrb[28].mxu1 }
 0x132   : > { %v1326_v60 = vpop.f32.mrb[29].mxu0  ;;  %v925_v3 = vpop.f32.mrb[29].mxu1 }
 0x133   : > { %v1327_v5 = vadd.f32 %v1326_v60, %v1325_v55  ;;  %v926_v7 = vadd.f32 %v925_v3, %v765_v2  ;;  %v1328_v0 = vpop.f32.mrb[30].mxu0  ;;  %v1416_v6 = vpop.f32.mrb[30].mxu1 }
 0x134   : > { %v1329_v11 = vpop.f32.mrb[31].mxu0  ;;  %v928_v14 = vpop.f32.mrb[31].mxu1 }
 0x135   : > { %v773_v15 = vadd.f32 %v1327_v5, %v1720_v50  ;;  %v1016_v16 = vmax.f32 %v926_v7, 0.0  ;;  %v1330_v12 = vadd.f32 %v1329_v11, %v1328_v0  ;;  %v929_v18 = vadd.f32 %v928_v14, %v768_v9 }
 0x136   : > { %v821_v7 = vadd.f32 %v1705_v20, %v1720_v50  ;;  %v816_v20 = vadd.f32 %v1703_v13, %v1720_v50 }
 0x137   : > { %v934_v22 = vadd.f32 %v1415_v1, %v773_v15  ;;  %v1749_v23 = vmax.f32 %v1008_v4, %v1016_v16  ;;  %v776_v24 = vadd.f32 %v1330_v12, %v1720_v50  ;;  %v1017_v27 = vmax.f32 %v929_v18, 0.0 }
 0x138   : > { %v813_v4 = vadd.f32 %v1701_v8, %v1720_v50  ;;  %v824_v16 = vadd.f32 %v1707_v25, %v1720_v50 }
 0x139   : > { %v1018_v29 = vmax.f32 %v934_v22, 0.0  ;;  %v937_v30 = vadd.f32 %v1416_v6, %v776_v24  ;;  %v1753_v31 = vmax.f32 %v1009_v19, %v1017_v27  ;;  %v1331_v17 = vpop.f32.mrb[32].mxu0  ;;  %v1419_v33 = vpop.f32.mrb[32].mxu1 }
 0x13a   : > { %v1332_v34 = vpop.f32.mrb[33].mxu0  ;;  %v941_v35 = vpop.f32.mrb[33].mxu1 }
 0x13b   : > { %v1756_v39 = vmax.f32 %v1010_v28, %v1018_v29  ;;  %v1019_v26 = vmax.f32 %v937_v30, 0.0  ;;  %v1333_v36 = vadd.f32 %v1332_v34, %v1331_v17  ;;  %v1334_v40 = vpop.f32.mrb[34].mxu0  ;;  %v1420_v41 = vpop.f32.mrb[34].mxu1 }
 0x13c   : > { %v1335_v42 = vpop.f32.mrb[35].mxu0  ;;  %v944_v43 = vpop.f32.mrb[35].mxu1 }
 0x13d   : > { %v1758_v10 = vmax.f32 %v1011_v38, %v1019_v26  ;;  %v781_v45 = vadd.f32 %v1333_v36, %v1720_v50  ;;  %v1336_v46 = vadd.f32 %v1335_v42, %v1334_v40 }
 0x13f   : > { %v942_v47 = vadd.f32 %v941_v35, %v781_v45  ;;  %v784_v48 = vadd.f32 %v1336_v46, %v1720_v50  ;;  %v837_v46 = vadd.f32 %v1713_v44, %v1720_v50 }
 0x141   : > { %v945_v51 = vadd.f32 %v944_v43, %v784_v48  ;;  %v1337_v52 = vpop.f32.mrb[36].mxu0  ;;  %v1762_v21 = vpop.f32.mrb[36].mxu1  ;;  %v1020_v24 = vmax.f32 %v942_v47, 0.0 }
 0x142   : > { %v1338_v53 = vpop.f32.mrb[37].mxu0  ;;  %v957_v54 = vpop.f32.mrb[37].mxu1 }
 0x143   : > { %v1339_v57 = vadd.f32 %v1338_v53, %v1337_v52  ;;  %v1340_v58 = vpop.f32.mrb[38].mxu0  ;;  %v1764_v61 = vpop.f32.mrb[38].mxu1  ;;  %v1021_v25 = vmax.f32 %v945_v51, 0.0 }
 0x144   : > { %v1341_v55 = vpop.f32.mrb[39].mxu0  ;;  %v960_v1 = vpop.f32.mrb[39].mxu1 }
 0x145   : > { %v789_v2 = vadd.f32 %v1339_v57, %v1720_v50  ;;  %v1342_v60 = vadd.f32 %v1341_v55, %v1340_v58 }
 0x147   : > { %v950_v3 = vadd.f32 %v1419_v33, %v789_v2  ;;  %v792_v5 = vadd.f32 %v1342_v60, %v1720_v50  ;;  %v840_v2 = vadd.f32 %v1715_v49, %v1720_v50 }
 0x149   : > { %v953_v0 = vadd.f32 %v1420_v41, %v792_v5  ;;  %v1343_v6 = vpop.f32.mrb[40].mxu0  ;;  %v1427_v9 = vpop.f32.mrb[40].mxu1  ;;  %v1022_v27 = vmax.f32 %v950_v3, 0.0 }
 0x14a   : > { %v982_v11 = vadd.f32 %v1427_v9, %v821_v7  ;;  %v1344_v14 = vpop.f32.mrb[41].mxu0  ;;  %v973_v15 = vpop.f32.mrb[41].mxu1  ;;  %v832_v9 = vadd.f32 %v1711_v37, %v1720_v50 }
 0x14b   : > { %v1345_v12 = vadd.f32 %v1344_v14, %v1343_v6  ;;  %v974_v18 = vadd.f32 %v973_v15, %v813_v4  ;;  %v1346_v19 = vpop.f32.mrb[42].mxu0  ;;  %v1428_v22 = vpop.f32.mrb[42].mxu1  ;;  %v1023_v26 = vmax.f32 %v953_v0, 0.0 }
 0x14c   : > { %v1030_v28 = vmax.f32 %v982_v11, 0.0  ;;  %v985_v8 = vadd.f32 %v1428_v22, %v824_v16  ;;  %v1347_v29 = vpop.f32.mrb[43].mxu0  ;;  %v976_v30 = vpop.f32.mrb[43].mxu1 }
 0x14d   : > { %v797_v17 = vadd.f32 %v1345_v12, %v1720_v50  ;;  %v1028_v33 = vmax.f32 %v974_v18, 0.0  ;;  %v1348_v34 = vadd.f32 %v1347_v29, %v1346_v19  ;;  %v977_v35 = vadd.f32 %v976_v30, %v816_v20 }
 0x14e   : > { %v1046_v38 = vmax.f32 %v1022_v27, %v1030_v28  ;;  %v1031_v36 = vmax.f32 %v985_v8, 0.0 }
 0x14f   : > { %v958_v40 = vadd.f32 %v957_v54, %v797_v17  ;;  %v1044_v41 = vmax.f32 %v1020_v24, %v1028_v33  ;;  %v800_v13 = vadd.f32 %v1348_v34, %v1720_v50  ;;  %v1029_v42 = vmax.f32 %v977_v35, 0.0 }
 0x150   : > { %v1054_v43 = vmax.f32 %v1738_v56, %v1046_v38  ;;  %v1047_v45 = vmax.f32 %v1023_v26, %v1031_v36  ;;  %v829_v56 = vadd.f32 %v1709_v32, %v1720_v50 }
 0x151   : > { %v1052_v47 = vmax.f32 %v1740_v59, %v1044_v41  ;;  %v961_v48 = vadd.f32 %v960_v1, %v800_v13  ;;  %v1045_v51 = vmax.f32 %v1021_v25, %v1029_v42  ;;  %v1349_v52 = vpop.f32.mrb[44].mxu0  ;;  %v1431_v53 = vpop.f32.mrb[44].mxu1 }
 0x152   : > { %v1261_v54 = vpack.c.bf16 %v1054_v43, %v1054_v43  ;;  %v1055_v57 = vmax.f32 %v1742_v62, %v1047_v45  ;;  %v998_v58 = vadd.f32 %v1431_v53, %v837_v46  ;;  %v1350_v44 = vpop.f32.mrb[45].mxu0  ;;  %v989_v55 = vpop.f32.mrb[45].mxu1  ;;  %v1024_v62 = vmax.f32 %v958_v40, 0.0 }
 0x153   : > { %v1259_v60 = vpack.c.bf16 %v1052_v47, %v1052_v47  ;;  %v1053_v59 = vmax.f32 %v1744_v63, %v1045_v51  ;;  %v1351_v1 = vadd.f32 %v1350_v44, %v1349_v52  ;;  %v990_v3 = vadd.f32 %v989_v55, %v829_v56  ;;  %v1352_v5 = vpop.f32.mrb[46].mxu0  ;;  %v1432_v7 = vpop.f32.mrb[46].mxu1 }
 0x154   : > { %1095 = vst.msk [vmem:[%s1789_s8 + $0x8] sm:$0xf] %vm1092_vm1, %v1261_v54  ;;  %v1262_v32 = vpack.c.bf16 %v1055_v57, %v1055_v57  ;;  %v1001_v0 = vadd.f32 %v1432_v7, %v840_v2  ;;  %v1353_v6 = vpop.f32.mrb[47].mxu0  ;;  %v992_v4 = vpop.f32.mrb[47].mxu1  ;;  %v1025_v37 = vmax.f32 %v961_v48, 0.0  ;;  %v1034_v22 = vmax.f32 %v998_v58, 0.0 }
 0x155   : > { %1093 = vst.msk [vmem:[%s1789_s8] sm:$0xf] %vm1092_vm1, %v1259_v60  ;;  %v1260_v49 = vpack.c.bf16 %v1053_v59, %v1053_v59  ;;  %v805_v63 = vadd.f32 %v1351_v1, %v1720_v50  ;;  %v1032_v11 = vmax.f32 %v990_v3, 0.0  ;;  %v1354_v14 = vadd.f32 %v1353_v6, %v1352_v5 }
 0x156   : > { %1096 = vst.msk [vmem:[%s1789_s8 + $0xc] sm:$0xf] %vm1092_vm1, %v1262_v32  ;;  %v993_v15 = vadd.f32 %v992_v4, %v832_v9  ;;  %v1035_v30 = vmax.f32 %v1001_v0, 0.0 }
 0x157   : > { %1094 = vst.msk [vmem:[%s1789_s8 + $0x4] sm:$0xf] %vm1092_vm1, %v1260_v49  ;;  %v966_v16 = vadd.f32 %v1762_v21, %v805_v63  ;;  %v1048_v12 = vmax.f32 %v1024_v62, %v1032_v11  ;;  %v808_v18 = vadd.f32 %v1354_v14, %v1720_v50 }
 0x158   : > { %v1033_v19 = vmax.f32 %v993_v15, 0.0 }
 0x159   : > { %v1026_v20 = vmax.f32 %v966_v16, 0.0  ;;  %v1056_v24 = vmax.f32 %v1749_v23, %v1048_v12  ;;  %v969_v27 = vadd.f32 %v1764_v61, %v808_v18 }
 0x15a   : > { %v1049_v28 = vmax.f32 %v1025_v37, %v1033_v19 }
 0x15b   : > { %v1050_v8 = vmax.f32 %v1026_v20, %v1034_v22  ;;  %v1263_v29 = vpack.c.bf16 %v1056_v24, %v1056_v24  ;;  %v1027_v21 = vmax.f32 %v969_v27, 0.0 }
 0x15c   : > { %v1057_v17 = vmax.f32 %v1753_v31, %v1049_v28 }
 0x15d   : > { %v1058_v50 = vmax.f32 %v1756_v39, %v1050_v8  ;;  %1097 = vst.msk [vmem:[%s1789_s8 + $0x10] sm:$0xf] %vm1092_vm1, %v1263_v29  ;;  %v1051_v33 = vmax.f32 %v1027_v21, %v1035_v30 }
 0x15e   : > { %v1264_v34 = vpack.c.bf16 %v1057_v17, %v1057_v17 }
 0x15f   : > { %v1265_v35 = vpack.c.bf16 %v1058_v50, %v1058_v50  ;;  %v1059_v25 = vmax.f32 %v1758_v10, %v1051_v33 }
 0x160   : > { %1098 = vst.msk [vmem:[%s1789_s8 + $0x14] sm:$0xf] %vm1092_vm1, %v1264_v34 }
 0x161   : > { %1099 = vst.msk [vmem:[%s1789_s8 + $0x18] sm:$0xf] %vm1092_vm1, %v1265_v35  ;;  %v1266_v23 = vpack.c.bf16 %v1059_v25, %v1059_v25 }
 0x163   : > { %1100 = vst.msk [vmem:[%s1789_s8 + $0x1c] sm:$0xf] %vm1092_vm1, %v1266_v23 }
 0x164 PF: > { %s13_s12 = sadd.s32 1, %s1546_s12  }
 0x165   : > { %p10_p5 = scmp.ge.s32.totalorder %s13_s12, 4  }
 0x167   :  { %12 = sbr.rel (!%p10_p5) target bundleno = 1 (0x1), region = 62 }

// kernel: cnn_forward.5
= control target key start
LH: loop header
LB: loop body
LE: loop exit
PB: predicated region body
PF: predicated region fallthrough
CT: control target
= control target key end

     0   :  { %s6069_s18 = smov 0   ;;  %s6071_s19 = smov 0   ;;  %s6855_s0 = inlined_call_operand.vmem [shape: bf16[8,4096], index: 0, kind: input, shape index: {}]   ;;  %s6856_s1 = inlined_call_operand.vmem [shape: bf16[4096,512], index: 1, kind: input, shape index: {}]   ;;  %s6857_s2 = inlined_call_operand.vmem [shape: f32[1,512], index: 2, kind: input, shape index: {}]   ;;  %s6858_s3 = inlined_call_operand.vmem [shape: bf16[512,10], index: 3, kind: input, shape index: {}]   ;;  %s6859_s4 = inlined_call_operand.vmem [shape: f32[1,10], index: 4, kind: input, shape index: {}]   ;;  %s6860_s5 = inlined_call_operand.vmem [shape: f32[8,10], index: 5, kind: output, shape index: {}]  }
   0x1   :  { %s6073_s20 = smov 0  }
   0x2 LB: > { %s24_s21 = sadd.s32 1, %s6032_s19  ;;  %p4556_p0 = scmp.ge.s32.totalorder %s6036_s20, 1  ;;  %s6036_s20 = sphi %s6073_s20, %s15_s20   ;;  %s6032_s19 = sphi %s6071_s19, %s6862_s19   ;;  %s6028_s18 = sphi %s6069_s18, %s6861_s18  }
   0x3   : > { %p25_p1 = scmp.ge.s32.totalorder %s24_s21, 2  ;;  %p218_p2 = scmp.lt.s32.totalorder %s6036_s20, 3 }
   0x5   : > { %s6864_s21 = smov (%p25_p1, %s24_s21), 0  ;;  %p219_p3 = pnand %p4556_p0, %p218_p2 }
   0x6   : > { %s4557_s22 = sshll.u32 (!%p219_p3), %s6028_s18, 4  ;;  %s4559_s23 = sshll.u32 (!%p219_p3), %s6028_s18, 8 }
   0x7   : > { %222 = sbr.rel (%p219_p3) target bundleno = 989 (0x3dd), region = 40  ;;  %p258_p4 = scmp.lt.s32.totalorder (!%p219_p3), %s4557_s22, 31 }
   0x8   : > { %p266_p5 = scmp.lt.s32.totalorder (!%p219_p3), %s4559_s23, 511  ;;  %p4562_p6 = scmp.ne.s32.totalorder (!%p219_p3), %s6028_s18, 0 }
   0xe   : > { %s6866_s22 = smov (!%p258_p4, %s4557_s22), 31  ;;  %s6868_s23 = smov (!%p266_p5, %s4559_s23), 511 }
   0xf   : > { %s4558_s24 = sshll.u32 %s6866_s22, 2  ;;  %s5128_s28 = sshll.u32 %s6868_s23, 4  ;;  %v6038_v0 = vmov (!%p4562_p6), 0.0  }
  0x10   : > { %s6094_s27 = scalar_lea.vmem %s6855_s0, %s4558_s24  ;;  %s6099_s6 = scalar_lea.vmem %s6856_s1, %s5128_s28  ;;  %281 = vst [vmem:[#allocation2] sm:$0xff] (!%p4562_p6), %v6038_v0  ;;  %282 = vst [vmem:[#allocation2 + $0x8] sm:$0xff] (!%p4562_p6), %v6038_v0 }
  0x11   : > { %280 = sbr.rel (%p4562_p6) target bundleno = 24 (0x18), region = 44  ;;  %283 = vst [vmem:[#allocation2 + $0x10] sm:$0xff] (!%p4562_p6), %v6038_v0  ;;  %284 = vst [vmem:[#allocation2 + $0x18] sm:$0xff] (!%p4562_p6), %v6038_v0 }
  0x18 PF: > { %v5198_v1 = vld [vmem:[%s6099_s6 + $0x4] ss:$16 sps:$4 sm:$0xff]   ;;  %v5202_v3 = vld [vmem:[%s6099_s6] ss:$16 sps:$4 sm:$0xff]   ;;  %v290_v49 = vld [vmem:[%s6094_s27 + $0x8] sm:$0xff]  ;;  %p5091_p7 = scmp.ne.s32.totalorder %s6028_s18, 1 }
  0x19   : > { %v5200_v2 = vld [vmem:[%s6099_s6 + $0x204] ss:$16 sps:$4 sm:$0xff]   ;;  %3425 = vmatprep.subr.bf16.mxu0 %v5198_v1  ;;  %v5203_v4 = vld [vmem:[%s6099_s6 + $0x200] ss:$16 sps:$4 sm:$0xff]   ;;  %v6154_v52 = vcombine.high %v290_v49, %v290_v49  ;;  %vm4474_vm0 = vcmask (!%p5091_p7), 80896  }
  0x1a   : > { %3466 = vmatprep.subr.bf16.mxu1 %v5200_v2  ;;  %v5204_v5 = vld [vmem:[%s6099_s6 + $0x24] ss:$16 sps:$4 sm:$0xff]   ;;  %3426 = vmatpush1.bf16.msra.mxu0 %v5202_v3  ;;  %v5208_v7 = vld [vmem:[%s6099_s6 + $0x20] ss:$16 sps:$4 sm:$0xff]  }
  0x1b   : > { %3467 = vmatpush1.bf16.msra.mxu1 %v5203_v4  ;;  %v5206_v6 = vld [vmem:[%s6099_s6 + $0x224] ss:$16 sps:$4 sm:$0xff]   ;;  %3427 = vmatprep.subr.bf16.mxu0 %v5204_v5  ;;  %v5209_v8 = vld [vmem:[%s6099_s6 + $0x220] ss:$16 sps:$4 sm:$0xff]  }
  0x1c   : > { %3468 = vmatprep.subr.bf16.mxu1 %v5206_v6  ;;  %v5210_v9 = vld [vmem:[%s6099_s6 + $0x44] ss:$16 sps:$4 sm:$0xff]   ;;  %v5214_v11 = vld [vmem:[%s6099_s6 + $0x40] ss:$16 sps:$4 sm:$0xff]   ;;  %3498 = vmatprep.mubr.bf16.mxu1 %v6154_v52 }
  0x1d   : > { %v5212_v10 = vld [vmem:[%s6099_s6 + $0x244] ss:$16 sps:$4 sm:$0xff]   ;;  %v5215_v12 = vld [vmem:[%s6099_s6 + $0x240] ss:$16 sps:$4 sm:$0xff]  }
  0x1e   : > { %3428 = vmatpush1.bf16.msra.mxu0 %v5208_v7  ;;  %v5216_v13 = vld [vmem:[%s6099_s6 + $0x64] ss:$16 sps:$4 sm:$0xff]   ;;  %v5220_v15 = vld [vmem:[%s6099_s6 + $0x60] ss:$16 sps:$4 sm:$0xff]  }
  0x1f   : > { %3469 = vmatpush1.bf16.msra.mxu1 %v5209_v8  ;;  %3429 = vmatprep.subr.bf16.mxu0 %v5210_v9  ;;  %v5218_v14 = vld [vmem:[%s6099_s6 + $0x264] ss:$16 sps:$4 sm:$0xff]   ;;  %v5221_v16 = vld [vmem:[%s6099_s6 + $0x260] ss:$16 sps:$4 sm:$0xff]   ;;  %v6178_v8 = vcombine.low %v290_v49, %v290_v49 }
  0x20   : > { %3470 = vmatprep.subr.bf16.mxu1 %v5212_v10  ;;  %v5222_v17 = vld [vmem:[%s6099_s6 + $0x84] ss:$16 sps:$4 sm:$0xff]   ;;  %v5226_v19 = vld [vmem:[%s6099_s6 + $0x80] ss:$16 sps:$4 sm:$0xff]  }
  0x21   : > { %v5224_v18 = vld [vmem:[%s6099_s6 + $0x284] ss:$16 sps:$4 sm:$0xff]   ;;  %v5227_v20 = vld [vmem:[%s6099_s6 + $0x280] ss:$16 sps:$4 sm:$0xff]  }
  0x22   : > { %3430 = vmatpush1.bf16.msra.mxu0 %v5214_v11  ;;  %v5228_v21 = vld [vmem:[%s6099_s6 + $0xa4] ss:$16 sps:$4 sm:$0xff]   ;;  %v5232_v23 = vld [vmem:[%s6099_s6 + $0xa0] ss:$16 sps:$4 sm:$0xff]  }
  0x23   : > { %3471 = vmatpush1.bf16.msra.mxu1 %v5215_v12  ;;  %3431 = vmatprep.subr.bf16.mxu0 %v5216_v13  ;;  %v5230_v22 = vld [vmem:[%s6099_s6 + $0x2a4] ss:$16 sps:$4 sm:$0xff]   ;;  %v5233_v24 = vld [vmem:[%s6099_s6 + $0x2a0] ss:$16 sps:$4 sm:$0xff]  }
  0x24   : > { %3472 = vmatprep.subr.bf16.mxu1 %v5218_v14  ;;  %v5234_v25 = vld [vmem:[%s6099_s6 + $0xc4] ss:$16 sps:$4 sm:$0xff]   ;;  %v5238_v27 = vld [vmem:[%s6099_s6 + $0xc0] ss:$16 sps:$4 sm:$0xff]  }
  0x25   : > { %v5236_v26 = vld [vmem:[%s6099_s6 + $0x2c4] ss:$16 sps:$4 sm:$0xff]   ;;  %v5239_v28 = vld [vmem:[%s6099_s6 + $0x2c0] ss:$16 sps:$4 sm:$0xff]  }
  0x26   : > { %3432 = vmatpush1.bf16.msra.mxu0 %v5220_v15  ;;  %v5240_v29 = vld [vmem:[%s6099_s6 + $0xe4] ss:$16 sps:$4 sm:$0xff]   ;;  %v5244_v31 = vld [vmem:[%s6099_s6 + $0xe0] ss:$16 sps:$4 sm:$0xff]  }
  0x27   : > { %3473 = vmatpush1.bf16.msra.mxu1 %v5221_v16  ;;  %3433 = vmatprep.subr.bf16.mxu0 %v5222_v17  ;;  %v5242_v30 = vld [vmem:[%s6099_s6 + $0x2e4] ss:$16 sps:$4 sm:$0xff]   ;;  %v5245_v32 = vld [vmem:[%s6099_s6 + $0x2e0] ss:$16 sps:$4 sm:$0xff]  }
  0x28   : > { %3474 = vmatprep.subr.bf16.mxu1 %v5224_v18  ;;  %v5246_v33 = vld [vmem:[%s6099_s6 + $0x104] ss:$16 sps:$4 sm:$0xff]   ;;  %v5250_v35 = vld [vmem:[%s6099_s6 + $0x100] ss:$16 sps:$4 sm:$0xff]  }
  0x29   : > { %v5248_v34 = vld [vmem:[%s6099_s6 + $0x304] ss:$16 sps:$4 sm:$0xff]   ;;  %v5251_v36 = vld [vmem:[%s6099_s6 + $0x300] ss:$16 sps:$4 sm:$0xff]  }
  0x2a   : > { %3434 = vmatpush1.bf16.msra.mxu0 %v5226_v19  ;;  %v5252_v37 = vld [vmem:[%s6099_s6 + $0x124] ss:$16 sps:$4 sm:$0xff]   ;;  %v5256_v39 = vld [vmem:[%s6099_s6 + $0x120] ss:$16 sps:$4 sm:$0xff]  }
  0x2b   : > { %3475 = vmatpush1.bf16.msra.mxu1 %v5227_v20  ;;  %3435 = vmatprep.subr.bf16.mxu0 %v5228_v21  ;;  %v5254_v38 = vld [vmem:[%s6099_s6 + $0x324] ss:$16 sps:$4 sm:$0xff]   ;;  %v5257_v40 = vld [vmem:[%s6099_s6 + $0x320] ss:$16 sps:$4 sm:$0xff]  }
  0x2c   : > { %3476 = vmatprep.subr.bf16.mxu1 %v5230_v22  ;;  %v5258_v41 = vld [vmem:[%s6099_s6 + $0x144] ss:$16 sps:$4 sm:$0xff]   ;;  %v5262_v43 = vld [vmem:[%s6099_s6 + $0x140] ss:$16 sps:$4 sm:$0xff]  }
  0x2d   : > { %v5260_v42 = vld [vmem:[%s6099_s6 + $0x344] ss:$16 sps:$4 sm:$0xff]   ;;  %v5263_v44 = vld [vmem:[%s6099_s6 + $0x340] ss:$16 sps:$4 sm:$0xff]  }
  0x2e   : > { %3436 = vmatpush1.bf16.msra.mxu0 %v5232_v23  ;;  %v5264_v45 = vld [vmem:[%s6099_s6 + $0x164] ss:$16 sps:$4 sm:$0xff]   ;;  %v5268_v50 = vld [vmem:[%s6099_s6 + $0x160] ss:$16 sps:$4 sm:$0xff]  }
  0x2f   : > { %3477 = vmatpush1.bf16.msra.mxu1 %v5233_v24  ;;  %3437 = vmatprep.subr.bf16.mxu0 %v5234_v25  ;;  %v5266_v46 = vld [vmem:[%s6099_s6 + $0x364] ss:$16 sps:$4 sm:$0xff]   ;;  %v5269_v51 = vld [vmem:[%s6099_s6 + $0x360] ss:$16 sps:$4 sm:$0xff]  }
  0x30   : > { %3478 = vmatprep.subr.bf16.mxu1 %v5236_v26  ;;  %v289_v47 = vld [vmem:[%s6094_s27] sm:$0xff] }
  0x31   : > { %v6149_v48 = vcombine.high %v289_v47, %v289_v47  ;;  %v5270_v53 = vld [vmem:[%s6099_s6 + $0x184] ss:$16 sps:$4 sm:$0xff]   ;;  %v5274_v55 = vld [vmem:[%s6099_s6 + $0x180] ss:$16 sps:$4 sm:$0xff]   ;;  %v6176_v7 = vcombine.low %v289_v47, %v289_v47 }
  0x32   : > { %3438 = vmatpush1.bf16.msra.mxu0 %v5238_v27  ;;  %v5272_v54 = vld [vmem:[%s6099_s6 + $0x384] ss:$16 sps:$4 sm:$0xff]   ;;  %v5275_v56 = vld [vmem:[%s6099_s6 + $0x380] ss:$16 sps:$4 sm:$0xff]  }
  0x33   : > { %3479 = vmatpush1.bf16.msra.mxu1 %v5239_v28  ;;  %3439 = vmatprep.subr.bf16.mxu0 %v5240_v29  ;;  %v5276_v57 = vld [vmem:[%s6099_s6 + $0x1a4] ss:$16 sps:$4 sm:$0xff]   ;;  %v5280_v59 = vld [vmem:[%s6099_s6 + $0x1a0] ss:$16 sps:$4 sm:$0xff]  }
  0x34   : > { %3480 = vmatprep.subr.bf16.mxu1 %v5242_v30  ;;  %3457 = vmatprep.mubr.bf16.mxu0 %v6149_v48  ;;  %v5278_v58 = vld [vmem:[%s6099_s6 + $0x3a4] ss:$16 sps:$4 sm:$0xff]   ;;  %v5281_v60 = vld [vmem:[%s6099_s6 + $0x3a0] ss:$16 sps:$4 sm:$0xff]  }
  0x35   : > { %v5282_v61 = vld [vmem:[%s6099_s6 + $0x1c4] ss:$16 sps:$4 sm:$0xff]   ;;  %v5286_v63 = vld [vmem:[%s6099_s6 + $0x1c0] ss:$16 sps:$4 sm:$0xff]  }
  0x36   : > { %3440 = vmatpush1.bf16.msra.mxu0 %v5244_v31  ;;  %v5284_v62 = vld [vmem:[%s6099_s6 + $0x3c4] ss:$16 sps:$4 sm:$0xff]   ;;  %v5287_v0 = vld [vmem:[%s6099_s6 + $0x3c0] ss:$16 sps:$4 sm:$0xff]  }
  0x37   : > { %3481 = vmatpush1.bf16.msra.mxu1 %v5245_v32  ;;  %3441 = vmatprep.subr.bf16.mxu0 %v5246_v33  ;;  %v5288_v1 = vld [vmem:[%s6099_s6 + $0x1e4] ss:$16 sps:$4 sm:$0xff]   ;;  %v5292_v3 = vld [vmem:[%s6099_s6 + $0x1e0] ss:$16 sps:$4 sm:$0xff]  }
  0x38   : > { %3482 = vmatprep.subr.bf16.mxu1 %v5248_v34  ;;  %v5290_v2 = vld [vmem:[%s6099_s6 + $0x3e4] ss:$16 sps:$4 sm:$0xff]   ;;  %v5293_v4 = vld [vmem:[%s6099_s6 + $0x3e0] ss:$16 sps:$4 sm:$0xff]   ;;  %v6210_v34 = vld [vmem:[%s6094_s27 + $0x18] sm:$0xff] }
  0x39   : > { %v5300_v5 = vld [vmem:[%s6099_s6 + $0x404] ss:$16 sps:$4 sm:$0xff]   ;;  %v5298_v9 = vld [vmem:[%s6099_s6 + $0x400] ss:$16 sps:$4 sm:$0xff]  }
  0x3a   : > { %3442 = vmatpush1.bf16.msra.mxu0 %v5250_v35  ;;  %v5303_v6 = vld [vmem:[%s6099_s6 + $0x604] ss:$16 sps:$4 sm:$0xff]   ;;  %v5301_v10 = vld [vmem:[%s6099_s6 + $0x600] ss:$16 sps:$4 sm:$0xff]  }
  0x3b   : > { %3483 = vmatpush1.bf16.msra.mxu1 %v5251_v36  ;;  %3443 = vmatprep.subr.bf16.mxu0 %v5252_v37  ;;  %v5306_v11 = vld [vmem:[%s6099_s6 + $0x424] ss:$16 sps:$4 sm:$0xff]   ;;  %v5304_v13 = vld [vmem:[%s6099_s6 + $0x420] ss:$16 sps:$4 sm:$0xff]  }
  0x3c   : > { %3484 = vmatprep.subr.bf16.mxu1 %v5254_v38  ;;  %v5309_v12 = vld [vmem:[%s6099_s6 + $0x624] ss:$16 sps:$4 sm:$0xff]   ;;  %v5307_v14 = vld [vmem:[%s6099_s6 + $0x620] ss:$16 sps:$4 sm:$0xff]   ;;  %v6220_v38 = vcombine.high %v6210_v34, %v6210_v34 }
  0x3d   : > { %v5312_v15 = vld [vmem:[%s6099_s6 + $0x444] ss:$16 sps:$4 sm:$0xff]   ;;  %v5310_v17 = vld [vmem:[%s6099_s6 + $0x440] ss:$16 sps:$4 sm:$0xff]  }
  0x3e   : > { %3444 = vmatpush1.bf16.msra.mxu0 %v5256_v39  ;;  %v5315_v16 = vld [vmem:[%s6099_s6 + $0x644] ss:$16 sps:$4 sm:$0xff]   ;;  %v5313_v18 = vld [vmem:[%s6099_s6 + $0x640] ss:$16 sps:$4 sm:$0xff]  }
  0x3f   : > { %3485 = vmatpush1.bf16.msra.mxu1 %v5257_v40  ;;  %3445 = vmatprep.subr.bf16.mxu0 %v5258_v41  ;;  %v5318_v19 = vld [vmem:[%s6099_s6 + $0x464] ss:$16 sps:$4 sm:$0xff]   ;;  %v5316_v21 = vld [vmem:[%s6099_s6 + $0x460] ss:$16 sps:$4 sm:$0xff]  }
  0x40   : > { %3486 = vmatprep.subr.bf16.mxu1 %v5260_v42  ;;  %v5321_v20 = vld [vmem:[%s6099_s6 + $0x664] ss:$16 sps:$4 sm:$0xff]   ;;  %v5319_v22 = vld [vmem:[%s6099_s6 + $0x660] ss:$16 sps:$4 sm:$0xff]  }
  0x41   : > { %v5324_v23 = vld [vmem:[%s6099_s6 + $0x484] ss:$16 sps:$4 sm:$0xff]   ;;  %v5322_v25 = vld [vmem:[%s6099_s6 + $0x480] ss:$16 sps:$4 sm:$0xff]  }
  0x42   : > { %3446 = vmatpush1.bf16.msra.mxu0 %v5262_v43  ;;  %v5327_v24 = vld [vmem:[%s6099_s6 + $0x684] ss:$16 sps:$4 sm:$0xff]   ;;  %v5325_v26 = vld [vmem:[%s6099_s6 + $0x680] ss:$16 sps:$4 sm:$0xff]  }
  0x43   : > { %3487 = vmatpush1.bf16.msra.mxu1 %v5263_v44  ;;  %3447 = vmatprep.subr.bf16.mxu0 %v5264_v45  ;;  %v5330_v27 = vld [vmem:[%s6099_s6 + $0x4a4] ss:$16 sps:$4 sm:$0xff]   ;;  %v5328_v29 = vld [vmem:[%s6099_s6 + $0x4a0] ss:$16 sps:$4 sm:$0xff]  }
  0x44   : > { %3488 = vmatprep.subr.bf16.mxu1 %v5266_v46  ;;  %v5333_v28 = vld [vmem:[%s6099_s6 + $0x6a4] ss:$16 sps:$4 sm:$0xff]   ;;  %v5331_v30 = vld [vmem:[%s6099_s6 + $0x6a0] ss:$16 sps:$4 sm:$0xff]  }
  0x45   : > { %v5336_v31 = vld [vmem:[%s6099_s6 + $0x4c4] ss:$16 sps:$4 sm:$0xff]   ;;  %v5334_v35 = vld [vmem:[%s6099_s6 + $0x4c0] ss:$16 sps:$4 sm:$0xff]  }
  0x46   : > { %3448 = vmatpush1.bf16.msra.mxu0 %v5268_v50  ;;  %v5339_v32 = vld [vmem:[%s6099_s6 + $0x6c4] ss:$16 sps:$4 sm:$0xff]   ;;  %v5337_v36 = vld [vmem:[%s6099_s6 + $0x6c0] ss:$16 sps:$4 sm:$0xff]  }
  0x47   : > { %3489 = vmatpush1.bf16.msra.mxu1 %v5269_v51  ;;  %3449 = vmatprep.subr.bf16.mxu0 %v5270_v53  ;;  %v6207_v33 = vld [vmem:[%s6094_s27 + $0x10] sm:$0xff] }
  0x48   : > { %3490 = vmatprep.subr.bf16.mxu1 %v5272_v54  ;;  %v6216_v37 = vcombine.high %v6207_v33, %v6207_v33  ;;  %v5342_v39 = vld [vmem:[%s6099_s6 + $0x4e4] ss:$16 sps:$4 sm:$0xff]   ;;  %v5340_v41 = vld [vmem:[%s6099_s6 + $0x4e0] ss:$16 sps:$4 sm:$0xff]  }
  0x49   : > { %v5345_v40 = vld [vmem:[%s6099_s6 + $0x6e4] ss:$16 sps:$4 sm:$0xff]   ;;  %v5343_v42 = vld [vmem:[%s6099_s6 + $0x6e0] ss:$16 sps:$4 sm:$0xff]  }
  0x4a   : > { %3450 = vmatpush1.bf16.msra.mxu0 %v5274_v55  ;;  %v5348_v43 = vld [vmem:[%s6099_s6 + $0x504] ss:$16 sps:$4 sm:$0xff]   ;;  %v5346_v45 = vld [vmem:[%s6099_s6 + $0x500] ss:$16 sps:$4 sm:$0xff]  }
  0x4b   : > { %3491 = vmatpush1.bf16.msra.mxu1 %v5275_v56  ;;  %3451 = vmatprep.subr.bf16.mxu0 %v5276_v57  ;;  %v5351_v44 = vld [vmem:[%s6099_s6 + $0x704] ss:$16 sps:$4 sm:$0xff]   ;;  %v5349_v46 = vld [vmem:[%s6099_s6 + $0x700] ss:$16 sps:$4 sm:$0xff]  }
  0x4c   : > { %3492 = vmatprep.subr.bf16.mxu1 %v5278_v58  ;;  %v5354_v47 = vld [vmem:[%s6099_s6 + $0x524] ss:$16 sps:$4 sm:$0xff]   ;;  %v5352_v50 = vld [vmem:[%s6099_s6 + $0x520] ss:$16 sps:$4 sm:$0xff]  }
  0x4d   : > { %v5357_v49 = vld [vmem:[%s6099_s6 + $0x724] ss:$16 sps:$4 sm:$0xff]   ;;  %v5355_v51 = vld [vmem:[%s6099_s6 + $0x720] ss:$16 sps:$4 sm:$0xff]  }
  0x4e   : > { %3452 = vmatpush1.bf16.msra.mxu0 %v5280_v59  ;;  %v5360_v53 = vld [vmem:[%s6099_s6 + $0x544] ss:$16 sps:$4 sm:$0xff]   ;;  %v5358_v55 = vld [vmem:[%s6099_s6 + $0x540] ss:$16 sps:$4 sm:$0xff]  }
  0x4f   : > { %3493 = vmatpush1.bf16.msra.mxu1 %v5281_v60  ;;  %3453 = vmatprep.subr.bf16.mxu0 %v5282_v61  ;;  %v5363_v54 = vld [vmem:[%s6099_s6 + $0x744] ss:$16 sps:$4 sm:$0xff]   ;;  %v5361_v56 = vld [vmem:[%s6099_s6 + $0x740] ss:$16 sps:$4 sm:$0xff]  }
  0x50   : > { %3494 = vmatprep.subr.bf16.mxu1 %v5284_v62  ;;  %v5366_v57 = vld [vmem:[%s6099_s6 + $0x564] ss:$16 sps:$4 sm:$0xff]   ;;  %v5364_v59 = vld [vmem:[%s6099_s6 + $0x560] ss:$16 sps:$4 sm:$0xff]  }
  0x51   : > { %v5369_v58 = vld [vmem:[%s6099_s6 + $0x764] ss:$16 sps:$4 sm:$0xff]   ;;  %v5367_v60 = vld [vmem:[%s6099_s6 + $0x760] ss:$16 sps:$4 sm:$0xff]  }
  0x52   : > { %3454 = vmatpush1.bf16.msra.mxu0 %v5286_v63  ;;  %v5372_v61 = vld [vmem:[%s6099_s6 + $0x584] ss:$16 sps:$4 sm:$0xff]   ;;  %v5370_v63 = vld [vmem:[%s6099_s6 + $0x580] ss:$16 sps:$4 sm:$0xff]  }
  0x53   : > { %3495 = vmatpush1.bf16.msra.mxu1 %v5287_v0  ;;  %3455 = vmatprep.subr.bf16.mxu0 %v5288_v1  ;;  %v5375_v62 = vld [vmem:[%s6099_s6 + $0x784] ss:$16 sps:$4 sm:$0xff]   ;;  %v5373_v0 = vld [vmem:[%s6099_s6 + $0x780] ss:$16 sps:$4 sm:$0xff]  }
  0x54   : > { %3496 = vmatprep.subr.bf16.mxu1 %v5290_v2  ;;  %v5378_v1 = vld [vmem:[%s6099_s6 + $0x5a4] ss:$16 sps:$4 sm:$0xff]  }
  0x55   : > { %v5381_v2 = vld [vmem:[%s6099_s6 + $0x7a4] ss:$16 sps:$4 sm:$0xff]  }
  0x56   : > { %3456 = vmatpush1.bf16.msra.mxu0 %v5292_v3  ;;  %v5376_v3 = vld [vmem:[%s6099_s6 + $0x5a0] ss:$16 sps:$4 sm:$0xff]  }
  0x57   : > { %3497 = vmatpush1.bf16.msra.mxu1 %v5293_v4  ;;  %3507 = vmatprep.subr.bf16.mxu0 %v5300_v5  ;;  %v5379_v4 = vld [vmem:[%s6099_s6 + $0x7a0] ss:$16 sps:$4 sm:$0xff]   ;;  %v5384_v5 = vld [vmem:[%s6099_s6 + $0x5c4] ss:$16 sps:$4 sm:$0xff]  }
  0x58   : > { %3548 = vmatprep.subr.bf16.mxu1 %v5303_v6  ;;  %v5387_v6 = vld [vmem:[%s6099_s6 + $0x7c4] ss:$16 sps:$4 sm:$0xff]  }
  0x59   : > { %3458 = vmatmul.mubr.bf16.vlgmr.msra.gmra.mrb[0].mxu0 %v6176_v7 }
  0x5a   : > { %3499 = vmatmul.mubr.bf16.vlgmr.msra.gmra.mrb[0].mxu1 %v6178_v8  ;;  %3508 = vmatpush1.bf16.msra.mxu0 %v5298_v9  ;;  %v5382_v9 = vld [vmem:[%s6099_s6 + $0x5c0] ss:$16 sps:$4 sm:$0xff]  }
  0x5b   : > { %3549 = vmatpush1.bf16.msra.mxu1 %v5301_v10  ;;  %3509 = vmatprep.subr.bf16.mxu0 %v5306_v11  ;;  %v5385_v10 = vld [vmem:[%s6099_s6 + $0x7c0] ss:$16 sps:$4 sm:$0xff]   ;;  %v5390_v11 = vld [vmem:[%s6099_s6 + $0x5e4] ss:$16 sps:$4 sm:$0xff]  }
  0x5c   : > { %3550 = vmatprep.subr.bf16.mxu1 %v5309_v12  ;;  %3539 = vmatprep.mubr.bf16.mxu0 %v6216_v37  ;;  %v5393_v12 = vld [vmem:[%s6099_s6 + $0x7e4] ss:$16 sps:$4 sm:$0xff]  }
  0x5d   : > { %3580 = vmatprep.mubr.bf16.mxu1 %v6220_v38 }
  0x5e   : > { %3510 = vmatpush1.bf16.msra.mxu0 %v5304_v13  ;;  %v5388_v13 = vld [vmem:[%s6099_s6 + $0x5e0] ss:$16 sps:$4 sm:$0xff]  }
  0x5f   : > { %3551 = vmatpush1.bf16.msra.mxu1 %v5307_v14  ;;  %3511 = vmatprep.subr.bf16.mxu0 %v5312_v15  ;;  %v5391_v14 = vld [vmem:[%s6099_s6 + $0x7e0] ss:$16 sps:$4 sm:$0xff]   ;;  %v5400_v15 = vld [vmem:[%s6099_s6 + $0x804] ss:$16 sps:$4 sm:$0xff]  }
  0x60   : > { %3552 = vmatprep.subr.bf16.mxu1 %v5315_v16  ;;  %v5403_v16 = vld [vmem:[%s6099_s6 + $0xa04] ss:$16 sps:$4 sm:$0xff]  }
  0x62   : > { %3512 = vmatpush1.bf16.msra.mxu0 %v5310_v17  ;;  %v6264_v17 = vcombine.low %v6207_v33, %v6207_v33  ;;  %v5418_v33 = vld [vmem:[%s6099_s6 + $0x864] ss:$16 sps:$4 sm:$0xff]  }
  0x63   : > { %3553 = vmatpush1.bf16.msra.mxu1 %v5313_v18  ;;  %3513 = vmatprep.subr.bf16.mxu0 %v5318_v19  ;;  %v6268_v18 = vcombine.low %v6210_v34, %v6210_v34  ;;  %v5398_v19 = vld [vmem:[%s6099_s6 + $0x800] ss:$16 sps:$4 sm:$0xff]   ;;  %v5421_v34 = vld [vmem:[%s6099_s6 + $0xa64] ss:$16 sps:$4 sm:$0xff]  }
  0x64   : > { %3554 = vmatprep.subr.bf16.mxu1 %v5321_v20  ;;  %v5401_v20 = vld [vmem:[%s6099_s6 + $0xa00] ss:$16 sps:$4 sm:$0xff]  }
  0x66   : > { %3514 = vmatpush1.bf16.msra.mxu0 %v5316_v21  ;;  %v5406_v21 = vld [vmem:[%s6099_s6 + $0x824] ss:$16 sps:$4 sm:$0xff]  }
  0x67   : > { %3555 = vmatpush1.bf16.msra.mxu1 %v5319_v22  ;;  %3515 = vmatprep.subr.bf16.mxu0 %v5324_v23  ;;  %v5409_v22 = vld [vmem:[%s6099_s6 + $0xa24] ss:$16 sps:$4 sm:$0xff]  }
  0x68   : > { %3556 = vmatprep.subr.bf16.mxu1 %v5327_v24  ;;  %v6275_v23 = vld [vmem:[%s6094_s27 + $0x20] sm:$0xff]  ;;  %v6278_v24 = vld [vmem:[%s6094_s27 + $0x28] sm:$0xff] }
  0x6a   : > { %3516 = vmatpush1.bf16.msra.mxu0 %v5322_v25  ;;  %v6282_v25 = vcombine.high %v6275_v23, %v6275_v23 }
  0x6b   : > { %3557 = vmatpush1.bf16.msra.mxu1 %v5325_v26  ;;  %3517 = vmatprep.subr.bf16.mxu0 %v5330_v27  ;;  %v6286_v26 = vcombine.high %v6278_v24, %v6278_v24  ;;  %v5404_v27 = vld [vmem:[%s6099_s6 + $0x820] ss:$16 sps:$4 sm:$0xff]  }
  0x6c   : > { %3558 = vmatprep.subr.bf16.mxu1 %v5333_v28  ;;  %v5407_v28 = vld [vmem:[%s6099_s6 + $0xa20] ss:$16 sps:$4 sm:$0xff]  }
  0x6e   : > { %3518 = vmatpush1.bf16.msra.mxu0 %v5328_v29  ;;  %v5412_v29 = vld [vmem:[%s6099_s6 + $0x844] ss:$16 sps:$4 sm:$0xff]  }
  0x6f   : > { %3559 = vmatpush1.bf16.msra.mxu1 %v5331_v30  ;;  %3519 = vmatprep.subr.bf16.mxu0 %v5336_v31  ;;  %v5415_v30 = vld [vmem:[%s6099_s6 + $0xa44] ss:$16 sps:$4 sm:$0xff]   ;;  %v5410_v31 = vld [vmem:[%s6099_s6 + $0x840] ss:$16 sps:$4 sm:$0xff]  }
  0x70   : > { %3560 = vmatprep.subr.bf16.mxu1 %v5339_v32  ;;  %v5413_v32 = vld [vmem:[%s6099_s6 + $0xa40] ss:$16 sps:$4 sm:$0xff]  }
  0x72   : > { %3520 = vmatpush1.bf16.msra.mxu0 %v5334_v35  ;;  %v5416_v35 = vld [vmem:[%s6099_s6 + $0x860] ss:$16 sps:$4 sm:$0xff]  }
  0x73   : > { %3561 = vmatpush1.bf16.msra.mxu1 %v5337_v36  ;;  %3521 = vmatprep.subr.bf16.mxu0 %v5342_v39  ;;  %v5419_v36 = vld [vmem:[%s6099_s6 + $0xa60] ss:$16 sps:$4 sm:$0xff]   ;;  %v5424_v39 = vld [vmem:[%s6099_s6 + $0x884] ss:$16 sps:$4 sm:$0xff]  }
  0x74   : > { %3562 = vmatprep.subr.bf16.mxu1 %v5345_v40  ;;  %v5427_v40 = vld [vmem:[%s6099_s6 + $0xa84] ss:$16 sps:$4 sm:$0xff]  }
  0x76   : > { %3522 = vmatpush1.bf16.msra.mxu0 %v5340_v41  ;;  %v5422_v41 = vld [vmem:[%s6099_s6 + $0x880] ss:$16 sps:$4 sm:$0xff]  }
  0x77   : > { %3563 = vmatpush1.bf16.msra.mxu1 %v5343_v42  ;;  %3523 = vmatprep.subr.bf16.mxu0 %v5348_v43  ;;  %v5425_v42 = vld [vmem:[%s6099_s6 + $0xa80] ss:$16 sps:$4 sm:$0xff]   ;;  %v5430_v43 = vld [vmem:[%s6099_s6 + $0x8a4] ss:$16 sps:$4 sm:$0xff]  }
  0x78   : > { %3564 = vmatprep.subr.bf16.mxu1 %v5351_v44  ;;  %v5433_v44 = vld [vmem:[%s6099_s6 + $0xaa4] ss:$16 sps:$4 sm:$0xff]  }
  0x7a   : > { %3524 = vmatpush1.bf16.msra.mxu0 %v5346_v45  ;;  %v5428_v45 = vld [vmem:[%s6099_s6 + $0x8a0] ss:$16 sps:$4 sm:$0xff]  }
  0x7b   : > { %3565 = vmatpush1.bf16.msra.mxu1 %v5349_v46  ;;  %3525 = vmatprep.subr.bf16.mxu0 %v5354_v47  ;;  %v5431_v46 = vld [vmem:[%s6099_s6 + $0xaa0] ss:$16 sps:$4 sm:$0xff]   ;;  %v5436_v47 = vld [vmem:[%s6099_s6 + $0x8c4] ss:$16 sps:$4 sm:$0xff]  }
  0x7c   : > { %3566 = vmatprep.subr.bf16.mxu1 %v5357_v49  ;;  %v5439_v49 = vld [vmem:[%s6099_s6 + $0xac4] ss:$16 sps:$4 sm:$0xff]  }
  0x7e   : > { %3526 = vmatpush1.bf16.msra.mxu0 %v5352_v50  ;;  %v5434_v50 = vld [vmem:[%s6099_s6 + $0x8c0] ss:$16 sps:$4 sm:$0xff]  }
  0x7f   : > { %3567 = vmatpush1.bf16.msra.mxu1 %v5355_v51  ;;  %3527 = vmatprep.subr.bf16.mxu0 %v5360_v53  ;;  %v5437_v51 = vld [vmem:[%s6099_s6 + $0xac0] ss:$16 sps:$4 sm:$0xff]   ;;  %v5442_v53 = vld [vmem:[%s6099_s6 + $0x8e4] ss:$16 sps:$4 sm:$0xff]  }
  0x80   : > { %3568 = vmatprep.subr.bf16.mxu1 %v5363_v54  ;;  %v5445_v54 = vld [vmem:[%s6099_s6 + $0xae4] ss:$16 sps:$4 sm:$0xff]  }
  0x82   : > { %3528 = vmatpush1.bf16.msra.mxu0 %v5358_v55  ;;  %v5440_v55 = vld [vmem:[%s6099_s6 + $0x8e0] ss:$16 sps:$4 sm:$0xff]  }
  0x83   : > { %3569 = vmatpush1.bf16.msra.mxu1 %v5361_v56  ;;  %3529 = vmatprep.subr.bf16.mxu0 %v5366_v57  ;;  %v5443_v56 = vld [vmem:[%s6099_s6 + $0xae0] ss:$16 sps:$4 sm:$0xff]   ;;  %v5448_v57 = vld [vmem:[%s6099_s6 + $0x904] ss:$16 sps:$4 sm:$0xff]  }
  0x84   : > { %3570 = vmatprep.subr.bf16.mxu1 %v5369_v58  ;;  %v5451_v58 = vld [vmem:[%s6099_s6 + $0xb04] ss:$16 sps:$4 sm:$0xff]  }
  0x86   : > { %3530 = vmatpush1.bf16.msra.mxu0 %v5364_v59  ;;  %v5446_v59 = vld [vmem:[%s6099_s6 + $0x900] ss:$16 sps:$4 sm:$0xff]  }
  0x87   : > { %3571 = vmatpush1.bf16.msra.mxu1 %v5367_v60  ;;  %3531 = vmatprep.subr.bf16.mxu0 %v5372_v61  ;;  %v5449_v60 = vld [vmem:[%s6099_s6 + $0xb00] ss:$16 sps:$4 sm:$0xff]   ;;  %v5454_v61 = vld [vmem:[%s6099_s6 + $0x924] ss:$16 sps:$4 sm:$0xff]  }
  0x88   : > { %3572 = vmatprep.subr.bf16.mxu1 %v5375_v62  ;;  %v5457_v62 = vld [vmem:[%s6099_s6 + $0xb24] ss:$16 sps:$4 sm:$0xff]  }
  0x8a   : > { %3532 = vmatpush1.bf16.msra.mxu0 %v5370_v63  ;;  %v5452_v63 = vld [vmem:[%s6099_s6 + $0x920] ss:$16 sps:$4 sm:$0xff]  }
  0x8b   : > { %3573 = vmatpush1.bf16.msra.mxu1 %v5373_v0  ;;  %3533 = vmatprep.subr.bf16.mxu0 %v5378_v1  ;;  %v5455_v0 = vld [vmem:[%s6099_s6 + $0xb20] ss:$16 sps:$4 sm:$0xff]   ;;  %v5460_v1 = vld [vmem:[%s6099_s6 + $0x944] ss:$16 sps:$4 sm:$0xff]  }
  0x8c   : > { %3574 = vmatprep.subr.bf16.mxu1 %v5381_v2  ;;  %v5463_v2 = vld [vmem:[%s6099_s6 + $0xb44] ss:$16 sps:$4 sm:$0xff]  }
  0x8e   : > { %3534 = vmatpush1.bf16.msra.mxu0 %v5376_v3  ;;  %v5458_v3 = vld [vmem:[%s6099_s6 + $0x940] ss:$16 sps:$4 sm:$0xff]  }
  0x8f   : > { %3575 = vmatpush1.bf16.msra.mxu1 %v5379_v4  ;;  %3535 = vmatprep.subr.bf16.mxu0 %v5384_v5  ;;  %v5461_v4 = vld [vmem:[%s6099_s6 + $0xb40] ss:$16 sps:$4 sm:$0xff]   ;;  %v5466_v5 = vld [vmem:[%s6099_s6 + $0x964] ss:$16 sps:$4 sm:$0xff]  }
  0x90   : > { %3576 = vmatprep.subr.bf16.mxu1 %v5387_v6  ;;  %v5469_v6 = vld [vmem:[%s6099_s6 + $0xb64] ss:$16 sps:$4 sm:$0xff]  }
  0x92   : > { %3536 = vmatpush1.bf16.msra.mxu0 %v5382_v9  ;;  %v5464_v9 = vld [vmem:[%s6099_s6 + $0x960] ss:$16 sps:$4 sm:$0xff]  }
  0x93   : > { %3577 = vmatpush1.bf16.msra.mxu1 %v5385_v10  ;;  %3537 = vmatprep.subr.bf16.mxu0 %v5390_v11  ;;  %v5467_v10 = vld [vmem:[%s6099_s6 + $0xb60] ss:$16 sps:$4 sm:$0xff]   ;;  %v5472_v11 = vld [vmem:[%s6099_s6 + $0x984] ss:$16 sps:$4 sm:$0xff]  }
  0x94   : > { %3578 = vmatprep.subr.bf16.mxu1 %v5393_v12  ;;  %v5475_v12 = vld [vmem:[%s6099_s6 + $0xb84] ss:$16 sps:$4 sm:$0xff]  }
  0x96   : > { %3538 = vmatpush1.bf16.msra.mxu0 %v5388_v13  ;;  %v5470_v13 = vld [vmem:[%s6099_s6 + $0x980] ss:$16 sps:$4 sm:$0xff]  }
  0x97   : > { %3579 = vmatpush1.bf16.msra.mxu1 %v5391_v14  ;;  %3589 = vmatprep.subr.bf16.mxu0 %v5400_v15  ;;  %v5473_v14 = vld [vmem:[%s6099_s6 + $0xb80] ss:$16 sps:$4 sm:$0xff]   ;;  %v5478_v15 = vld [vmem:[%s6099_s6 + $0x9a4] ss:$16 sps:$4 sm:$0xff]  }
  0x98   : > { %3630 = vmatprep.subr.bf16.mxu1 %v5403_v16  ;;  %v5481_v16 = vld [vmem:[%s6099_s6 + $0xba4] ss:$16 sps:$4 sm:$0xff]  }
  0x99   : > { %3540 = vmatmul.mubr.bf16.vlgmr.msra.gmra.mrb[4].mxu0 %v6264_v17 }
  0x9a   : > { %3581 = vmatmul.mubr.bf16.vlgmr.msra.gmra.mrb[4].mxu1 %v6268_v18  ;;  %3590 = vmatpush1.bf16.msra.mxu0 %v5398_v19  ;;  %v5476_v19 = vld [vmem:[%s6099_s6 + $0x9a0] ss:$16 sps:$4 sm:$0xff]  }
  0x9b   : > { %3631 = vmatpush1.bf16.msra.mxu1 %v5401_v20  ;;  %3591 = vmatprep.subr.bf16.mxu0 %v5406_v21  ;;  %v5479_v20 = vld [vmem:[%s6099_s6 + $0xba0] ss:$16 sps:$4 sm:$0xff]   ;;  %v5484_v21 = vld [vmem:[%s6099_s6 + $0x9c4] ss:$16 sps:$4 sm:$0xff]  }
  0x9c   : > { %3632 = vmatprep.subr.bf16.mxu1 %v5409_v22  ;;  %3621 = vmatprep.mubr.bf16.mxu0 %v6282_v25  ;;  %v5487_v22 = vld [vmem:[%s6099_s6 + $0xbc4] ss:$16 sps:$4 sm:$0xff]  }
  0x9d   : > { %3662 = vmatprep.mubr.bf16.mxu1 %v6286_v26 }
  0x9e   : > { %3592 = vmatpush1.bf16.msra.mxu0 %v5404_v27  ;;  %v5482_v27 = vld [vmem:[%s6099_s6 + $0x9c0] ss:$16 sps:$4 sm:$0xff]  }
  0x9f   : > { %3633 = vmatpush1.bf16.msra.mxu1 %v5407_v28  ;;  %3593 = vmatprep.subr.bf16.mxu0 %v5412_v29  ;;  %v5485_v28 = vld [vmem:[%s6099_s6 + $0xbc0] ss:$16 sps:$4 sm:$0xff]   ;;  %v5490_v29 = vld [vmem:[%s6099_s6 + $0x9e4] ss:$16 sps:$4 sm:$0xff]  }
  0xa0   : > { %3634 = vmatprep.subr.bf16.mxu1 %v5415_v30  ;;  %v5493_v30 = vld [vmem:[%s6099_s6 + $0xbe4] ss:$16 sps:$4 sm:$0xff]  }
  0xa2   : > { %3594 = vmatpush1.bf16.msra.mxu0 %v5410_v31  ;;  %v5488_v31 = vld [vmem:[%s6099_s6 + $0x9e0] ss:$16 sps:$4 sm:$0xff]  }
  0xa3   : > { %3635 = vmatpush1.bf16.msra.mxu1 %v5413_v32  ;;  %3595 = vmatprep.subr.bf16.mxu0 %v5418_v33  ;;  %v5491_v32 = vld [vmem:[%s6099_s6 + $0xbe0] ss:$16 sps:$4 sm:$0xff]   ;;  %v5500_v33 = vld [vmem:[%s6099_s6 + $0xc04] ss:$16 sps:$4 sm:$0xff]  }
  0xa4   : > { %3636 = vmatprep.subr.bf16.mxu1 %v5421_v34  ;;  %v5503_v34 = vld [vmem:[%s6099_s6 + $0xe04] ss:$16 sps:$4 sm:$0xff]  }
  0xa6   : > { %3596 = vmatpush1.bf16.msra.mxu0 %v5416_v35  ;;  %v5498_v35 = vld [vmem:[%s6099_s6 + $0xc00] ss:$16 sps:$4 sm:$0xff]  }
  0xa7   : > { %3637 = vmatpush1.bf16.msra.mxu1 %v5419_v36  ;;  %3597 = vmatprep.subr.bf16.mxu0 %v5424_v39  ;;  %v5501_v36 = vld [vmem:[%s6099_s6 + $0xe00] ss:$16 sps:$4 sm:$0xff]   ;;  %v6356_v39 = vcombine.low %v6275_v23, %v6275_v23 }
  0xa8   : > { %3638 = vmatprep.subr.bf16.mxu1 %v5427_v40  ;;  %v6360_v40 = vcombine.low %v6278_v24, %v6278_v24 }
  0xaa   : > { %3598 = vmatpush1.bf16.msra.mxu0 %v5422_v41  ;;  %v6363_v41 = vld [vmem:[%s6094_s27 + $0x30] sm:$0xff] }
  0xab   : > { %3639 = vmatpush1.bf16.msra.mxu1 %v5425_v42  ;;  %3599 = vmatprep.subr.bf16.mxu0 %v5430_v43  ;;  %v6366_v42 = vld [vmem:[%s6094_s27 + $0x38] sm:$0xff]  ;;  %v5506_v43 = vld [vmem:[%s6099_s6 + $0xc24] ss:$16 sps:$4 sm:$0xff]   ;;  %v6372_v23 = vcombine.high %v6363_v41, %v6363_v41 }
  0xac   : > { %3640 = vmatprep.subr.bf16.mxu1 %v5433_v44  ;;  %v5509_v44 = vld [vmem:[%s6099_s6 + $0xe24] ss:$16 sps:$4 sm:$0xff]   ;;  %v6376_v24 = vcombine.high %v6366_v42, %v6366_v42 }
  0xae   : > { %3600 = vmatpush1.bf16.msra.mxu0 %v5428_v45  ;;  %v5504_v45 = vld [vmem:[%s6099_s6 + $0xc20] ss:$16 sps:$4 sm:$0xff]  }
  0xaf   : > { %3641 = vmatpush1.bf16.msra.mxu1 %v5431_v46  ;;  %3601 = vmatprep.subr.bf16.mxu0 %v5436_v47  ;;  %v5507_v46 = vld [vmem:[%s6099_s6 + $0xe20] ss:$16 sps:$4 sm:$0xff]   ;;  %v5512_v47 = vld [vmem:[%s6099_s6 + $0xc44] ss:$16 sps:$4 sm:$0xff]  }
  0xb0   : > { %3642 = vmatprep.subr.bf16.mxu1 %v5439_v49  ;;  %v5515_v49 = vld [vmem:[%s6099_s6 + $0xe44] ss:$16 sps:$4 sm:$0xff]  }
  0xb2   : > { %3602 = vmatpush1.bf16.msra.mxu0 %v5434_v50  ;;  %v5510_v50 = vld [vmem:[%s6099_s6 + $0xc40] ss:$16 sps:$4 sm:$0xff]  }
  0xb3   : > { %3643 = vmatpush1.bf16.msra.mxu1 %v5437_v51  ;;  %3603 = vmatprep.subr.bf16.mxu0 %v5442_v53  ;;  %v5513_v51 = vld [vmem:[%s6099_s6 + $0xe40] ss:$16 sps:$4 sm:$0xff]   ;;  %v5518_v53 = vld [vmem:[%s6099_s6 + $0xc64] ss:$16 sps:$4 sm:$0xff]  }
  0xb4   : > { %3644 = vmatprep.subr.bf16.mxu1 %v5445_v54  ;;  %v5521_v54 = vld [vmem:[%s6099_s6 + $0xe64] ss:$16 sps:$4 sm:$0xff]  }
  0xb6   : > { %3604 = vmatpush1.bf16.msra.mxu0 %v5440_v55  ;;  %v5516_v55 = vld [vmem:[%s6099_s6 + $0xc60] ss:$16 sps:$4 sm:$0xff]  }
  0xb7   : > { %3645 = vmatpush1.bf16.msra.mxu1 %v5443_v56  ;;  %3605 = vmatprep.subr.bf16.mxu0 %v5448_v57  ;;  %v5519_v56 = vld [vmem:[%s6099_s6 + $0xe60] ss:$16 sps:$4 sm:$0xff]   ;;  %v5524_v57 = vld [vmem:[%s6099_s6 + $0xc84] ss:$16 sps:$4 sm:$0xff]  }
  0xb8   : > { %3646 = vmatprep.subr.bf16.mxu1 %v5451_v58  ;;  %v5527_v58 = vld [vmem:[%s6099_s6 + $0xe84] ss:$16 sps:$4 sm:$0xff]  }
  0xba   : > { %3606 = vmatpush1.bf16.msra.mxu0 %v5446_v59  ;;  %v5522_v59 = vld [vmem:[%s6099_s6 + $0xc80] ss:$16 sps:$4 sm:$0xff]  }
  0xbb   : > { %3647 = vmatpush1.bf16.msra.mxu1 %v5449_v60  ;;  %3607 = vmatprep.subr.bf16.mxu0 %v5454_v61  ;;  %v5525_v60 = vld [vmem:[%s6099_s6 + $0xe80] ss:$16 sps:$4 sm:$0xff]   ;;  %v5530_v61 = vld [vmem:[%s6099_s6 + $0xca4] ss:$16 sps:$4 sm:$0xff]  }
  0xbc   : > { %3648 = vmatprep.subr.bf16.mxu1 %v5457_v62  ;;  %v5533_v62 = vld [vmem:[%s6099_s6 + $0xea4] ss:$16 sps:$4 sm:$0xff]  }
  0xbe   : > { %3608 = vmatpush1.bf16.msra.mxu0 %v5452_v63  ;;  %v5528_v63 = vld [vmem:[%s6099_s6 + $0xca0] ss:$16 sps:$4 sm:$0xff]  }
  0xbf   : > { %3649 = vmatpush1.bf16.msra.mxu1 %v5455_v0  ;;  %3609 = vmatprep.subr.bf16.mxu0 %v5460_v1  ;;  %v5531_v0 = vld [vmem:[%s6099_s6 + $0xea0] ss:$16 sps:$4 sm:$0xff]   ;;  %v5536_v1 = vld [vmem:[%s6099_s6 + $0xcc4] ss:$16 sps:$4 sm:$0xff]  }
  0xc0   : > { %3650 = vmatprep.subr.bf16.mxu1 %v5463_v2  ;;  %v5539_v2 = vld [vmem:[%s6099_s6 + $0xec4] ss:$16 sps:$4 sm:$0xff]  }
  0xc2   : > { %3610 = vmatpush1.bf16.msra.mxu0 %v5458_v3  ;;  %v5534_v3 = vld [vmem:[%s6099_s6 + $0xcc0] ss:$16 sps:$4 sm:$0xff]  }
  0xc3   : > { %3651 = vmatpush1.bf16.msra.mxu1 %v5461_v4  ;;  %3611 = vmatprep.subr.bf16.mxu0 %v5466_v5  ;;  %v5537_v4 = vld [vmem:[%s6099_s6 + $0xec0] ss:$16 sps:$4 sm:$0xff]   ;;  %v5542_v5 = vld [vmem:[%s6099_s6 + $0xce4] ss:$16 sps:$4 sm:$0xff]  }
  0xc4   : > { %3652 = vmatprep.subr.bf16.mxu1 %v5469_v6  ;;  %v5545_v6 = vld [vmem:[%s6099_s6 + $0xee4] ss:$16 sps:$4 sm:$0xff]  }
  0xc6   : > { %3612 = vmatpush1.bf16.msra.mxu0 %v5464_v9  ;;  %v5540_v9 = vld [vmem:[%s6099_s6 + $0xce0] ss:$16 sps:$4 sm:$0xff]  }
  0xc7   : > { %3653 = vmatpush1.bf16.msra.mxu1 %v5467_v10  ;;  %3613 = vmatprep.subr.bf16.mxu0 %v5472_v11  ;;  %v5543_v10 = vld [vmem:[%s6099_s6 + $0xee0] ss:$16 sps:$4 sm:$0xff]   ;;  %v5548_v11 = vld [vmem:[%s6099_s6 + $0xd04] ss:$16 sps:$4 sm:$0xff]  }
  0xc8   : > { %3654 = vmatprep.subr.bf16.mxu1 %v5475_v12  ;;  %v5551_v12 = vld [vmem:[%s6099_s6 + $0xf04] ss:$16 sps:$4 sm:$0xff]  }
  0xca   : > { %3614 = vmatpush1.bf16.msra.mxu0 %v5470_v13  ;;  %v5546_v13 = vld [vmem:[%s6099_s6 + $0xd00] ss:$16 sps:$4 sm:$0xff]  }
  0xcb   : > { %3655 = vmatpush1.bf16.msra.mxu1 %v5473_v14  ;;  %3615 = vmatprep.subr.bf16.mxu0 %v5478_v15  ;;  %v5549_v14 = vld [vmem:[%s6099_s6 + $0xf00] ss:$16 sps:$4 sm:$0xff]   ;;  %v5554_v15 = vld [vmem:[%s6099_s6 + $0xd24] ss:$16 sps:$4 sm:$0xff]  }
  0xcc   : > { %3656 = vmatprep.subr.bf16.mxu1 %v5481_v16  ;;  %v5557_v16 = vld [vmem:[%s6099_s6 + $0xf24] ss:$16 sps:$4 sm:$0xff]  }
  0xce   : > { %3616 = vmatpush1.bf16.msra.mxu0 %v5476_v19  ;;  %v5552_v19 = vld [vmem:[%s6099_s6 + $0xd20] ss:$16 sps:$4 sm:$0xff]  }
  0xcf   : > { %3657 = vmatpush1.bf16.msra.mxu1 %v5479_v20  ;;  %3617 = vmatprep.subr.bf16.mxu0 %v5484_v21  ;;  %v5555_v20 = vld [vmem:[%s6099_s6 + $0xf20] ss:$16 sps:$4 sm:$0xff]   ;;  %v5560_v21 = vld [vmem:[%s6099_s6 + $0xd44] ss:$16 sps:$4 sm:$0xff]  }
  0xd0   : > { %3658 = vmatprep.subr.bf16.mxu1 %v5487_v22  ;;  %v5563_v22 = vld [vmem:[%s6099_s6 + $0xf44] ss:$16 sps:$4 sm:$0xff]  }
  0xd2   : > { %3618 = vmatpush1.bf16.msra.mxu0 %v5482_v27  ;;  %v5558_v27 = vld [vmem:[%s6099_s6 + $0xd40] ss:$16 sps:$4 sm:$0xff]  }
  0xd3   : > { %3659 = vmatpush1.bf16.msra.mxu1 %v5485_v28  ;;  %3619 = vmatprep.subr.bf16.mxu0 %v5490_v29  ;;  %v5561_v28 = vld [vmem:[%s6099_s6 + $0xf40] ss:$16 sps:$4 sm:$0xff]   ;;  %v5566_v29 = vld [vmem:[%s6099_s6 + $0xd64] ss:$16 sps:$4 sm:$0xff]  }
  0xd4   : > { %3660 = vmatprep.subr.bf16.mxu1 %v5493_v30  ;;  %v5569_v30 = vld [vmem:[%s6099_s6 + $0xf64] ss:$16 sps:$4 sm:$0xff]  }
  0xd6   : > { %3620 = vmatpush1.bf16.msra.mxu0 %v5488_v31  ;;  %v5564_v31 = vld [vmem:[%s6099_s6 + $0xd60] ss:$16 sps:$4 sm:$0xff]  }
  0xd7   : > { %3661 = vmatpush1.bf16.msra.mxu1 %v5491_v32  ;;  %3671 = vmatprep.subr.bf16.mxu0 %v5500_v33  ;;  %v5567_v32 = vld [vmem:[%s6099_s6 + $0xf60] ss:$16 sps:$4 sm:$0xff]   ;;  %v5572_v33 = vld [vmem:[%s6099_s6 + $0xd84] ss:$16 sps:$4 sm:$0xff]  }
  0xd8   : > { %3712 = vmatprep.subr.bf16.mxu1 %v5503_v34  ;;  %v5575_v34 = vld [vmem:[%s6099_s6 + $0xf84] ss:$16 sps:$4 sm:$0xff]  }
  0xd9   : > { %3622 = vmatmul.mubr.bf16.vlgmr.msra.gmra.mrb[8].mxu0 %v6356_v39 }
  0xda   : > { %3663 = vmatmul.mubr.bf16.vlgmr.msra.gmra.mrb[8].mxu1 %v6360_v40  ;;  %3672 = vmatpush1.bf16.msra.mxu0 %v5498_v35  ;;  %v5570_v35 = vld [vmem:[%s6099_s6 + $0xd80] ss:$16 sps:$4 sm:$0xff]  }
  0xdb   : > { %3713 = vmatpush1.bf16.msra.mxu1 %v5501_v36  ;;  %3673 = vmatprep.subr.bf16.mxu0 %v5506_v43  ;;  %v5573_v36 = vld [vmem:[%s6099_s6 + $0xf80] ss:$16 sps:$4 sm:$0xff]   ;;  %v5578_v43 = vld [vmem:[%s6099_s6 + $0xda4] ss:$16 sps:$4 sm:$0xff]  }
  0xdc   : > { %3714 = vmatprep.subr.bf16.mxu1 %v5509_v44  ;;  %3703 = vmatprep.mubr.bf16.mxu0 %v6372_v23  ;;  %v5581_v44 = vld [vmem:[%s6099_s6 + $0xfa4] ss:$16 sps:$4 sm:$0xff]  }
  0xdd   : > { %3744 = vmatprep.mubr.bf16.mxu1 %v6376_v24 }
  0xde   : > { %3674 = vmatpush1.bf16.msra.mxu0 %v5504_v45  ;;  %v5576_v45 = vld [vmem:[%s6099_s6 + $0xda0] ss:$16 sps:$4 sm:$0xff]  }
  0xdf   : > { %3715 = vmatpush1.bf16.msra.mxu1 %v5507_v46  ;;  %3675 = vmatprep.subr.bf16.mxu0 %v5512_v47  ;;  %v5579_v46 = vld [vmem:[%s6099_s6 + $0xfa0] ss:$16 sps:$4 sm:$0xff]   ;;  %v5584_v47 = vld [vmem:[%s6099_s6 + $0xdc4] ss:$16 sps:$4 sm:$0xff]  }
  0xe0   : > { %3716 = vmatprep.subr.bf16.mxu1 %v5515_v49  ;;  %v5587_v49 = vld [vmem:[%s6099_s6 + $0xfc4] ss:$16 sps:$4 sm:$0xff]  }
  0xe2   : > { %3676 = vmatpush1.bf16.msra.mxu0 %v5510_v50  ;;  %v5582_v50 = vld [vmem:[%s6099_s6 + $0xdc0] ss:$16 sps:$4 sm:$0xff]  }
  0xe3   : > { %3717 = vmatpush1.bf16.msra.mxu1 %v5513_v51  ;;  %3677 = vmatprep.subr.bf16.mxu0 %v5518_v53  ;;  %v5585_v51 = vld [vmem:[%s6099_s6 + $0xfc0] ss:$16 sps:$4 sm:$0xff]   ;;  %v5590_v53 = vld [vmem:[%s6099_s6 + $0xde4] ss:$16 sps:$4 sm:$0xff]  }
  0xe4   : > { %3718 = vmatprep.subr.bf16.mxu1 %v5521_v54  ;;  %v5593_v54 = vld [vmem:[%s6099_s6 + $0xfe4] ss:$16 sps:$4 sm:$0xff]  }
  0xe6   : > { %3678 = vmatpush1.bf16.msra.mxu0 %v5516_v55  ;;  %v5588_v55 = vld [vmem:[%s6099_s6 + $0xde0] ss:$16 sps:$4 sm:$0xff]  }
  0xe7   : > { %3719 = vmatpush1.bf16.msra.mxu1 %v5519_v56  ;;  %3679 = vmatprep.subr.bf16.mxu0 %v5524_v57  ;;  %v5591_v56 = vld [vmem:[%s6099_s6 + $0xfe0] ss:$16 sps:$4 sm:$0xff]   ;;  %v5600_v57 = vld [vmem:[%s6099_s6 + $0xc] ss:$16 sps:$4 sm:$0xff]  }
  0xe8   : > { %3720 = vmatprep.subr.bf16.mxu1 %v5527_v58  ;;  %v5603_v58 = vld [vmem:[%s6099_s6 + $0x20c] ss:$16 sps:$4 sm:$0xff]  }
  0xea   : > { %3680 = vmatpush1.bf16.msra.mxu0 %v5522_v59  ;;  %v6444_v59 = vcombine.low %v6363_v41, %v6363_v41  ;;  %v5604_v41 = vld [vmem:[%s6099_s6 + $0x28] ss:$16 sps:$4 sm:$0xff]  }
  0xeb   : > { %3721 = vmatpush1.bf16.msra.mxu1 %v5525_v60  ;;  %3681 = vmatprep.subr.bf16.mxu0 %v5530_v61  ;;  %v6448_v60 = vcombine.low %v6366_v42, %v6366_v42  ;;  %v5598_v61 = vld [vmem:[%s6099_s6 + $0x8] ss:$16 sps:$4 sm:$0xff]   ;;  %v5612_v42 = vld [vmem:[%s6099_s6 + $0x4c] ss:$16 sps:$4 sm:$0xff]  }
  0xec   : > { %3722 = vmatprep.subr.bf16.mxu1 %v5533_v62  ;;  %v5601_v62 = vld [vmem:[%s6099_s6 + $0x208] ss:$16 sps:$4 sm:$0xff]  }
  0xee   : > { %3682 = vmatpush1.bf16.msra.mxu0 %v5528_v63  ;;  %v5606_v63 = vld [vmem:[%s6099_s6 + $0x2c] ss:$16 sps:$4 sm:$0xff]  }
  0xef   : > { %3723 = vmatpush1.bf16.msra.mxu1 %v5531_v0  ;;  %3683 = vmatprep.subr.bf16.mxu0 %v5536_v1  ;;  %v5609_v0 = vld [vmem:[%s6099_s6 + $0x22c] ss:$16 sps:$4 sm:$0xff]   ;;  %v5607_v1 = vld [vmem:[%s6099_s6 + $0x228] ss:$16 sps:$4 sm:$0xff]  }
  0xf0   : > { %3724 = vmatprep.subr.bf16.mxu1 %v5539_v2  ;;  %v5615_v2 = vld [vmem:[%s6099_s6 + $0x24c] ss:$16 sps:$4 sm:$0xff]  }
  0xf2   : > { %3684 = vmatpush1.bf16.msra.mxu0 %v5534_v3  ;;  %v5610_v3 = vld [vmem:[%s6099_s6 + $0x48] ss:$16 sps:$4 sm:$0xff]  }
  0xf3   : > { %3725 = vmatpush1.bf16.msra.mxu1 %v5537_v4  ;;  %3685 = vmatprep.subr.bf16.mxu0 %v5542_v5  ;;  %v5613_v4 = vld [vmem:[%s6099_s6 + $0x248] ss:$16 sps:$4 sm:$0xff]   ;;  %v5618_v5 = vld [vmem:[%s6099_s6 + $0x6c] ss:$16 sps:$4 sm:$0xff]  }
  0xf4   : > { %3726 = vmatprep.subr.bf16.mxu1 %v5545_v6  ;;  %v5621_v6 = vld [vmem:[%s6099_s6 + $0x26c] ss:$16 sps:$4 sm:$0xff]  }
  0xf6   : > { %3686 = vmatpush1.bf16.msra.mxu0 %v5540_v9  ;;  %v5619_v9 = vld [vmem:[%s6099_s6 + $0x268] ss:$16 sps:$4 sm:$0xff]  }
  0xf7   : > { %3727 = vmatpush1.bf16.msra.mxu1 %v5543_v10  ;;  %3687 = vmatprep.subr.bf16.mxu0 %v5548_v11  ;;  %v5627_v10 = vld [vmem:[%s6099_s6 + $0x28c] ss:$16 sps:$4 sm:$0xff]   ;;  %v5622_v11 = vld [vmem:[%s6099_s6 + $0x88] ss:$16 sps:$4 sm:$0xff]  }
  0xf8   : > { %3728 = vmatprep.subr.bf16.mxu1 %v5551_v12  ;;  %v5625_v12 = vld [vmem:[%s6099_s6 + $0x288] ss:$16 sps:$4 sm:$0xff]  }
  0xfa   : > { %3688 = vmatpush1.bf16.msra.mxu0 %v5546_v13  ;;  %v5630_v13 = vld [vmem:[%s6099_s6 + $0xac] ss:$16 sps:$4 sm:$0xff]  }
  0xfb   : > { %3729 = vmatpush1.bf16.msra.mxu1 %v5549_v14  ;;  %3689 = vmatprep.subr.bf16.mxu0 %v5554_v15  ;;  %v5633_v14 = vld [vmem:[%s6099_s6 + $0x2ac] ss:$16 sps:$4 sm:$0xff]   ;;  %v5628_v15 = vld [vmem:[%s6099_s6 + $0xa8] ss:$16 sps:$4 sm:$0xff]  }
  0xfc   : > { %3730 = vmatprep.subr.bf16.mxu1 %v5557_v16  ;;  %v5631_v16 = vld [vmem:[%s6099_s6 + $0x2a8] ss:$16 sps:$4 sm:$0xff]  }
  0xfe   : > { %3690 = vmatpush1.bf16.msra.mxu0 %v5552_v19  ;;  %v5636_v19 = vld [vmem:[%s6099_s6 + $0xcc] ss:$16 sps:$4 sm:$0xff]  }
  0xff   : > { %3731 = vmatpush1.bf16.msra.mxu1 %v5555_v20  ;;  %3691 = vmatprep.subr.bf16.mxu0 %v5560_v21  ;;  %v5639_v20 = vld [vmem:[%s6099_s6 + $0x2cc] ss:$16 sps:$4 sm:$0xff]  }
 0x100   : > { %3732 = vmatprep.subr.bf16.mxu1 %v5563_v22 }
 0x102   : > { %3692 = vmatpush1.bf16.msra.mxu0 %v5558_v27  ;;  %v5634_v27 = vld [vmem:[%s6099_s6 + $0xc8] ss:$16 sps:$4 sm:$0xff]  }
 0x103   : > { %3733 = vmatpush1.bf16.msra.mxu1 %v5561_v28  ;;  %3693 = vmatprep.subr.bf16.mxu0 %v5566_v29  ;;  %v5637_v28 = vld [vmem:[%s6099_s6 + $0x2c8] ss:$16 sps:$4 sm:$0xff]  }
 0x104   : > { %3734 = vmatprep.subr.bf16.mxu1 %v5569_v30 }
 0x106   : > { %3694 = vmatpush1.bf16.msra.mxu0 %v5564_v31 }
 0x107   : > { %3735 = vmatpush1.bf16.msra.mxu1 %v5567_v32  ;;  %3695 = vmatprep.subr.bf16.mxu0 %v5572_v33 }
 0x108   : > { %3736 = vmatprep.subr.bf16.mxu1 %v5575_v34 }
 0x10a   : > { %3696 = vmatpush1.bf16.msra.mxu0 %v5570_v35 }
 0x10b   : > { %3737 = vmatpush1.bf16.msra.mxu1 %v5573_v36  ;;  %3697 = vmatprep.subr.bf16.mxu0 %v5578_v43  ;;  %v5642_v43 = vld [vmem:[%s6099_s6 + $0xec] ss:$16 sps:$4 sm:$0xff]  }
 0x10c   : > { %3738 = vmatprep.subr.bf16.mxu1 %v5581_v44  ;;  %v5645_v44 = vld [vmem:[%s6099_s6 + $0x2ec] ss:$16 sps:$4 sm:$0xff]  }
 0x10e   : > { %3698 = vmatpush1.bf16.msra.mxu0 %v5576_v45  ;;  %v5640_v45 = vld [vmem:[%s6099_s6 + $0xe8] ss:$16 sps:$4 sm:$0xff]  }
 0x10f   : > { %3739 = vmatpush1.bf16.msra.mxu1 %v5579_v46  ;;  %3699 = vmatprep.subr.bf16.mxu0 %v5584_v47  ;;  %v5643_v46 = vld [vmem:[%s6099_s6 + $0x2e8] ss:$16 sps:$4 sm:$0xff]   ;;  %v5648_v47 = vld [vmem:[%s6099_s6 + $0x10c] ss:$16 sps:$4 sm:$0xff]  }
 0x110   : > { %3740 = vmatprep.subr.bf16.mxu1 %v5587_v49  ;;  %v5651_v49 = vld [vmem:[%s6099_s6 + $0x30c] ss:$16 sps:$4 sm:$0xff]  }
 0x112   : > { %3700 = vmatpush1.bf16.msra.mxu0 %v5582_v50  ;;  %v5646_v50 = vld [vmem:[%s6099_s6 + $0x108] ss:$16 sps:$4 sm:$0xff]  }
 0x113   : > { %3741 = vmatpush1.bf16.msra.mxu1 %v5585_v51  ;;  %3701 = vmatprep.subr.bf16.mxu0 %v5590_v53  ;;  %v5649_v51 = vld [vmem:[%s6099_s6 + $0x308] ss:$16 sps:$4 sm:$0xff]   ;;  %v5654_v53 = vld [vmem:[%s6099_s6 + $0x12c] ss:$16 sps:$4 sm:$0xff]  }
 0x114   : > { %3742 = vmatprep.subr.bf16.mxu1 %v5593_v54  ;;  %v5657_v54 = vld [vmem:[%s6099_s6 + $0x32c] ss:$16 sps:$4 sm:$0xff]  }
 0x116   : > { %3702 = vmatpush1.bf16.msra.mxu0 %v5588_v55  ;;  %v5652_v55 = vld [vmem:[%s6099_s6 + $0x128] ss:$16 sps:$4 sm:$0xff]  }
 0x117   : > { %3743 = vmatpush1.bf16.msra.mxu1 %v5591_v56  ;;  %3753 = vmatprep.subr.bf16.mxu0 %v5600_v57  ;;  %v5655_v56 = vld [vmem:[%s6099_s6 + $0x328] ss:$16 sps:$4 sm:$0xff]   ;;  %v5660_v57 = vld [vmem:[%s6099_s6 + $0x14c] ss:$16 sps:$4 sm:$0xff]  }
 0x118   : > { %3794 = vmatprep.subr.bf16.mxu1 %v5603_v58  ;;  %v5663_v58 = vld [vmem:[%s6099_s6 + $0x34c] ss:$16 sps:$4 sm:$0xff]  }
 0x119   : > { %3704 = vmatmul.mubr.bf16.vlgmr.msra.gmra.mrb[12].mxu0 %v6444_v59 }
 0x11a   : > { %3745 = vmatmul.mubr.bf16.vlgmr.msra.gmra.mrb[12].mxu1 %v6448_v60  ;;  %3754 = vmatpush1.bf16.msra.mxu0 %v5598_v61  ;;  %v5658_v61 = vld [vmem:[%s6099_s6 + $0x148] ss:$16 sps:$4 sm:$0xff]  }
 0x11b   : > { %3795 = vmatpush1.bf16.msra.mxu1 %v5601_v62  ;;  %3755 = vmatprep.subr.bf16.mxu0 %v5606_v63  ;;  %v5661_v62 = vld [vmem:[%s6099_s6 + $0x348] ss:$16 sps:$4 sm:$0xff]   ;;  %v5666_v63 = vld [vmem:[%s6099_s6 + $0x16c] ss:$16 sps:$4 sm:$0xff]  }
 0x11c   : > { %3796 = vmatprep.subr.bf16.mxu1 %v5609_v0  ;;  %3785 = vmatprep.mubr.bf16.mxu0 %v6149_v48  ;;  %v5616_v48 = vld [vmem:[%s6099_s6 + $0x68] ss:$16 sps:$4 sm:$0xff]   ;;  %v5669_v0 = vld [vmem:[%s6099_s6 + $0x36c] ss:$16 sps:$4 sm:$0xff]  }
 0x11d   : > { %3826 = vmatprep.mubr.bf16.mxu1 %v6154_v52  ;;  %v5624_v52 = vld [vmem:[%s6099_s6 + $0x8c] ss:$16 sps:$4 sm:$0xff]  }
 0x11e   : > { %3756 = vmatpush1.bf16.msra.mxu0 %v5604_v41  ;;  %v5664_v41 = vld [vmem:[%s6099_s6 + $0x168] ss:$16 sps:$4 sm:$0xff]  }
 0x11f   : > { %3797 = vmatpush1.bf16.msra.mxu1 %v5607_v1  ;;  %3757 = vmatprep.subr.bf16.mxu0 %v5612_v42  ;;  %v5667_v1 = vld [vmem:[%s6099_s6 + $0x368] ss:$16 sps:$4 sm:$0xff]   ;;  %v5672_v42 = vld [vmem:[%s6099_s6 + $0x18c] ss:$16 sps:$4 sm:$0xff]  }
 0x120   : > { %3798 = vmatprep.subr.bf16.mxu1 %v5615_v2  ;;  %v5675_v2 = vld [vmem:[%s6099_s6 + $0x38c] ss:$16 sps:$4 sm:$0xff]  }
 0x122   : > { %3758 = vmatpush1.bf16.msra.mxu0 %v5610_v3  ;;  %v5670_v3 = vld [vmem:[%s6099_s6 + $0x188] ss:$16 sps:$4 sm:$0xff]  }
 0x123   : > { %3799 = vmatpush1.bf16.msra.mxu1 %v5613_v4  ;;  %3759 = vmatprep.subr.bf16.mxu0 %v5618_v5  ;;  %v5673_v4 = vld [vmem:[%s6099_s6 + $0x388] ss:$16 sps:$4 sm:$0xff]   ;;  %v5678_v5 = vld [vmem:[%s6099_s6 + $0x1ac] ss:$16 sps:$4 sm:$0xff]  }
 0x124   : > { %3800 = vmatprep.subr.bf16.mxu1 %v5621_v6  ;;  %v5681_v6 = vld [vmem:[%s6099_s6 + $0x3ac] ss:$16 sps:$4 sm:$0xff]  }
 0x126   : > { %3760 = vmatpush1.bf16.msra.mxu0 %v5616_v48  ;;  %v5676_v48 = vld [vmem:[%s6099_s6 + $0x1a8] ss:$16 sps:$4 sm:$0xff]  }
 0x127   : > { %3801 = vmatpush1.bf16.msra.mxu1 %v5619_v9  ;;  %3761 = vmatprep.subr.bf16.mxu0 %v5624_v52  ;;  %v5679_v9 = vld [vmem:[%s6099_s6 + $0x3a8] ss:$16 sps:$4 sm:$0xff]   ;;  %v5684_v52 = vld [vmem:[%s6099_s6 + $0x1cc] ss:$16 sps:$4 sm:$0xff]  }
 0x128   : > { %3802 = vmatprep.subr.bf16.mxu1 %v5627_v10  ;;  %v5687_v10 = vld [vmem:[%s6099_s6 + $0x3cc] ss:$16 sps:$4 sm:$0xff]  }
 0x12a   : > { %3762 = vmatpush1.bf16.msra.mxu0 %v5622_v11  ;;  %v5682_v11 = vld [vmem:[%s6099_s6 + $0x1c8] ss:$16 sps:$4 sm:$0xff]  }
 0x12b   : > { %3803 = vmatpush1.bf16.msra.mxu1 %v5625_v12  ;;  %3763 = vmatprep.subr.bf16.mxu0 %v5630_v13  ;;  %v5685_v12 = vld [vmem:[%s6099_s6 + $0x3c8] ss:$16 sps:$4 sm:$0xff]   ;;  %v5690_v13 = vld [vmem:[%s6099_s6 + $0x1ec] ss:$16 sps:$4 sm:$0xff]  }
 0x12c   : > { %3804 = vmatprep.subr.bf16.mxu1 %v5633_v14  ;;  %v3459_v21 = vpop.f32.mrb[0].mxu0  ;;  %v5693_v14 = vld [vmem:[%s6099_s6 + $0x3ec] ss:$16 sps:$4 sm:$0xff]  }
 0x12d   : > { %v3500_v22 = vpop.f32.mrb[0].mxu1  ;;  %v3461_v30 = vpop.f32.mrb[1].mxu0 }
 0x12e   : > { %v6480_v29 = vadd.f32 %v3500_v22, %v3459_v21  ;;  %v3502_v31 = vpop.f32.mrb[1].mxu1  ;;  %v3463_v33 = vpop.f32.mrb[2].mxu0  ;;  %3764 = vmatpush1.bf16.msra.mxu0 %v5628_v15  ;;  %v5688_v15 = vld [vmem:[%s6099_s6 + $0x1e8] ss:$16 sps:$4 sm:$0xff]  }
 0x12f   : > { %v6482_v32 = vadd.f32 %v3502_v31, %v3461_v30  ;;  %v3504_v34 = vpop.f32.mrb[2].mxu1  ;;  %3805 = vmatpush1.bf16.msra.mxu1 %v5631_v16  ;;  %v3464_v35 = vpop.f32.mrb[3].mxu0  ;;  %3765 = vmatprep.subr.bf16.mxu0 %v5636_v19  ;;  %v5691_v16 = vld [vmem:[%s6099_s6 + $0x3e8] ss:$16 sps:$4 sm:$0xff]   ;;  %v5696_v19 = vld [vmem:[%s6099_s6 + $0x40c] ss:$16 sps:$4 sm:$0xff]  }
 0x130   : > { %v3505_v36 = vpop.f32.mrb[3].mxu1  ;;  %3806 = vmatprep.subr.bf16.mxu1 %v5639_v20  ;;  %v5699_v20 = vld [vmem:[%s6099_s6 + $0x60c] ss:$16 sps:$4 sm:$0xff]   ;;  %v5694_v21 = vld [vmem:[%s6099_s6 + $0x408] ss:$16 sps:$4 sm:$0xff]  }
 0x131   : > { %v5697_v22 = vld [vmem:[%s6099_s6 + $0x608] ss:$16 sps:$4 sm:$0xff]   ;;  %v5708_v33 = vld [vmem:[%s6099_s6 + $0x44c] ss:$16 sps:$4 sm:$0xff]  }
 0x132   : > { %3766 = vmatpush1.bf16.msra.mxu0 %v5634_v27  ;;  %v5702_v27 = vld [vmem:[%s6099_s6 + $0x42c] ss:$16 sps:$4 sm:$0xff]   ;;  %v5700_v30 = vld [vmem:[%s6099_s6 + $0x428] ss:$16 sps:$4 sm:$0xff]  }
 0x133   : > { %3807 = vmatpush1.bf16.msra.mxu1 %v5637_v28  ;;  %3767 = vmatprep.subr.bf16.mxu0 %v5642_v43  ;;  %v5705_v28 = vld [vmem:[%s6099_s6 + $0x62c] ss:$16 sps:$4 sm:$0xff]   ;;  %v5703_v31 = vld [vmem:[%s6099_s6 + $0x628] ss:$16 sps:$4 sm:$0xff]  }
 0x134   : > { %3808 = vmatprep.subr.bf16.mxu1 %v5645_v44  ;;  %v5711_v34 = vld [vmem:[%s6099_s6 + $0x64c] ss:$16 sps:$4 sm:$0xff]   ;;  %v5712_v43 = vld [vmem:[%s6099_s6 + $0x468] ss:$16 sps:$4 sm:$0xff]  }
 0x135   : > { %v5714_v35 = vld [vmem:[%s6099_s6 + $0x46c] ss:$16 sps:$4 sm:$0xff]  }
 0x136   : > { %3768 = vmatpush1.bf16.msra.mxu0 %v5640_v45  ;;  %v5717_v36 = vld [vmem:[%s6099_s6 + $0x66c] ss:$16 sps:$4 sm:$0xff]   ;;  %v5718_v45 = vld [vmem:[%s6099_s6 + $0x488] ss:$16 sps:$4 sm:$0xff]  }
 0x137   : > { %3809 = vmatpush1.bf16.msra.mxu1 %v5643_v46  ;;  %3769 = vmatprep.subr.bf16.mxu0 %v5648_v47  ;;  %v5723_v44 = vld [vmem:[%s6099_s6 + $0x68c] ss:$16 sps:$4 sm:$0xff]   ;;  %v5721_v46 = vld [vmem:[%s6099_s6 + $0x688] ss:$16 sps:$4 sm:$0xff]  }
 0x138   : > { %3810 = vmatprep.subr.bf16.mxu1 %v5651_v49  ;;  %v5726_v47 = vld [vmem:[%s6099_s6 + $0x4ac] ss:$16 sps:$4 sm:$0xff]  }
 0x139   : > { %v5729_v49 = vld [vmem:[%s6099_s6 + $0x6ac] ss:$16 sps:$4 sm:$0xff]  }
 0x13a   : > { %3770 = vmatpush1.bf16.msra.mxu0 %v5646_v50  ;;  %v5724_v50 = vld [vmem:[%s6099_s6 + $0x4a8] ss:$16 sps:$4 sm:$0xff]  }
 0x13b   : > { %3811 = vmatpush1.bf16.msra.mxu1 %v5649_v51  ;;  %3771 = vmatprep.subr.bf16.mxu0 %v5654_v53  ;;  %v5727_v51 = vld [vmem:[%s6099_s6 + $0x6a8] ss:$16 sps:$4 sm:$0xff]   ;;  %v5732_v53 = vld [vmem:[%s6099_s6 + $0x4cc] ss:$16 sps:$4 sm:$0xff]  }
 0x13c   : > { %3812 = vmatprep.subr.bf16.mxu1 %v5657_v54  ;;  %v5735_v54 = vld [vmem:[%s6099_s6 + $0x6cc] ss:$16 sps:$4 sm:$0xff]  }
 0x13e   : > { %3772 = vmatpush1.bf16.msra.mxu0 %v5652_v55 }
 0x13f   : > { %3813 = vmatpush1.bf16.msra.mxu1 %v5655_v56  ;;  %3773 = vmatprep.subr.bf16.mxu0 %v5660_v57 }
 0x140   : > { %3814 = vmatprep.subr.bf16.mxu1 %v5663_v58 }
 0x142   : > { %3774 = vmatpush1.bf16.msra.mxu0 %v5658_v61 }
 0x143   : > { %3815 = vmatpush1.bf16.msra.mxu1 %v5661_v62  ;;  %3775 = vmatprep.subr.bf16.mxu0 %v5666_v63 }
 0x144   : > { %3816 = vmatprep.subr.bf16.mxu1 %v5669_v0 }
 0x146   : > { %3776 = vmatpush1.bf16.msra.mxu0 %v5664_v41  ;;  %v5730_v41 = vld [vmem:[%s6099_s6 + $0x4c8] ss:$16 sps:$4 sm:$0xff]  }
 0x147   : > { %3817 = vmatpush1.bf16.msra.mxu1 %v5667_v1  ;;  %3777 = vmatprep.subr.bf16.mxu0 %v5672_v42  ;;  %v5733_v1 = vld [vmem:[%s6099_s6 + $0x6c8] ss:$16 sps:$4 sm:$0xff]  }
 0x148   : > { %3818 = vmatprep.subr.bf16.mxu1 %v5675_v2 }
 0x14a   : > { %3778 = vmatpush1.bf16.msra.mxu0 %v5670_v3 }
 0x14b   : > { %3819 = vmatpush1.bf16.msra.mxu1 %v5673_v4  ;;  %3779 = vmatprep.subr.bf16.mxu0 %v5678_v5  ;;  %v5736_v5 = vld [vmem:[%s6099_s6 + $0x4e8] ss:$16 sps:$4 sm:$0xff]  }
 0x14c   : > { %3820 = vmatprep.subr.bf16.mxu1 %v5681_v6  ;;  %v5739_v6 = vld [vmem:[%s6099_s6 + $0x6e8] ss:$16 sps:$4 sm:$0xff]  }
 0x14e   : > { %3780 = vmatpush1.bf16.msra.mxu0 %v5676_v48  ;;  %v5744_v48 = vld [vmem:[%s6099_s6 + $0x50c] ss:$16 sps:$4 sm:$0xff]  }
 0x14f   : > { %3821 = vmatpush1.bf16.msra.mxu1 %v5679_v9  ;;  %3781 = vmatprep.subr.bf16.mxu0 %v5684_v52  ;;  %v5747_v9 = vld [vmem:[%s6099_s6 + $0x70c] ss:$16 sps:$4 sm:$0xff]   ;;  %v5742_v52 = vld [vmem:[%s6099_s6 + $0x508] ss:$16 sps:$4 sm:$0xff]  }
 0x150   : > { %3822 = vmatprep.subr.bf16.mxu1 %v5687_v10  ;;  %v5745_v10 = vld [vmem:[%s6099_s6 + $0x708] ss:$16 sps:$4 sm:$0xff]  }
 0x152   : > { %3782 = vmatpush1.bf16.msra.mxu0 %v5682_v11  ;;  %v5750_v11 = vld [vmem:[%s6099_s6 + $0x52c] ss:$16 sps:$4 sm:$0xff]  }
 0x153   : > { %3823 = vmatpush1.bf16.msra.mxu1 %v5685_v12  ;;  %3783 = vmatprep.subr.bf16.mxu0 %v5690_v13  ;;  %v5753_v12 = vld [vmem:[%s6099_s6 + $0x72c] ss:$16 sps:$4 sm:$0xff]   ;;  %v5748_v13 = vld [vmem:[%s6099_s6 + $0x528] ss:$16 sps:$4 sm:$0xff]  }
 0x154   : > { %3824 = vmatprep.subr.bf16.mxu1 %v5693_v14  ;;  %v5751_v14 = vld [vmem:[%s6099_s6 + $0x728] ss:$16 sps:$4 sm:$0xff]  }
 0x156   : > { %3784 = vmatpush1.bf16.msra.mxu0 %v5688_v15  ;;  %v5756_v15 = vld [vmem:[%s6099_s6 + $0x54c] ss:$16 sps:$4 sm:$0xff]  }
 0x157   : > { %3825 = vmatpush1.bf16.msra.mxu1 %v5691_v16  ;;  %3835 = vmatprep.subr.bf16.mxu0 %v5696_v19  ;;  %v5759_v16 = vld [vmem:[%s6099_s6 + $0x74c] ss:$16 sps:$4 sm:$0xff]   ;;  %v5754_v19 = vld [vmem:[%s6099_s6 + $0x548] ss:$16 sps:$4 sm:$0xff]  }
 0x158   : > { %3876 = vmatprep.subr.bf16.mxu1 %v5699_v20  ;;  %v5757_v20 = vld [vmem:[%s6099_s6 + $0x748] ss:$16 sps:$4 sm:$0xff]  }
 0x159   : > { %3786 = vmatmul.mubr.bf16.vlgmr.msra.gmra.mrb[16].mxu0 %v6176_v7  ;;  %v5706_v7 = vld [vmem:[%s6099_s6 + $0x448] ss:$16 sps:$4 sm:$0xff]  }
 0x15a   : > { %3827 = vmatmul.mubr.bf16.vlgmr.msra.gmra.mrb[16].mxu1 %v6178_v8  ;;  %3836 = vmatpush1.bf16.msra.mxu0 %v5694_v21  ;;  %v5709_v8 = vld [vmem:[%s6099_s6 + $0x648] ss:$16 sps:$4 sm:$0xff]   ;;  %v5762_v21 = vld [vmem:[%s6099_s6 + $0x56c] ss:$16 sps:$4 sm:$0xff]  }
 0x15b   : > { %3877 = vmatpush1.bf16.msra.mxu1 %v5697_v22  ;;  %3837 = vmatprep.subr.bf16.mxu0 %v5702_v27  ;;  %v5765_v22 = vld [vmem:[%s6099_s6 + $0x76c] ss:$16 sps:$4 sm:$0xff]   ;;  %v5760_v27 = vld [vmem:[%s6099_s6 + $0x568] ss:$16 sps:$4 sm:$0xff]  }
 0x15c   : > { %3878 = vmatprep.subr.bf16.mxu1 %v5705_v28  ;;  %3867 = vmatprep.mubr.bf16.mxu0 %v6216_v37  ;;  %v5715_v37 = vld [vmem:[%s6099_s6 + $0x668] ss:$16 sps:$4 sm:$0xff]  }
 0x15d   : > { %3908 = vmatprep.mubr.bf16.mxu1 %v6220_v38  ;;  %v5720_v38 = vld [vmem:[%s6099_s6 + $0x48c] ss:$16 sps:$4 sm:$0xff]   ;;  %v5763_v28 = vld [vmem:[%s6099_s6 + $0x768] ss:$16 sps:$4 sm:$0xff]  }
 0x15e   : > { %3838 = vmatpush1.bf16.msra.mxu0 %v5700_v30  ;;  %v5768_v30 = vld [vmem:[%s6099_s6 + $0x58c] ss:$16 sps:$4 sm:$0xff]  }
 0x15f   : > { %3879 = vmatpush1.bf16.msra.mxu1 %v5703_v31  ;;  %3839 = vmatprep.subr.bf16.mxu0 %v5708_v33  ;;  %v5771_v31 = vld [vmem:[%s6099_s6 + $0x78c] ss:$16 sps:$4 sm:$0xff]   ;;  %v5766_v33 = vld [vmem:[%s6099_s6 + $0x588] ss:$16 sps:$4 sm:$0xff]  }
 0x160   : > { %3880 = vmatprep.subr.bf16.mxu1 %v5711_v34  ;;  %v5769_v34 = vld [vmem:[%s6099_s6 + $0x788] ss:$16 sps:$4 sm:$0xff]  }
 0x162   : > { %3840 = vmatpush1.bf16.msra.mxu0 %v5706_v7  ;;  %v5774_v7 = vld [vmem:[%s6099_s6 + $0x5ac] ss:$16 sps:$4 sm:$0xff]  }
 0x163   : > { %3881 = vmatpush1.bf16.msra.mxu1 %v5709_v8  ;;  %3841 = vmatprep.subr.bf16.mxu0 %v5714_v35  ;;  %v5777_v8 = vld [vmem:[%s6099_s6 + $0x7ac] ss:$16 sps:$4 sm:$0xff]   ;;  %v5772_v35 = vld [vmem:[%s6099_s6 + $0x5a8] ss:$16 sps:$4 sm:$0xff]  }
 0x164   : > { %3882 = vmatprep.subr.bf16.mxu1 %v5717_v36  ;;  %v5775_v36 = vld [vmem:[%s6099_s6 + $0x7a8] ss:$16 sps:$4 sm:$0xff]  }
 0x166   : > { %3842 = vmatpush1.bf16.msra.mxu0 %v5712_v43  ;;  %v5780_v43 = vld [vmem:[%s6099_s6 + $0x5cc] ss:$16 sps:$4 sm:$0xff]  }
 0x167   : > { %3883 = vmatpush1.bf16.msra.mxu1 %v5715_v37  ;;  %3843 = vmatprep.subr.bf16.mxu0 %v5720_v38  ;;  %v5783_v37 = vld [vmem:[%s6099_s6 + $0x7cc] ss:$16 sps:$4 sm:$0xff]   ;;  %v5778_v38 = vld [vmem:[%s6099_s6 + $0x5c8] ss:$16 sps:$4 sm:$0xff]  }
 0x168   : > { %3884 = vmatprep.subr.bf16.mxu1 %v5723_v44  ;;  %v5781_v44 = vld [vmem:[%s6099_s6 + $0x7c8] ss:$16 sps:$4 sm:$0xff]  }
 0x16a   : > { %3844 = vmatpush1.bf16.msra.mxu0 %v5718_v45  ;;  %v5786_v45 = vld [vmem:[%s6099_s6 + $0x5ec] ss:$16 sps:$4 sm:$0xff]  }
 0x16b   : > { %3885 = vmatpush1.bf16.msra.mxu1 %v5721_v46  ;;  %3845 = vmatprep.subr.bf16.mxu0 %v5726_v47  ;;  %v5789_v46 = vld [vmem:[%s6099_s6 + $0x7ec] ss:$16 sps:$4 sm:$0xff]   ;;  %v5784_v47 = vld [vmem:[%s6099_s6 + $0x5e8] ss:$16 sps:$4 sm:$0xff]  }
 0x16c   : > { %3886 = vmatprep.subr.bf16.mxu1 %v5729_v49  ;;  %v3541_v55 = vpop.f32.mrb[4].mxu0  ;;  %v5787_v49 = vld [vmem:[%s6099_s6 + $0x7e8] ss:$16 sps:$4 sm:$0xff]  }
 0x16d   : > { %v3582_v56 = vpop.f32.mrb[4].mxu1  ;;  %v3542_v57 = vadd.f32 %v3541_v55, %v6480_v29  ;;  %v3543_v58 = vpop.f32.mrb[5].mxu0  ;;  %v5738_v29 = vld [vmem:[%s6099_s6 + $0x4ec] ss:$16 sps:$4 sm:$0xff]  }
 0x16e   : > { %v3584_v61 = vpop.f32.mrb[5].mxu1  ;;  %v3544_v62 = vadd.f32 %v3543_v58, %v6482_v32  ;;  %v3545_v63 = vpop.f32.mrb[6].mxu0  ;;  %3846 = vmatpush1.bf16.msra.mxu0 %v5724_v50  ;;  %v5741_v32 = vld [vmem:[%s6099_s6 + $0x6ec] ss:$16 sps:$4 sm:$0xff]   ;;  %v5799_v58 = vld [vmem:[%s6099_s6 + $0xa28] ss:$16 sps:$4 sm:$0xff]  }
 0x16f   : > { %v3586_v0 = vpop.f32.mrb[6].mxu1  ;;  %3887 = vmatpush1.bf16.msra.mxu1 %v5727_v51  ;;  %v6554_v42 = vadd.f32 %v3582_v56, %v3542_v57  ;;  %v3546_v2 = vpop.f32.mrb[7].mxu0  ;;  %3847 = vmatprep.subr.bf16.mxu0 %v5732_v53  ;;  %v5792_v50 = vld [vmem:[%s6099_s6 + $0x80c] ss:$16 sps:$4 sm:$0xff]   ;;  %v5790_v53 = vld [vmem:[%s6099_s6 + $0x808] ss:$16 sps:$4 sm:$0xff]  }
 0x170   : > { %v3587_v3 = vpop.f32.mrb[7].mxu1  ;;  %3888 = vmatprep.subr.bf16.mxu1 %v5735_v54  ;;  %v6558_v4 = vadd.f32 %v3584_v61, %v3544_v62  ;;  %v5795_v51 = vld [vmem:[%s6099_s6 + $0xa0c] ss:$16 sps:$4 sm:$0xff]   ;;  %v5793_v54 = vld [vmem:[%s6099_s6 + $0xa08] ss:$16 sps:$4 sm:$0xff]  }
 0x171   : > { %v5798_v55 = vld [vmem:[%s6099_s6 + $0x82c] ss:$16 sps:$4 sm:$0xff]   ;;  %v5796_v57 = vld [vmem:[%s6099_s6 + $0x828] ss:$16 sps:$4 sm:$0xff]  }
 0x172   : > { %3848 = vmatpush1.bf16.msra.mxu0 %v5730_v41  ;;  %v5801_v56 = vld [vmem:[%s6099_s6 + $0xa2c] ss:$16 sps:$4 sm:$0xff]   ;;  %v5808_v41 = vld [vmem:[%s6099_s6 + $0x868] ss:$16 sps:$4 sm:$0xff]  }
 0x173   : > { %3889 = vmatpush1.bf16.msra.mxu1 %v5733_v1  ;;  %3849 = vmatprep.subr.bf16.mxu0 %v5738_v29  ;;  %v5804_v61 = vld [vmem:[%s6099_s6 + $0x84c] ss:$16 sps:$4 sm:$0xff]   ;;  %v5814_v2 = vld [vmem:[%s6099_s6 + $0x888] ss:$16 sps:$4 sm:$0xff]  }
 0x174   : > { %3890 = vmatprep.subr.bf16.mxu1 %v5741_v32  ;;  %v5807_v62 = vld [vmem:[%s6099_s6 + $0xa4c] ss:$16 sps:$4 sm:$0xff]   ;;  %v5817_v3 = vld [vmem:[%s6099_s6 + $0xa88] ss:$16 sps:$4 sm:$0xff]  }
 0x175   : > { %v5810_v63 = vld [vmem:[%s6099_s6 + $0x86c] ss:$16 sps:$4 sm:$0xff]  }
 0x176   : > { %3850 = vmatpush1.bf16.msra.mxu0 %v5736_v5  ;;  %v5813_v0 = vld [vmem:[%s6099_s6 + $0xa6c] ss:$16 sps:$4 sm:$0xff]   ;;  %v5820_v5 = vld [vmem:[%s6099_s6 + $0x8a8] ss:$16 sps:$4 sm:$0xff]  }
 0x177   : > { %3891 = vmatpush1.bf16.msra.mxu1 %v5739_v6  ;;  %3851 = vmatprep.subr.bf16.mxu0 %v5744_v48  ;;  %v5819_v1 = vld [vmem:[%s6099_s6 + $0xa8c] ss:$16 sps:$4 sm:$0xff]   ;;  %v5823_v6 = vld [vmem:[%s6099_s6 + $0xaa8] ss:$16 sps:$4 sm:$0xff]  }
 0x178   : > { %3892 = vmatprep.subr.bf16.mxu1 %v5747_v9  ;;  %v5822_v29 = vld [vmem:[%s6099_s6 + $0x8ac] ss:$16 sps:$4 sm:$0xff]  }
 0x179   : > { %v5825_v32 = vld [vmem:[%s6099_s6 + $0xaac] ss:$16 sps:$4 sm:$0xff]  }
 0x17a   : > { %3852 = vmatpush1.bf16.msra.mxu0 %v5742_v52  ;;  %v5828_v48 = vld [vmem:[%s6099_s6 + $0x8cc] ss:$16 sps:$4 sm:$0xff]  }
 0x17b   : > { %3893 = vmatpush1.bf16.msra.mxu1 %v5745_v10  ;;  %3853 = vmatprep.subr.bf16.mxu0 %v5750_v11  ;;  %v5831_v9 = vld [vmem:[%s6099_s6 + $0xacc] ss:$16 sps:$4 sm:$0xff]  }
 0x17c   : > { %3894 = vmatprep.subr.bf16.mxu1 %v5753_v12 }
 0x17e   : > { %3854 = vmatpush1.bf16.msra.mxu0 %v5748_v13 }
 0x17f   : > { %3895 = vmatpush1.bf16.msra.mxu1 %v5751_v14  ;;  %3855 = vmatprep.subr.bf16.mxu0 %v5756_v15 }
 0x180   : > { %3896 = vmatprep.subr.bf16.mxu1 %v5759_v16 }
 0x182   : > { %3856 = vmatpush1.bf16.msra.mxu0 %v5754_v19  ;;  %v5826_v19 = vld [vmem:[%s6099_s6 + $0x8c8] ss:$16 sps:$4 sm:$0xff]  }
 0x183   : > { %3897 = vmatpush1.bf16.msra.mxu1 %v5757_v20  ;;  %3857 = vmatprep.subr.bf16.mxu0 %v5762_v21  ;;  %v5829_v20 = vld [vmem:[%s6099_s6 + $0xac8] ss:$16 sps:$4 sm:$0xff]  }
 0x184   : > { %3898 = vmatprep.subr.bf16.mxu1 %v5765_v22 }
 0x186   : > { %3858 = vmatpush1.bf16.msra.mxu0 %v5760_v27 }
 0x187   : > { %3899 = vmatpush1.bf16.msra.mxu1 %v5763_v28  ;;  %3859 = vmatprep.subr.bf16.mxu0 %v5768_v30  ;;  %v5832_v30 = vld [vmem:[%s6099_s6 + $0x8e8] ss:$16 sps:$4 sm:$0xff]  }
 0x188   : > { %3900 = vmatprep.subr.bf16.mxu1 %v5771_v31  ;;  %v5835_v31 = vld [vmem:[%s6099_s6 + $0xae8] ss:$16 sps:$4 sm:$0xff]  }
 0x18a   : > { %3860 = vmatpush1.bf16.msra.mxu0 %v5766_v33  ;;  %v5840_v33 = vld [vmem:[%s6099_s6 + $0x90c] ss:$16 sps:$4 sm:$0xff]  }
 0x18b   : > { %3901 = vmatpush1.bf16.msra.mxu1 %v5769_v34  ;;  %3861 = vmatprep.subr.bf16.mxu0 %v5774_v7  ;;  %v5843_v34 = vld [vmem:[%s6099_s6 + $0xb0c] ss:$16 sps:$4 sm:$0xff]   ;;  %v5838_v7 = vld [vmem:[%s6099_s6 + $0x908] ss:$16 sps:$4 sm:$0xff]  }
 0x18c   : > { %3902 = vmatprep.subr.bf16.mxu1 %v5777_v8  ;;  %v5841_v8 = vld [vmem:[%s6099_s6 + $0xb08] ss:$16 sps:$4 sm:$0xff]  }
 0x18e   : > { %3862 = vmatpush1.bf16.msra.mxu0 %v5772_v35  ;;  %v5846_v35 = vld [vmem:[%s6099_s6 + $0x92c] ss:$16 sps:$4 sm:$0xff]  }
 0x18f   : > { %3903 = vmatpush1.bf16.msra.mxu1 %v5775_v36  ;;  %3863 = vmatprep.subr.bf16.mxu0 %v5780_v43  ;;  %v5849_v36 = vld [vmem:[%s6099_s6 + $0xb2c] ss:$16 sps:$4 sm:$0xff]   ;;  %v5844_v43 = vld [vmem:[%s6099_s6 + $0x928] ss:$16 sps:$4 sm:$0xff]  }
 0x190   : > { %3904 = vmatprep.subr.bf16.mxu1 %v5783_v37  ;;  %v5847_v37 = vld [vmem:[%s6099_s6 + $0xb28] ss:$16 sps:$4 sm:$0xff]  }
 0x192   : > { %3864 = vmatpush1.bf16.msra.mxu0 %v5778_v38  ;;  %v5852_v38 = vld [vmem:[%s6099_s6 + $0x94c] ss:$16 sps:$4 sm:$0xff]  }
 0x193   : > { %3905 = vmatpush1.bf16.msra.mxu1 %v5781_v44  ;;  %3865 = vmatprep.subr.bf16.mxu0 %v5786_v45  ;;  %v5855_v44 = vld [vmem:[%s6099_s6 + $0xb4c] ss:$16 sps:$4 sm:$0xff]   ;;  %v5850_v45 = vld [vmem:[%s6099_s6 + $0x948] ss:$16 sps:$4 sm:$0xff]  }
 0x194   : > { %3906 = vmatprep.subr.bf16.mxu1 %v5789_v46  ;;  %v5853_v46 = vld [vmem:[%s6099_s6 + $0xb48] ss:$16 sps:$4 sm:$0xff]  }
 0x196   : > { %3866 = vmatpush1.bf16.msra.mxu0 %v5784_v47  ;;  %v5858_v47 = vld [vmem:[%s6099_s6 + $0x96c] ss:$16 sps:$4 sm:$0xff]  }
 0x197   : > { %3907 = vmatpush1.bf16.msra.mxu1 %v5787_v49  ;;  %3917 = vmatprep.subr.bf16.mxu0 %v5792_v50  ;;  %v5861_v49 = vld [vmem:[%s6099_s6 + $0xb6c] ss:$16 sps:$4 sm:$0xff]   ;;  %v5856_v50 = vld [vmem:[%s6099_s6 + $0x968] ss:$16 sps:$4 sm:$0xff]  }
 0x198   : > { %3958 = vmatprep.subr.bf16.mxu1 %v5795_v51  ;;  %v5859_v51 = vld [vmem:[%s6099_s6 + $0xb68] ss:$16 sps:$4 sm:$0xff]  }
 0x199   : > { %3868 = vmatmul.mubr.bf16.vlgmr.msra.gmra.mrb[20].mxu0 %v6264_v17  ;;  %v5802_v17 = vld [vmem:[%s6099_s6 + $0x848] ss:$16 sps:$4 sm:$0xff]  }
 0x19a   : > { %3909 = vmatmul.mubr.bf16.vlgmr.msra.gmra.mrb[20].mxu1 %v6268_v18  ;;  %3918 = vmatpush1.bf16.msra.mxu0 %v5790_v53  ;;  %v5805_v18 = vld [vmem:[%s6099_s6 + $0xa48] ss:$16 sps:$4 sm:$0xff]   ;;  %v5864_v53 = vld [vmem:[%s6099_s6 + $0x98c] ss:$16 sps:$4 sm:$0xff]  }
 0x19b   : > { %3959 = vmatpush1.bf16.msra.mxu1 %v5793_v54  ;;  %3919 = vmatprep.subr.bf16.mxu0 %v5798_v55  ;;  %v5867_v54 = vld [vmem:[%s6099_s6 + $0xb8c] ss:$16 sps:$4 sm:$0xff]   ;;  %v5862_v55 = vld [vmem:[%s6099_s6 + $0x988] ss:$16 sps:$4 sm:$0xff]  }
 0x19c   : > { %3960 = vmatprep.subr.bf16.mxu1 %v5801_v56  ;;  %3949 = vmatprep.mubr.bf16.mxu0 %v6282_v25  ;;  %v5811_v25 = vld [vmem:[%s6099_s6 + $0xa68] ss:$16 sps:$4 sm:$0xff]  }
 0x19d   : > { %3990 = vmatprep.mubr.bf16.mxu1 %v6286_v26  ;;  %v5816_v26 = vld [vmem:[%s6099_s6 + $0x88c] ss:$16 sps:$4 sm:$0xff]   ;;  %v5865_v56 = vld [vmem:[%s6099_s6 + $0xb88] ss:$16 sps:$4 sm:$0xff]  }
 0x19e   : > { %3920 = vmatpush1.bf16.msra.mxu0 %v5796_v57  ;;  %v5870_v57 = vld [vmem:[%s6099_s6 + $0x9ac] ss:$16 sps:$4 sm:$0xff]  }
 0x19f   : > { %3961 = vmatpush1.bf16.msra.mxu1 %v5799_v58  ;;  %3921 = vmatprep.subr.bf16.mxu0 %v5804_v61  ;;  %v5873_v58 = vld [vmem:[%s6099_s6 + $0xbac] ss:$16 sps:$4 sm:$0xff]   ;;  %v5868_v61 = vld [vmem:[%s6099_s6 + $0x9a8] ss:$16 sps:$4 sm:$0xff]  }
 0x1a0   : > { %3962 = vmatprep.subr.bf16.mxu1 %v5807_v62  ;;  %v5871_v62 = vld [vmem:[%s6099_s6 + $0xba8] ss:$16 sps:$4 sm:$0xff]  }
 0x1a2   : > { %3922 = vmatpush1.bf16.msra.mxu0 %v5802_v17  ;;  %v5876_v17 = vld [vmem:[%s6099_s6 + $0x9cc] ss:$16 sps:$4 sm:$0xff]  }
 0x1a3   : > { %3963 = vmatpush1.bf16.msra.mxu1 %v5805_v18  ;;  %3923 = vmatprep.subr.bf16.mxu0 %v5810_v63  ;;  %v5879_v18 = vld [vmem:[%s6099_s6 + $0xbcc] ss:$16 sps:$4 sm:$0xff]   ;;  %v5874_v63 = vld [vmem:[%s6099_s6 + $0x9c8] ss:$16 sps:$4 sm:$0xff]  }
 0x1a4   : > { %3964 = vmatprep.subr.bf16.mxu1 %v5813_v0  ;;  %v5877_v0 = vld [vmem:[%s6099_s6 + $0xbc8] ss:$16 sps:$4 sm:$0xff]  }
 0x1a6   : > { %3924 = vmatpush1.bf16.msra.mxu0 %v5808_v41  ;;  %v5882_v41 = vld [vmem:[%s6099_s6 + $0x9ec] ss:$16 sps:$4 sm:$0xff]  }
 0x1a7   : > { %3965 = vmatpush1.bf16.msra.mxu1 %v5811_v25  ;;  %3925 = vmatprep.subr.bf16.mxu0 %v5816_v26  ;;  %v5885_v25 = vld [vmem:[%s6099_s6 + $0xbec] ss:$16 sps:$4 sm:$0xff]   ;;  %v5880_v26 = vld [vmem:[%s6099_s6 + $0x9e8] ss:$16 sps:$4 sm:$0xff]  }
 0x1a8   : > { %3966 = vmatprep.subr.bf16.mxu1 %v5819_v1  ;;  %v5883_v1 = vld [vmem:[%s6099_s6 + $0xbe8] ss:$16 sps:$4 sm:$0xff]  }
 0x1aa   : > { %3926 = vmatpush1.bf16.msra.mxu0 %v5814_v2  ;;  %v5888_v2 = vld [vmem:[%s6099_s6 + $0xc0c] ss:$16 sps:$4 sm:$0xff]  }
 0x1ab   : > { %3967 = vmatpush1.bf16.msra.mxu1 %v5817_v3  ;;  %3927 = vmatprep.subr.bf16.mxu0 %v5822_v29  ;;  %v5891_v3 = vld [vmem:[%s6099_s6 + $0xe0c] ss:$16 sps:$4 sm:$0xff]   ;;  %v5886_v29 = vld [vmem:[%s6099_s6 + $0xc08] ss:$16 sps:$4 sm:$0xff]  }
 0x1ac   : > { %3968 = vmatprep.subr.bf16.mxu1 %v5825_v32  ;;  %v3623_v52 = vpop.f32.mrb[8].mxu0  ;;  %v5889_v32 = vld [vmem:[%s6099_s6 + $0xe08] ss:$16 sps:$4 sm:$0xff]  }
 0x1ad   : > { %v3664_v10 = vpop.f32.mrb[8].mxu1  ;;  %v3624_v11 = vadd.f32 %v3623_v52, %v6554_v42  ;;  %v3625_v12 = vpop.f32.mrb[9].mxu0  ;;  %v5834_v42 = vld [vmem:[%s6099_s6 + $0x8ec] ss:$16 sps:$4 sm:$0xff]  }
 0x1ae   : > { %v3666_v13 = vpop.f32.mrb[9].mxu1  ;;  %v3626_v14 = vadd.f32 %v3625_v12, %v6558_v4  ;;  %v3627_v15 = vpop.f32.mrb[10].mxu0  ;;  %3928 = vmatpush1.bf16.msra.mxu0 %v5820_v5  ;;  %v5837_v4 = vld [vmem:[%s6099_s6 + $0xaec] ss:$16 sps:$4 sm:$0xff]  }
 0x1af   : > { %v3668_v16 = vpop.f32.mrb[10].mxu1  ;;  %3969 = vmatpush1.bf16.msra.mxu1 %v5823_v6  ;;  %v6628_v21 = vadd.f32 %v3664_v10, %v3624_v11  ;;  %v3628_v22 = vpop.f32.mrb[11].mxu0  ;;  %3929 = vmatprep.subr.bf16.mxu0 %v5828_v48  ;;  %v5894_v5 = vld [vmem:[%s6099_s6 + $0xc2c] ss:$16 sps:$4 sm:$0xff]   ;;  %v5892_v48 = vld [vmem:[%s6099_s6 + $0xc28] ss:$16 sps:$4 sm:$0xff]  }
 0x1b0   : > { %v3669_v27 = vpop.f32.mrb[11].mxu1  ;;  %3970 = vmatprep.subr.bf16.mxu1 %v5831_v9  ;;  %v6632_v28 = vadd.f32 %v3666_v13, %v3626_v14  ;;  %v5897_v6 = vld [vmem:[%s6099_s6 + $0xe2c] ss:$16 sps:$4 sm:$0xff]   ;;  %v5895_v9 = vld [vmem:[%s6099_s6 + $0xe28] ss:$16 sps:$4 sm:$0xff]  }
 0x1b1   : > { %v5900_v52 = vld [vmem:[%s6099_s6 + $0xc4c] ss:$16 sps:$4 sm:$0xff]   ;;  %v5904_v13 = vld [vmem:[%s6099_s6 + $0xc68] ss:$16 sps:$4 sm:$0xff]  }
 0x1b2   : > { %3930 = vmatpush1.bf16.msra.mxu0 %v5826_v19  ;;  %v5903_v10 = vld [vmem:[%s6099_s6 + $0xe4c] ss:$16 sps:$4 sm:$0xff]   ;;  %v5910_v15 = vld [vmem:[%s6099_s6 + $0xc88] ss:$16 sps:$4 sm:$0xff]  }
 0x1b3   : > { %3971 = vmatpush1.bf16.msra.mxu1 %v5829_v20  ;;  %3931 = vmatprep.subr.bf16.mxu0 %v5834_v42  ;;  %v5906_v11 = vld [vmem:[%s6099_s6 + $0xc6c] ss:$16 sps:$4 sm:$0xff]   ;;  %v5913_v16 = vld [vmem:[%s6099_s6 + $0xe88] ss:$16 sps:$4 sm:$0xff]  }
 0x1b4   : > { %3972 = vmatprep.subr.bf16.mxu1 %v5837_v4  ;;  %v5909_v12 = vld [vmem:[%s6099_s6 + $0xe6c] ss:$16 sps:$4 sm:$0xff]   ;;  %v5916_v22 = vld [vmem:[%s6099_s6 + $0xca8] ss:$16 sps:$4 sm:$0xff]  }
 0x1b5   : > { %v5915_v14 = vld [vmem:[%s6099_s6 + $0xe8c] ss:$16 sps:$4 sm:$0xff]   ;;  %v5919_v27 = vld [vmem:[%s6099_s6 + $0xea8] ss:$16 sps:$4 sm:$0xff]  }
 0x1b6   : > { %3932 = vmatpush1.bf16.msra.mxu0 %v5832_v30  ;;  %v5918_v19 = vld [vmem:[%s6099_s6 + $0xcac] ss:$16 sps:$4 sm:$0xff]  }
 0x1b7   : > { %3973 = vmatpush1.bf16.msra.mxu1 %v5835_v31  ;;  %3933 = vmatprep.subr.bf16.mxu0 %v5840_v33  ;;  %v5921_v20 = vld [vmem:[%s6099_s6 + $0xeac] ss:$16 sps:$4 sm:$0xff]  }
 0x1b8   : > { %3974 = vmatprep.subr.bf16.mxu1 %v5843_v34  ;;  %v5924_v42 = vld [vmem:[%s6099_s6 + $0xccc] ss:$16 sps:$4 sm:$0xff]  }
 0x1b9   : > { %v5927_v4 = vld [vmem:[%s6099_s6 + $0xecc] ss:$16 sps:$4 sm:$0xff]  }
 0x1ba   : > { %3934 = vmatpush1.bf16.msra.mxu0 %v5838_v7 }
 0x1bb   : > { %3975 = vmatpush1.bf16.msra.mxu1 %v5841_v8  ;;  %3935 = vmatprep.subr.bf16.mxu0 %v5846_v35  ;;  %v5922_v8 = vld [vmem:[%s6099_s6 + $0xcc8] ss:$16 sps:$4 sm:$0xff]   ;;  %v285_v35 = vld [vmem:[#allocation2] sm:$0xff] }
 0x1bc   : > { %3976 = vmatprep.subr.bf16.mxu1 %v5849_v36 }
 0x1be   : > { %3936 = vmatpush1.bf16.msra.mxu0 %v5844_v43  ;;  %v286_v43 = vld [vmem:[#allocation2 + $0x8] sm:$0xff] }
 0x1bf   : > { %3977 = vmatpush1.bf16.msra.mxu1 %v5847_v37  ;;  %3937 = vmatprep.subr.bf16.mxu0 %v5852_v38 }
 0x1c0   : > { %3978 = vmatprep.subr.bf16.mxu1 %v5855_v44  ;;  %v5925_v44 = vld [vmem:[%s6099_s6 + $0xec8] ss:$16 sps:$4 sm:$0xff]  }
 0x1c2   : > { %3938 = vmatpush1.bf16.msra.mxu0 %v5850_v45 }
 0x1c3   : > { %3979 = vmatpush1.bf16.msra.mxu1 %v5853_v46  ;;  %3939 = vmatprep.subr.bf16.mxu0 %v5858_v47  ;;  %v5930_v47 = vld [vmem:[%s6099_s6 + $0xcec] ss:$16 sps:$4 sm:$0xff]  }
 0x1c4   : > { %3980 = vmatprep.subr.bf16.mxu1 %v5861_v49  ;;  %v5933_v49 = vld [vmem:[%s6099_s6 + $0xeec] ss:$16 sps:$4 sm:$0xff]  }
 0x1c6   : > { %3940 = vmatpush1.bf16.msra.mxu0 %v5856_v50 }
 0x1c7   : > { %3981 = vmatpush1.bf16.msra.mxu1 %v5859_v51  ;;  %3941 = vmatprep.subr.bf16.mxu0 %v5864_v53  ;;  %v5928_v53 = vld [vmem:[%s6099_s6 + $0xce8] ss:$16 sps:$4 sm:$0xff]  }
 0x1c8   : > { %3982 = vmatprep.subr.bf16.mxu1 %v5867_v54  ;;  %v5931_v54 = vld [vmem:[%s6099_s6 + $0xee8] ss:$16 sps:$4 sm:$0xff]  }
 0x1ca   : > { %3942 = vmatpush1.bf16.msra.mxu0 %v5862_v55  ;;  %v5936_v55 = vld [vmem:[%s6099_s6 + $0xd0c] ss:$16 sps:$4 sm:$0xff]  }
 0x1cb   : > { %3983 = vmatpush1.bf16.msra.mxu1 %v5865_v56  ;;  %3943 = vmatprep.subr.bf16.mxu0 %v5870_v57  ;;  %v5939_v56 = vld [vmem:[%s6099_s6 + $0xf0c] ss:$16 sps:$4 sm:$0xff]   ;;  %v5934_v57 = vld [vmem:[%s6099_s6 + $0xd08] ss:$16 sps:$4 sm:$0xff]  }
 0x1cc   : > { %3984 = vmatprep.subr.bf16.mxu1 %v5873_v58  ;;  %v5937_v58 = vld [vmem:[%s6099_s6 + $0xf08] ss:$16 sps:$4 sm:$0xff]  }
 0x1ce   : > { %3944 = vmatpush1.bf16.msra.mxu0 %v5868_v61  ;;  %v5942_v61 = vld [vmem:[%s6099_s6 + $0xd2c] ss:$16 sps:$4 sm:$0xff]  }
 0x1cf   : > { %3985 = vmatpush1.bf16.msra.mxu1 %v5871_v62  ;;  %3945 = vmatprep.subr.bf16.mxu0 %v5876_v17  ;;  %v5945_v62 = vld [vmem:[%s6099_s6 + $0xf2c] ss:$16 sps:$4 sm:$0xff]   ;;  %v5940_v17 = vld [vmem:[%s6099_s6 + $0xd28] ss:$16 sps:$4 sm:$0xff]  }
 0x1d0   : > { %3986 = vmatprep.subr.bf16.mxu1 %v5879_v18  ;;  %v5943_v18 = vld [vmem:[%s6099_s6 + $0xf28] ss:$16 sps:$4 sm:$0xff]  }
 0x1d2   : > { %3946 = vmatpush1.bf16.msra.mxu0 %v5874_v63  ;;  %v5948_v63 = vld [vmem:[%s6099_s6 + $0xd4c] ss:$16 sps:$4 sm:$0xff]  }
 0x1d3   : > { %3987 = vmatpush1.bf16.msra.mxu1 %v5877_v0  ;;  %3947 = vmatprep.subr.bf16.mxu0 %v5882_v41  ;;  %v5951_v0 = vld [vmem:[%s6099_s6 + $0xf4c] ss:$16 sps:$4 sm:$0xff]   ;;  %v5946_v41 = vld [vmem:[%s6099_s6 + $0xd48] ss:$16 sps:$4 sm:$0xff]  }
 0x1d4   : > { %3988 = vmatprep.subr.bf16.mxu1 %v5885_v25  ;;  %v5949_v25 = vld [vmem:[%s6099_s6 + $0xf48] ss:$16 sps:$4 sm:$0xff]  }
 0x1d6   : > { %3948 = vmatpush1.bf16.msra.mxu0 %v5880_v26  ;;  %v5954_v26 = vld [vmem:[%s6099_s6 + $0xd6c] ss:$16 sps:$4 sm:$0xff]  }
 0x1d7   : > { %3989 = vmatpush1.bf16.msra.mxu1 %v5883_v1  ;;  %3999 = vmatprep.subr.bf16.mxu0 %v5888_v2  ;;  %v5957_v1 = vld [vmem:[%s6099_s6 + $0xf6c] ss:$16 sps:$4 sm:$0xff]   ;;  %v5952_v2 = vld [vmem:[%s6099_s6 + $0xd68] ss:$16 sps:$4 sm:$0xff]  }
 0x1d8   : > { %4040 = vmatprep.subr.bf16.mxu1 %v5891_v3  ;;  %v5955_v3 = vld [vmem:[%s6099_s6 + $0xf68] ss:$16 sps:$4 sm:$0xff]  }
 0x1d9   : > { %3950 = vmatmul.mubr.bf16.vlgmr.msra.gmra.mrb[24].mxu0 %v6356_v39  ;;  %v5898_v39 = vld [vmem:[%s6099_s6 + $0xc48] ss:$16 sps:$4 sm:$0xff]  }
 0x1da   : > { %3991 = vmatmul.mubr.bf16.vlgmr.msra.gmra.mrb[24].mxu1 %v6360_v40  ;;  %4000 = vmatpush1.bf16.msra.mxu0 %v5886_v29  ;;  %v5901_v40 = vld [vmem:[%s6099_s6 + $0xe48] ss:$16 sps:$4 sm:$0xff]   ;;  %v5960_v29 = vld [vmem:[%s6099_s6 + $0xd8c] ss:$16 sps:$4 sm:$0xff]  }
 0x1db   : > { %4041 = vmatpush1.bf16.msra.mxu1 %v5889_v32  ;;  %4001 = vmatprep.subr.bf16.mxu0 %v5894_v5  ;;  %v5963_v32 = vld [vmem:[%s6099_s6 + $0xf8c] ss:$16 sps:$4 sm:$0xff]   ;;  %v5958_v5 = vld [vmem:[%s6099_s6 + $0xd88] ss:$16 sps:$4 sm:$0xff]  }
 0x1dc   : > { %4042 = vmatprep.subr.bf16.mxu1 %v5897_v6  ;;  %4031 = vmatprep.mubr.bf16.mxu0 %v6372_v23  ;;  %v5907_v23 = vld [vmem:[%s6099_s6 + $0xe68] ss:$16 sps:$4 sm:$0xff]  }
 0x1dd   : > { %4072 = vmatprep.mubr.bf16.mxu1 %v6376_v24  ;;  %v5912_v24 = vld [vmem:[%s6099_s6 + $0xc8c] ss:$16 sps:$4 sm:$0xff]   ;;  %v5961_v6 = vld [vmem:[%s6099_s6 + $0xf88] ss:$16 sps:$4 sm:$0xff]  }
 0x1de   : > { %4002 = vmatpush1.bf16.msra.mxu0 %v5892_v48  ;;  %v5966_v48 = vld [vmem:[%s6099_s6 + $0xdac] ss:$16 sps:$4 sm:$0xff]  }
 0x1df   : > { %4043 = vmatpush1.bf16.msra.mxu1 %v5895_v9  ;;  %4003 = vmatprep.subr.bf16.mxu0 %v5900_v52  ;;  %v5969_v9 = vld [vmem:[%s6099_s6 + $0xfac] ss:$16 sps:$4 sm:$0xff]   ;;  %v5964_v52 = vld [vmem:[%s6099_s6 + $0xda8] ss:$16 sps:$4 sm:$0xff]  }
 0x1e0   : > { %4044 = vmatprep.subr.bf16.mxu1 %v5903_v10  ;;  %v5967_v10 = vld [vmem:[%s6099_s6 + $0xfa8] ss:$16 sps:$4 sm:$0xff]  }
 0x1e2   : > { %4004 = vmatpush1.bf16.msra.mxu0 %v5898_v39  ;;  %v5972_v39 = vld [vmem:[%s6099_s6 + $0xdcc] ss:$16 sps:$4 sm:$0xff]  }
 0x1e3   : > { %4045 = vmatpush1.bf16.msra.mxu1 %v5901_v40  ;;  %4005 = vmatprep.subr.bf16.mxu0 %v5906_v11  ;;  %v5975_v40 = vld [vmem:[%s6099_s6 + $0xfcc] ss:$16 sps:$4 sm:$0xff]   ;;  %v5970_v11 = vld [vmem:[%s6099_s6 + $0xdc8] ss:$16 sps:$4 sm:$0xff]  }
 0x1e4   : > { %4046 = vmatprep.subr.bf16.mxu1 %v5909_v12  ;;  %v5973_v12 = vld [vmem:[%s6099_s6 + $0xfc8] ss:$16 sps:$4 sm:$0xff]  }
 0x1e6   : > { %4006 = vmatpush1.bf16.msra.mxu0 %v5904_v13  ;;  %v5978_v13 = vld [vmem:[%s6099_s6 + $0xdec] ss:$16 sps:$4 sm:$0xff]  }
 0x1e7   : > { %4047 = vmatpush1.bf16.msra.mxu1 %v5907_v23  ;;  %4007 = vmatprep.subr.bf16.mxu0 %v5912_v24  ;;  %v5981_v23 = vld [vmem:[%s6099_s6 + $0xfec] ss:$16 sps:$4 sm:$0xff]   ;;  %v5976_v24 = vld [vmem:[%s6099_s6 + $0xde8] ss:$16 sps:$4 sm:$0xff]  }
 0x1e8   : > { %4048 = vmatprep.subr.bf16.mxu1 %v5915_v14  ;;  %v5979_v14 = vld [vmem:[%s6099_s6 + $0xfe8] ss:$16 sps:$4 sm:$0xff]  }
 0x1ea   : > { %4008 = vmatpush1.bf16.msra.mxu0 %v5910_v15 }
 0x1eb   : > { %4049 = vmatpush1.bf16.msra.mxu1 %v5913_v16  ;;  %4009 = vmatprep.subr.bf16.mxu0 %v5918_v19 }
 0x1ec   : > { %4050 = vmatprep.subr.bf16.mxu1 %v5921_v20  ;;  %v3705_v30 = vpop.f32.mrb[12].mxu0 }
 0x1ed   : > { %v3746_v31 = vpop.f32.mrb[12].mxu1  ;;  %v3706_v33 = vadd.f32 %v3705_v30, %v6628_v21  ;;  %v3707_v34 = vpop.f32.mrb[13].mxu0 }
 0x1ee   : > { %v3748_v7 = vpop.f32.mrb[13].mxu1  ;;  %v3708_v36 = vadd.f32 %v3707_v34, %v6632_v28  ;;  %v3709_v37 = vpop.f32.mrb[14].mxu0  ;;  %4010 = vmatpush1.bf16.msra.mxu0 %v5916_v22 }
 0x1ef   : > { %v3750_v38 = vpop.f32.mrb[14].mxu1  ;;  %4051 = vmatpush1.bf16.msra.mxu1 %v5919_v27  ;;  %v3747_v45 = vadd.f32 %v3746_v31, %v3706_v33  ;;  %v3710_v46 = vpop.f32.mrb[15].mxu0  ;;  %4011 = vmatprep.subr.bf16.mxu0 %v5924_v42 }
 0x1f0   : > { %v3751_v21 = vpop.f32.mrb[15].mxu1  ;;  %4052 = vmatprep.subr.bf16.mxu1 %v5927_v4  ;;  %v3749_v50 = vadd.f32 %v3748_v7, %v3708_v36 }
 0x1f1   : > { %v4081_v28 = vadd.f32 %v3747_v45, %v285_v35 }
 0x1f2   : > { %v4082_v51 = vadd.f32 %v3749_v50, %v286_v43  ;;  %4012 = vmatpush1.bf16.msra.mxu0 %v5922_v8 }
 0x1f3   : > { %4053 = vmatpush1.bf16.msra.mxu1 %v5925_v44  ;;  %4085 = vst [vmem:[#allocation2] sm:$0xff] %v4081_v28  ;;  %4013 = vmatprep.subr.bf16.mxu0 %v5930_v47 }
 0x1f4   : > { %4054 = vmatprep.subr.bf16.mxu1 %v5933_v49  ;;  %4086 = vst [vmem:[#allocation2 + $0x8] sm:$0xff] %v4082_v51 }
 0x1f6   : > { %4014 = vmatpush1.bf16.msra.mxu0 %v5928_v53 }
 0x1f7   : > { %4055 = vmatpush1.bf16.msra.mxu1 %v5931_v54  ;;  %4015 = vmatprep.subr.bf16.mxu0 %v5936_v55 }
 0x1f8   : > { %4056 = vmatprep.subr.bf16.mxu1 %v5939_v56 }
 0x1fa   : > { %4016 = vmatpush1.bf16.msra.mxu0 %v5934_v57 }
 0x1fb   : > { %4057 = vmatpush1.bf16.msra.mxu1 %v5937_v58  ;;  %4017 = vmatprep.subr.bf16.mxu0 %v5942_v61 }
 0x1fc   : > { %4058 = vmatprep.subr.bf16.mxu1 %v5945_v62 }
 0x1fe   : > { %4018 = vmatpush1.bf16.msra.mxu0 %v5940_v17 }
 0x1ff   : > { %4059 = vmatpush1.bf16.msra.mxu1 %v5943_v18  ;;  %4019 = vmatprep.subr.bf16.mxu0 %v5948_v63  ;;  %v287_v18 = vld [vmem:[#allocation2 + $0x10] sm:$0xff] }
 0x200   : > { %4060 = vmatprep.subr.bf16.mxu1 %v5951_v0 }
 0x202   : > { %4020 = vmatpush1.bf16.msra.mxu0 %v5946_v41 }
 0x203   : > { %4061 = vmatpush1.bf16.msra.mxu1 %v5949_v25  ;;  %4021 = vmatprep.subr.bf16.mxu0 %v5954_v26  ;;  %v288_v26 = vld [vmem:[#allocation2 + $0x18] sm:$0xff] }
 0x204   : > { %4062 = vmatprep.subr.bf16.mxu1 %v5957_v1 }
 0x206   : > { %4022 = vmatpush1.bf16.msra.mxu0 %v5952_v2 }
 0x207   : > { %4063 = vmatpush1.bf16.msra.mxu1 %v5955_v3  ;;  %4023 = vmatprep.subr.bf16.mxu0 %v5960_v29 }
 0x208   : > { %4064 = vmatprep.subr.bf16.mxu1 %v5963_v32 }
 0x20a   : > { %4024 = vmatpush1.bf16.msra.mxu0 %v5958_v5  ;;  %v5982_v5 = vld [vmem:[%s6858_s3 + $0x40] sm:$0xff] (!%p5091_p7)  }
 0x20b   : > { %4065 = vmatpush1.bf16.msra.mxu1 %v5961_v6  ;;  %4025 = vmatprep.subr.bf16.mxu0 %v5966_v48  ;;  %v5983_v6 = vld [vmem:[%s6858_s3 + $0xc0] sm:$0xff] (!%p5091_p7)  }
 0x20c   : > { %4066 = vmatprep.subr.bf16.mxu1 %v5969_v9  ;;  %v5984_v48 = vld [vmem:[%s6858_s3] sm:$0xff] (!%p5091_p7)  }
 0x20d   : > { %v5985_v9 = vld [vmem:[%s6858_s3 + $0x80] sm:$0xff] (!%p5091_p7)  }
 0x20e   : > { %4026 = vmatpush1.bf16.msra.mxu0 %v5964_v52  ;;  %v5986_v52 = vld [vmem:[%s6858_s3 + $0x48] sm:$0xff] (!%p5091_p7)  }
 0x20f   : > { %4067 = vmatpush1.bf16.msra.mxu1 %v5967_v10  ;;  %4027 = vmatprep.subr.bf16.mxu0 %v5972_v39  ;;  %v5987_v10 = vld [vmem:[%s6858_s3 + $0xc8] sm:$0xff] (!%p5091_p7)  }
 0x210   : > { %4068 = vmatprep.subr.bf16.mxu1 %v5975_v40  ;;  %v5988_v39 = vld [vmem:[%s6858_s3 + $0x8] sm:$0xff] (!%p5091_p7)  }
 0x211   : > { %v5989_v40 = vld [vmem:[%s6858_s3 + $0x88] sm:$0xff] (!%p5091_p7)  }
 0x212   : > { %4028 = vmatpush1.bf16.msra.mxu0 %v5970_v11  ;;  %v5990_v11 = vld [vmem:[%s6858_s3 + $0x50] sm:$0xff] (!%p5091_p7)  }
 0x213   : > { %4069 = vmatpush1.bf16.msra.mxu1 %v5973_v12  ;;  %4029 = vmatprep.subr.bf16.mxu0 %v5978_v13  ;;  %v5991_v12 = vld [vmem:[%s6858_s3 + $0xd0] sm:$0xff] (!%p5091_p7)  }
 0x214   : > { %4070 = vmatprep.subr.bf16.mxu1 %v5981_v23  ;;  %v5992_v13 = vld [vmem:[%s6858_s3 + $0x10] sm:$0xff] (!%p5091_p7)  }
 0x215   : > { %v5993_v23 = vld [vmem:[%s6858_s3 + $0x90] sm:$0xff] (!%p5091_p7)  }
 0x216   : > { %4030 = vmatpush1.bf16.msra.mxu0 %v5976_v24  ;;  %v5994_v24 = vld [vmem:[%s6858_s3 + $0x58] sm:$0xff] (!%p5091_p7)  }
 0x217   : > { %4071 = vmatpush1.bf16.msra.mxu1 %v5979_v14  ;;  %5129 = vmatprep.subr.bf16.mxu0 (!%p5091_p7), %v5982_v5  ;;  %v5995_v14 = vld [vmem:[%s6858_s3 + $0xd8] sm:$0xff] (!%p5091_p7)  }
 0x218   : > { %5151 = vmatprep.subr.bf16.mxu1 (!%p5091_p7), %v5983_v6 }
 0x219   : > { %4032 = vmatmul.mubr.bf16.vlgmr.msra.gmra.mrb[28].mxu0 %v6444_v59 }
 0x21a   : > { %4073 = vmatmul.mubr.bf16.vlgmr.msra.gmra.mrb[28].mxu1 %v6448_v60  ;;  %5130 = vmatpush3.bf16.msra.mxu0 (!%p5091_p7), %v5984_v48 }
 0x21b   : > { %5152 = vmatpush3.bf16.msra.mxu1 (!%p5091_p7), %v5985_v9  ;;  %5131 = vmatprep.subr.bf16.mxu0 (!%p5091_p7), %v5986_v52 }
 0x21c   : > { %5153 = vmatprep.subr.bf16.mxu1 (!%p5091_p7), %v5987_v10 }
 0x21e   : > { %5132 = vmatpush3.bf16.msra.mxu0 (!%p5091_p7), %v5988_v39 }
 0x21f   : > { %5154 = vmatpush3.bf16.msra.mxu1 (!%p5091_p7), %v5989_v40  ;;  %5133 = vmatprep.subr.bf16.mxu0 (!%p5091_p7), %v5990_v11 }
 0x220   : > { %5155 = vmatprep.subr.bf16.mxu1 (!%p5091_p7), %v5991_v12 }
 0x222   : > { %5134 = vmatpush3.bf16.msra.mxu0 (!%p5091_p7), %v5992_v13 }
 0x223   : > { %5156 = vmatpush3.bf16.msra.mxu1 (!%p5091_p7), %v5993_v23  ;;  %5135 = vmatprep.subr.bf16.mxu0 (!%p5091_p7), %v5994_v24 }
 0x224   : > { %5157 = vmatprep.subr.bf16.mxu1 (!%p5091_p7), %v5995_v14 }
 0x22c   : > { %v3787_v15 = vpop.f32.mrb[16].mxu0 }
 0x22d   : > { %v3828_v16 = vpop.f32.mrb[16].mxu1  ;;  %v3789_v20 = vpop.f32.mrb[17].mxu0 }
 0x22e   : > { %v3829_v19 = vadd.f32 %v3828_v16, %v3787_v15  ;;  %v3830_v22 = vpop.f32.mrb[17].mxu1  ;;  %v3791_v42 = vpop.f32.mrb[18].mxu0  ;;  %v5996_v15 = vld [vmem:[%s6858_s3 + $0x18] sm:$0xff] (!%p5091_p7)  }
 0x22f   : > { %v3831_v27 = vadd.f32 %v3830_v22, %v3789_v20  ;;  %v3832_v4 = vpop.f32.mrb[18].mxu1  ;;  %v3792_v30 = vpop.f32.mrb[19].mxu0  ;;  %v5997_v16 = vld [vmem:[%s6858_s3 + $0x98] sm:$0xff] (!%p5091_p7)   ;;  %5136 = vmatpush3.bf16.msra.mxu0 (!%p5091_p7), %v5996_v15  ;;  %v5999_v20 = vld [vmem:[%s6858_s3 + $0xe0] sm:$0xff] (!%p5091_p7)  }
 0x230   : > { %v3833_v31 = vpop.f32.mrb[19].mxu1  ;;  %5158 = vmatpush3.bf16.msra.mxu1 (!%p5091_p7), %v5997_v16  ;;  %v6000_v22 = vld [vmem:[%s6858_s3 + $0x20] sm:$0xff] (!%p5091_p7)   ;;  %v6002_v4 = vld [vmem:[%s6858_s3 + $0x68] sm:$0xff] (!%p5091_p7)  }
 0x231   : > { %5159 = vmatprep.subr.bf16.mxu1 (!%p5091_p7), %v5999_v20  ;;  %v6001_v42 = vld [vmem:[%s6858_s3 + $0xa0] sm:$0xff] (!%p5091_p7)   ;;  %v6003_v30 = vld [vmem:[%s6858_s3 + $0xe8] sm:$0xff] (!%p5091_p7)  }
 0x232   : > { %v6004_v31 = vld [vmem:[%s6858_s3 + $0x28] sm:$0xff] (!%p5091_p7)  }
 0x234   : > { %5160 = vmatpush3.bf16.msra.mxu1 (!%p5091_p7), %v6001_v42 }
 0x235   : > { %5161 = vmatprep.subr.bf16.mxu1 (!%p5091_p7), %v6003_v30 }
 0x26c   : > { %v3869_v33 = vpop.f32.mrb[20].mxu0 }
 0x26d   : > { %v3910_v34 = vpop.f32.mrb[20].mxu1  ;;  %v3870_v7 = vadd.f32 %v3869_v33, %v3829_v19  ;;  %v3871_v8 = vpop.f32.mrb[21].mxu0  ;;  %v5998_v19 = vld [vmem:[%s6858_s3 + $0x60] sm:$0xff] (!%p5091_p7)  }
 0x26e   : > { %v3912_v35 = vpop.f32.mrb[21].mxu1  ;;  %v3872_v36 = vadd.f32 %v3871_v8, %v3831_v27  ;;  %v3873_v43 = vpop.f32.mrb[22].mxu0  ;;  %5137 = vmatprep.subr.bf16.mxu0 (!%p5091_p7), %v5998_v19  ;;  %v4099_v27 = vlaneseq (!%p5091_p7)  ;;  %v6007_v8 = vld [vmem:[%s6858_s3 + $0xf0] sm:$0xff] (!%p5091_p7)  }
 0x26f   : > { %v3914_v59 = vpop.f32.mrb[22].mxu1  ;;  %v3911_v37 = vadd.f32 %v3910_v34, %v3870_v7  ;;  %v3874_v60 = vpop.f32.mrb[23].mxu0  ;;  %5138 = vmatpush3.bf16.msra.mxu0 (!%p5091_p7), %v6000_v22  ;;  %v6005_v34 = vld [vmem:[%s6858_s3 + $0xa8] sm:$0xff] (!%p5091_p7)   ;;  %v6006_v7 = vld [vmem:[%s6858_s3 + $0x70] sm:$0xff] (!%p5091_p7)  }
 0x270   : > { %v3915_v38 = vpop.f32.mrb[23].mxu1  ;;  %v3913_v44 = vadd.f32 %v3912_v35, %v3872_v36  ;;  %5139 = vmatprep.subr.bf16.mxu0 (!%p5091_p7), %v6002_v4  ;;  %v4100_v33 = vshrl.u32 (!%p5091_p7), %v4099_v27, 7  ;;  %5162 = vmatpush3.bf16.msra.mxu1 (!%p5091_p7), %v6005_v34  ;;  %v6008_v35 = vld [vmem:[%s6858_s3 + $0x30] sm:$0xff] (!%p5091_p7)  }
 0x271   : > { %5163 = vmatprep.subr.bf16.mxu1 (!%p5091_p7), %v6007_v8  ;;  %v6009_v43 = vld [vmem:[%s6858_s3 + $0xb0] sm:$0xff] (!%p5091_p7)   ;;  %v6011_v38 = vld [vmem:[%s6858_s3 + $0xf8] sm:$0xff] (!%p5091_p7)  }
 0x272   : > { %v4105_v36 = vsub.s32 (!%p5091_p7), 1, %v4100_v33  ;;  %v4113_v59 = vsub.s32 (!%p5091_p7), 3, %v4100_v33  ;;  %v4101_v60 = vsub.s32 (!%p5091_p7), 0, %v4100_v33 }
 0x273   : > { %5140 = vmatpush3.bf16.msra.mxu0 (!%p5091_p7), %v6004_v31 }
 0x274   : > { %5141 = vmatprep.subr.bf16.mxu0 (!%p5091_p7), %v6006_v7  ;;  %5164 = vmatpush3.bf16.msra.mxu1 (!%p5091_p7), %v6009_v43 }
 0x275   : > { %5165 = vmatprep.subr.bf16.mxu1 (!%p5091_p7), %v6011_v38 }
 0x277   : > { %5142 = vmatpush3.bf16.msra.mxu0 (!%p5091_p7), %v6008_v35 }
 0x2ac   : > { %v3951_v45 = vpop.f32.mrb[24].mxu0 }
 0x2ad   : > { %v3992_v46 = vpop.f32.mrb[24].mxu1  ;;  %v3952_v21 = vadd.f32 %v3951_v45, %v3911_v37  ;;  %v3953_v47 = vpop.f32.mrb[25].mxu0  ;;  %v6010_v37 = vld [vmem:[%s6858_s3 + $0x78] sm:$0xff] (!%p5091_p7)  }
 0x2ae   : > { %v3994_v49 = vpop.f32.mrb[25].mxu1  ;;  %v3954_v50 = vadd.f32 %v3953_v47, %v3913_v44  ;;  %v3955_v28 = vpop.f32.mrb[26].mxu0  ;;  %v4109_v44 = vsub.s32 (!%p5091_p7), 2, %v4100_v33  ;;  %5143 = vmatprep.subr.bf16.mxu0 (!%p5091_p7), %v6010_v37  ;;  %v6012_v45 = vld [vmem:[%s6858_s3 + $0x38] sm:$0xff] (!%p5091_p7)   ;;  %v4097_v47 = vld [vmem:[%s6857_s2] sm:$0xf] (!%p5091_p7) }
 0x2af   : > { %v3996_v51 = vpop.f32.mrb[26].mxu1  ;;  %v3993_v53 = vadd.f32 %v3992_v46, %v3952_v21  ;;  %v3956_v54 = vpop.f32.mrb[27].mxu0  ;;  %v6013_v46 = vld [vmem:[%s6858_s3 + $0xb8] sm:$0xff] (!%p5091_p7)   ;;  %5144 = vmatpush3.bf16.msra.mxu0 (!%p5091_p7), %v6012_v45  ;;  %v4094_v21 = vld [vmem:[#allocation2 + $0x8] sm:$0xff] (!%p5091_p7)  ;;  %v4114_v28 = vrot.slane (!%p5091_p7), %v4097_v47, %v4113_v59 }
 0x2b0   : > { %v3997_v55 = vpop.f32.mrb[27].mxu1  ;;  %v3995_v56 = vadd.f32 %v3994_v49, %v3954_v50  ;;  %5166 = vmatpush3.bf16.msra.mxu1 (!%p5091_p7), %v6013_v46  ;;  %v4106_v50 = vrot.slane (!%p5091_p7), %v4097_v47, %v4105_v36  ;;  %v4093_v51 = vld [vmem:[#allocation2] sm:$0xff] (!%p5091_p7) }
 0x2b1   : > { %v4110_v55 = vrot.slane (!%p5091_p7), %v4097_v47, %v4109_v44 }
 0x2ec   : > { %v4033_v57 = vpop.f32.mrb[28].mxu0 }
 0x2ed   : > { %v4074_v58 = vpop.f32.mrb[28].mxu1  ;;  %v4034_v61 = vadd.f32 %v4033_v57, %v3993_v53  ;;  %v4035_v62 = vpop.f32.mrb[29].mxu0  ;;  %v4102_v53 = vrot.slane (!%p5091_p7), %v4097_v47, %v4101_v60 }
 0x2ee   : > { %v4076_v17 = vpop.f32.mrb[29].mxu1  ;;  %v4036_v63 = vadd.f32 %v4035_v62, %v3995_v56  ;;  %v4037_v0 = vpop.f32.mrb[30].mxu0  ;;  %4092 = sbr.rel (%p5091_p7) target bundleno = 989 (0x3dd), region = 48  ;;  %v4120_v56 = vadd.f32 (!%p5091_p7), %v4106_v50, %v4094_v21 }
 0x2ef   : > { %v4078_v41 = vpop.f32.mrb[30].mxu1  ;;  %v4075_v25 = vadd.f32 %v4074_v58, %v4034_v61  ;;  %v4038_v1 = vpop.f32.mrb[31].mxu0  ;;  %v4119_v58 = vadd.f32 (!%p5091_p7), %v4102_v53, %v4093_v51 }
 0x2f0   : > { %v4079_v2 = vpop.f32.mrb[31].mxu1  ;;  %v4077_v3 = vadd.f32 %v4076_v17, %v4036_v63  ;;  %v4124_v62 = vmax.f32 (!%p5091_p7), %v4120_v56, 0.0 }
 0x2f1   : > { %v4083_v29 = vadd.f32 %v4075_v25, %v287_v18  ;;  %v4123_v18 = vmax.f32 (!%p5091_p7), %v4119_v58, 0.0 }
 0x2f2   : > { %v4084_v32 = vadd.f32 %v4077_v3, %v288_v26  ;;  %v4128_v0 = vpack.c.bf16 (!%p5091_p7), %v4124_v62, %v4124_v62  ;;  %v5092_v3 = vld [vmem:[%s6859_s4] ss:$0 sm:$0xff] (!%p5091_p7) }
 0x2f3   : > { %4087 = vst [vmem:[#allocation2 + $0x10] sm:$0xff] %v4083_v29  ;;  %v4127_v25 = vpack.c.bf16 (!%p5091_p7), %v4123_v18, %v4123_v18 }
 0x2f4   : > { %4088 = vst [vmem:[#allocation2 + $0x18] sm:$0xff] %v4084_v32  ;;  %4426 = vmatprep.mubr.bf16.mxu0 (!%p5091_p7), %v4128_v0 }
 0x2f5   : > { %4427 = vmatmul.mubr.bf16.vlgmr.msra.gmra.mrb[0].mxu0 %v4127_v25 }
 0x2fa   : > { %v4095_v54 = vld [vmem:[#allocation2 + $0x10] sm:$0xff] }
 0x2fb   : > { %v4096_v49 = vld [vmem:[#allocation2 + $0x18] sm:$0xff]  ;;  %v4121_v61 = vadd.f32 %v4110_v55, %v4095_v54 }
 0x2fc   : > { %v4122_v57 = vadd.f32 %v4114_v28, %v4096_v49 }
 0x2fd   : > { %v4125_v63 = vmax.f32 %v4121_v61, 0.0 }
 0x2fe   : > { %v4126_v17 = vmax.f32 %v4122_v57, 0.0 }
 0x2ff   : > { %v4129_v26 = vpack.c.bf16 %v4125_v63, %v4125_v63 }
 0x300   : > { %v4130_v41 = vpack.c.bf16 %v4126_v17, %v4126_v17 }
 0x302   : > { %4466 = vmatprep.mubr.bf16.mxu1 %v4130_v41 }
 0x303   : > { %4467 = vmatmul.mubr.bf16.vlgmr.msra.gmra.mrb[0].mxu1 %v4129_v26 }
 0x3c8   : > { %v5145_v1 = vpop.f32.mrb[0].mxu0 }
 0x3c9   : > { %v5146_v29 = vpop.f32.mrb[1].mxu0 }
 0x3ca   : > { %v5147_v5 = vadd.f32 %v5146_v29, %v5145_v1  ;;  %v5148_v48 = vpop.f32.mrb[2].mxu0 }
 0x3cb   : > { %v5149_v52 = vpop.f32.mrb[3].mxu0 }
 0x3cc   : > { %v4429_v39 = vadd.f32 %v5147_v5, %v5092_v3 }
 0x3d6   : > { %v5167_v2 = vpop.f32.mrb[0].mxu1 }
 0x3d7   : > { %v5168_v32 = vpop.f32.mrb[1].mxu1 }
 0x3d8   : > { %v5169_v6 = vadd.f32 %v5168_v32, %v5167_v2  ;;  %v5170_v9 = vpop.f32.mrb[2].mxu1 }
 0x3d9   : > { %v5171_v10 = vpop.f32.mrb[3].mxu1 }
 0x3da   : > { %v4469_v40 = vadd.f32 %v5169_v6, %v4429_v39 }
 0x3dc   : > { %4475 = vst.msk [vmem:[%s6860_s5] sm:$0xff] %vm4474_vm0, %v4469_v40 }
 0x3dd PF: > { %s15_s20 = sadd.s32 1, %s6036_s20   ;;  %s6861_s18 = smov %s6032_s19 }
 0x3de   : > { %p12_p8 = scmp.ge.s32.totalorder %s15_s20, 4   ;;  %s6862_s19 = smov %s6864_s21 }
 0x3e0   :  { %14 = sbr.rel (!%p12_p8) target bundleno = 2 (0x2), region = 81 }

</bundles_post_ra>
